<compile_context>
chip_gen: v6e
topology: v6e:2x2x1
jax: 0.10.0
libtpu: 0.0.40
codegen_flags: <defaults>
</compile_context>

<pallas_src>
import functools

import jax
import jax.numpy as jnp
from jax import lax
from jax.experimental import pallas as pl
from jax.experimental.pallas import tpu as pltpu


LANE = 128                    # lane-dense output width of every kernel
CPP = LANE // 4               # per-phase lane block (max Cout supported = 32)
_EPS = 1e-5                   # PyTorch BatchNorm2d default
VMEM_LIMIT = 32 * 1024 * 1024


# ----------------------------------------------------------------------------
# Pallas kernels
# ----------------------------------------------------------------------------
def _linear_bn_relu_kernel(z_ref, w_ref, b_ref, g_ref, bb_ref, o_ref,
                           *, eps, inv_cnt, groups):
    """Fused Linear -> BatchNorm(train) -> ReLU.

    z:[N,K] bf16, w:[K,groups*128] bf16 (columns ordered (h,w,c_pad128)),
    b:[1,groups*128] f32, g/bb:[1,128] f32 per-channel BN affine.
    Channel c lives at lanes {g*128 + c}; stats merge the `groups` lane-tiles
    with 128-aligned static slices (cheap, no relayout).
    """
    x = jnp.dot(z_ref[...], w_ref[...],
                preferred_element_type=jnp.float32) + b_ref[...]
    s = jnp.sum(x, axis=0, keepdims=True)
    ss = jnp.sum(x * x, axis=0, keepdims=True)
    s128 = s[:, 0:LANE]
    ss128 = ss[:, 0:LANE]
    for g in range(1, groups):
        s128 = s128 + s[:, g * LANE:(g + 1) * LANE]
        ss128 = ss128 + ss[:, g * LANE:(g + 1) * LANE]
    mean = s128 * inv_cnt
    var = ss128 * inv_cnt - mean * mean                 # biased (train mode)
    scale = g_ref[...] * lax.rsqrt(var + eps)
    shift = bb_ref[...] - mean * scale
    scale_t = jnp.concatenate([scale] * groups, axis=1)
    shift_t = jnp.concatenate([shift] * groups, axis=1)
    o_ref[...] = jnp.maximum(x * scale_t + shift_t, 0.0).astype(o_ref.dtype)


def linear_bn_relu(z, w, b, gamma, beta):
    n, k = z.shape
    f = w.shape[1]
    groups = f // LANE
    return pl.pallas_call(
        functools.partial(_linear_bn_relu_kernel, eps=_EPS,
                          inv_cnt=1.0 / float(n * groups), groups=groups),
        out_shape=jax.ShapeDtypeStruct((n, f), jnp.bfloat16),
        grid_spec=pltpu.PrefetchScalarGridSpec(
            num_scalar_prefetch=0,
            grid=(1,),
            in_specs=[
                pl.BlockSpec((n, k), lambda i: (0, 0)),
                pl.BlockSpec((k, f), lambda i: (0, 0)),
                pl.BlockSpec((1, f), lambda i: (0, 0)),
                pl.BlockSpec((1, LANE), lambda i: (0, 0)),
                pl.BlockSpec((1, LANE), lambda i: (0, 0)),
            ],
            out_specs=pl.BlockSpec((n, f), lambda i: (0, 0)),
        ),
        compiler_params=pltpu.CompilerParams(
            dimension_semantics=("arbitrary",), vmem_limit_bytes=VMEM_LIMIT),
    )(z, w, b, gamma, beta)


def _convt_bn_relu_kernel(p_ref, w_ref, pm_ref, g_ref, b_ref, o_ref,
                          *, eps, inv_cnt):
    """Fused merged-3x3-window ConvTranspose + BatchNorm(train) + ReLU.

    p:[M,9*Cin] bf16 patches, w:[9*Cin,128] bf16 (lane = phase*32 + cout),
    pm:[128,128] f32 0/1 phase-merge matrix (sums the 4 phase lane-blocks per
    channel and re-broadcasts), g/b:[1,128] f32 pre-tiled BN affine.
    One matmul, stats and normalize on the resident f32 result, single bf16
    lane-dense store.  Conv bias omitted (cancelled by the mean subtraction).
    """
    x = jnp.dot(p_ref[...], w_ref[...], preferred_element_type=jnp.float32)
    s = jnp.sum(x, axis=0, keepdims=True)
    ss = jnp.sum(x * x, axis=0, keepdims=True)
    stats = jnp.concatenate([s, ss], axis=0)             # [2,128]
    merged = jnp.dot(stats, pm_ref[...],
                     preferred_element_type=jnp.float32)  # phase-merged, tiled
    mean = merged[0:1, :] * inv_cnt
    var = merged[1:2, :] * inv_cnt - mean * mean          # biased (train mode)
    scale = g_ref[...] * lax.rsqrt(var + eps)
    shift = b_ref[...] - mean * scale
    o_ref[...] = jnp.maximum(x * scale + shift, 0.0).astype(o_ref.dtype)


def convt_bn_relu(patches, w, pm, gamma, beta):
    m, kp = patches.shape
    return pl.pallas_call(
        functools.partial(_convt_bn_relu_kernel, eps=_EPS,
                          inv_cnt=1.0 / float(4 * m)),
        out_shape=jax.ShapeDtypeStruct((m, LANE), jnp.bfloat16),
        grid_spec=pltpu.PrefetchScalarGridSpec(
            num_scalar_prefetch=0,
            grid=(1,),
            in_specs=[
                pl.BlockSpec((m, kp), lambda i: (0, 0)),
                pl.BlockSpec((kp, LANE), lambda i: (0, 0)),
                pl.BlockSpec((LANE, LANE), lambda i: (0, 0)),
                pl.BlockSpec((1, LANE), lambda i: (0, 0)),
                pl.BlockSpec((1, LANE), lambda i: (0, 0)),
            ],
            out_specs=pl.BlockSpec((m, LANE), lambda i: (0, 0)),
        ),
        compiler_params=pltpu.CompilerParams(
            dimension_semantics=("arbitrary",), vmem_limit_bytes=VMEM_LIMIT),
    )(patches, w, pm, gamma, beta)


def _convt_tanh_kernel(p_ref, w_ref, b_ref, o_ref):
    x = jnp.dot(p_ref[...], w_ref[...],
                preferred_element_type=jnp.float32) + b_ref[...]
    o_ref[...] = jnp.tanh(x)


def convt_tanh(patches, w, bias, tm=256):
    """Final merged-3x3-window ConvTranspose + bias + tanh, gridded over M
    tiles (parallel -> pipelined DMA, shardable across v7x's 2 cores)."""
    m, kp = patches.shape
    tm = min(tm, m)
    while m % tm:
        tm //= 2
    return pl.pallas_call(
        _convt_tanh_kernel,
        out_shape=jax.ShapeDtypeStruct((m, LANE), jnp.float32),
        grid_spec=pltpu.PrefetchScalarGridSpec(
            num_scalar_prefetch=0,
            grid=(m // tm,),
            in_specs=[
                pl.BlockSpec((tm, kp), lambda i: (i, 0)),
                pl.BlockSpec((kp, LANE), lambda i: (0, 0)),
                pl.BlockSpec((1, LANE), lambda i: (0, 0)),
            ],
            out_specs=pl.BlockSpec((tm, LANE), lambda i: (i, 0)),
        ),
        compiler_params=pltpu.CompilerParams(
            dimension_semantics=("parallel",), vmem_limit_bytes=VMEM_LIMIT),
    )(patches, w, bias)


# ----------------------------------------------------------------------------
# ConvTranspose2d(k=4, s=2, p=1) merged 3x3-window decomposition — JAX glue
# ----------------------------------------------------------------------------
def convT_merged_weights(w):
    """PyTorch ConvTranspose2d weight [Cin,Cout,4,4] -> [9*Cin, 128] bf16.

    Output pixel (2p+py, 2q+px) = sum over the 3x3 input window centered at p,q
    (window tap (wy,wx) = input pixel (p+wy-1, q+wx-1)); phase (py,px) only
    reads taps with wy-py, wx-px in {0,1} using kernel entry
    kh = 3+py-2*wy, kw = 3+px-2*wx.  Lanes packed as phase*32 + cout."""
    cin, cout, _, _ = w.shape
    assert cout <= CPP
    wm = jnp.zeros((3, 3, cin, 4 * CPP), jnp.float32)
    for wy in range(3):
        for wx in range(3):
            for py in range(2):
                for px in range(2):
                    dy, dx = wy - py, wx - px
                    if dy in (0, 1) and dx in (0, 1):
                        kh, kw = 3 + py - 2 * wy, 3 + px - 2 * wx
                        ph = 2 * py + px
                        wm = wm.at[wy, wx, :, ph * CPP:ph * CPP + cout].set(
                            w[:, :, kh, kw])
    return wm.reshape(9 * cin, 4 * CPP).astype(jnp.bfloat16)


def tile_per_channel(v, cout):
    """Per-channel vector [cout] -> [1,128] in the (phase, cout) lane layout."""
    row = jnp.zeros((LANE,), jnp.float32)
    for ph in range(4):
        row = row.at[ph * CPP:ph * CPP + cout].set(v)
    return row.reshape(1, LANE)


def window_patches(x):
    """x:[N,H,W,Cin] -> patches:[N*H*W, 9*Cin] (3x3 window, zero-padded)."""
    n, h, w, c = x.shape
    xp = jnp.pad(x, ((0, 0), (1, 1), (1, 1), (0, 0)))
    taps = [xp[:, wy:wy + h, wx:wx + w, :]
            for wy in range(3) for wx in range(3)]
    patches = jnp.concatenate(taps, axis=-1).reshape(n * h * w, 9 * c)
    return patches, (n, h, w)


def interleave_merged(y, n, h, w, cout):
    """[N*H*W, 128] (lane = phase*32 + c) -> [N, 2H, 2W, cout] NHWC."""
    y = y.reshape(n, h, w, 2, 2, CPP)            # (n, p, q, py, px, c)
    y = jnp.transpose(y, (0, 1, 3, 2, 4, 5))     # (n, p, py, q, px, c)
    y = y.reshape(n, 2 * h, 2 * w, CPP)
    return y[..., :cout]


# ----------------------------------------------------------------------------
# Parameters & forward
# ----------------------------------------------------------------------------
def make_params(key, noise_dim, fcs, out_ch):
    c0 = fcs * 8
    chans = [c0, fcs * 4, fcs * 2, fcs, out_ch]
    assert c0 <= LANE and max(chans[1:]) <= CPP, "channel counts exceed lane packing"
    keys = jax.random.split(key, 16)
    p = {"c0": c0, "chans": chans}

    # Linear(noise_dim -> c0*4*4): columns re-laid-out to (h, w, c_pad128) so
    # the matmul output is directly the channels-last, lane-dense BN view.
    wlin = 0.05 * jax.random.normal(keys[0], (noise_dim, c0, 4, 4), jnp.float32)
    blin = 0.01 * jax.random.normal(keys[1], (c0, 4, 4), jnp.float32)
    wlin = jnp.pad(jnp.transpose(wlin, (0, 2, 3, 1)),
                   ((0, 0), (0, 0), (0, 0), (0, LANE - c0)))
    p["lin_w"] = wlin.reshape(noise_dim, 4 * 4 * LANE).astype(jnp.bfloat16)
    blin = jnp.pad(jnp.transpose(blin, (1, 2, 0)),
                   ((0, 0), (0, 0), (0, LANE - c0)))
    p["lin_b"] = blin.reshape(1, 4 * 4 * LANE)
    p["bn0_g"] = jnp.pad(jnp.ones((c0,), jnp.float32), (0, LANE - c0)).reshape(1, LANE)
    p["bn0_b"] = jnp.zeros((1, LANE), jnp.float32)

    # phase-merge matrix: sums the 4 phase lane-blocks per channel and
    # re-broadcasts (used only for BN statistics, exact 0/1 values).
    lanes = jnp.arange(LANE)
    p["pm"] = (lanes[:, None] % CPP == lanes[None, :] % CPP).astype(jnp.float32)

    for i in range(4):
        cin, cout = chans[i], chans[i + 1]
        w = 0.05 * jax.random.normal(keys[2 + 2 * i], (cin, cout, 4, 4), jnp.float32)
        p[f"conv{i}_w"] = convT_merged_weights(w)
        if i < 3:
            # Per-channel conv bias before train-mode BatchNorm is exactly
            # cancelled by the mean subtraction -> omitted (no-op).
            p[f"bn{i + 1}_g"] = tile_per_channel(jnp.ones((cout,), jnp.float32), cout)
            p[f"bn{i + 1}_b"] = jnp.zeros((1, LANE), jnp.float32)
        else:
            b = 0.01 * jax.random.normal(keys[3 + 2 * i], (cout,), jnp.float32)
            p["conv3_b"] = tile_per_channel(b, cout)
    return p


def generator_forward(z, params):
    n = z.shape[0]
    c0 = params["c0"]
    chans = params["chans"]

    # Fused Linear -> BN -> ReLU head.  Output columns are (h,w,c_pad128)
    # ordered, so the reshape to NHWC is free (row-major, 128-lane dense).
    h = linear_bn_relu(z.astype(jnp.bfloat16), params["lin_w"], params["lin_b"],
                       params["bn0_g"], params["bn0_b"])       # [N, 4*4*128] bf16
    x = h.reshape(n, 4, 4, LANE)[..., :c0]                     # [N,4,4,c0] NHWC
    # TODO(synk): BatchNorm running_mean/running_var buffers are not tracked
    # (they do not affect the training-mode forward output).

    # three fused (ConvTranspose2d + BN + ReLU) upsampling layers
    for i in range(3):
        patches, (nn_, hh, ww) = window_patches(x)
        y = convt_bn_relu(patches, params[f"conv{i}_w"], params["pm"],
                          params[f"bn{i + 1}_g"], params[f"bn{i + 1}_b"])
        x = interleave_merged(y, nn_, hh, ww, chans[i + 1])

    # final ConvTranspose2d + bias + Tanh
    patches, (nn_, hh, ww) = window_patches(x)
    y = convt_tanh(patches, params["conv3_w"], params["conv3_b"])
    out_nhwc = interleave_merged(y, nn_, hh, ww, chans[4])     # [N,64,64,3]
    return jnp.transpose(out_nhwc, (0, 3, 1, 2))               # NCHW


# ----------------------------------------------------------------------------
if __name__ == "__main__":
    batch = 2
    noise_dim = 8
    final_conv_size = 4
    output_channels = 3

    key = jax.random.PRNGKey(0)
    k_param, k_noise = jax.random.split(key)
    params = make_params(k_param, noise_dim, final_conv_size, output_channels)
    z = jax.random.normal(k_noise, (batch, noise_dim), jnp.float32)

    fwd = jax.jit(functools.partial(generator_forward, params=params))
    out = fwd(z)                         # expected [2, 3, 64, 64] NCHW
    jax.block_until_ready(out)
    assert out.shape == (batch, output_channels, 64, 64), out.shape
    assert bool(jnp.all(jnp.isfinite(out)))
    print("KERNEL_OK")
</pallas_src>

<mosaic_0001>
module attributes {stable_mosaic.version = 11 : i64} {
  func.func @_linear_bn_relu_kernel(%arg0: i32, %arg1: memref<2x8xbf16, #tpu.memory_space<vmem>>, %arg2: memref<8x2048xbf16, #tpu.memory_space<vmem>>, %arg3: memref<1x2048xf32, #tpu.memory_space<vmem>>, %arg4: memref<1x128xf32, #tpu.memory_space<vmem>>, %arg5: memref<1x128xf32, #tpu.memory_space<vmem>>, %arg6: memref<2x2048xbf16, #tpu.memory_space<vmem>>) attributes {dimension_semantics = [#tpu.dimension_semantics<arbitrary>], iteration_bounds = array<i64: 1>, scalar_prefetch = 0 : i64, scratch_operands = 0 : i64, tpu.core_type = #tpu.core_type<tc>, window_params = [{pipeline_mode = #tpu.pipeline_mode<synchronous>, transform_indices = @transform_0, window_bounds = array<i64: 2, 8>}, {pipeline_mode = #tpu.pipeline_mode<synchronous>, transform_indices = @transform_1, window_bounds = array<i64: 8, 2048>}, {pipeline_mode = #tpu.pipeline_mode<synchronous>, transform_indices = @transform_2, window_bounds = array<i64: 1, 2048>}, {pipeline_mode = #tpu.pipeline_mode<synchronous>, transform_indices = @transform_3, window_bounds = array<i64: 1, 128>}, {pipeline_mode = #tpu.pipeline_mode<synchronous>, transform_indices = @transform_4, window_bounds = array<i64: 1, 128>}, {pipeline_mode = #tpu.pipeline_mode<synchronous>, transform_indices = @transform_5, window_bounds = array<i64: 2, 2048>}]} {
    %c0 = arith.constant 0 : index
    %c0_0 = arith.constant 0 : index
    %0 = vector.load %arg1[%c0, %c0_0] : memref<2x8xbf16, #tpu.memory_space<vmem>>, vector<2x8xbf16>
    %c0_1 = arith.constant 0 : index
    %c0_2 = arith.constant 0 : index
    %1 = vector.load %arg2[%c0_1, %c0_2] : memref<8x2048xbf16, #tpu.memory_space<vmem>>, vector<8x2048xbf16>
    %cst = arith.constant dense<0.000000e+00> : vector<2x2048xf32>
    %2 = tpu.matmul %0, %1, %cst {dimension_numbers = #tpu.dot_dimension_numbers<[1], [0], [0], [1], [0, 0, 1, 1], [], []>} : vector<2x8xbf16>, vector<8x2048xbf16>, vector<2x2048xf32> -> vector<2x2048xf32>
    %c0_3 = arith.constant 0 : index
    %c0_4 = arith.constant 0 : index
    %3 = vector.load %arg3[%c0_3, %c0_4] : memref<1x2048xf32, #tpu.memory_space<vmem>>, vector<1x2048xf32>
    %4 = vector.broadcast %3 : vector<1x2048xf32> to vector<2x2048xf32>
    %5 = arith.addf %2, %4 : vector<2x2048xf32>
    %cst_5 = arith.constant dense<0.000000e+00> : vector<2048xf32>
    %6 = vector.multi_reduction <add>, %5, %cst_5 [0] : vector<2x2048xf32> to vector<2048xf32>
    %7 = vector.shape_cast %6 : vector<2048xf32> to vector<1x2048xf32>
    %8 = arith.mulf %5, %5 : vector<2x2048xf32>
    %cst_6 = arith.constant dense<0.000000e+00> : vector<2048xf32>
    %9 = vector.multi_reduction <add>, %8, %cst_6 [0] : vector<2x2048xf32> to vector<2048xf32>
    %10 = vector.shape_cast %9 : vector<2048xf32> to vector<1x2048xf32>
    %11 = vector.extract_strided_slice %7 {offsets = [0, 0], sizes = [1, 128], strides = [1, 1]} : vector<1x2048xf32> to vector<1x128xf32>
    %12 = vector.extract_strided_slice %10 {offsets = [0, 0], sizes = [1, 128], strides = [1, 1]} : vector<1x2048xf32> to vector<1x128xf32>
    %13 = vector.extract_strided_slice %7 {offsets = [0, 128], sizes = [1, 128], strides = [1, 1]} : vector<1x2048xf32> to vector<1x128xf32>
    %14 = arith.addf %11, %13 : vector<1x128xf32>
    %15 = vector.extract_strided_slice %10 {offsets = [0, 128], sizes = [1, 128], strides = [1, 1]} : vector<1x2048xf32> to vector<1x128xf32>
    %16 = arith.addf %12, %15 : vector<1x128xf32>
    %17 = vector.extract_strided_slice %7 {offsets = [0, 256], sizes = [1, 128], strides = [1, 1]} : vector<1x2048xf32> to vector<1x128xf32>
    %18 = arith.addf %14, %17 : vector<1x128xf32>
    %19 = vector.extract_strided_slice %10 {offsets = [0, 256], sizes = [1, 128], strides = [1, 1]} : vector<1x2048xf32> to vector<1x128xf32>
    %20 = arith.addf %16, %19 : vector<1x128xf32>
    %21 = vector.extract_strided_slice %7 {offsets = [0, 384], sizes = [1, 128], strides = [1, 1]} : vector<1x2048xf32> to vector<1x128xf32>
    %22 = arith.addf %18, %21 : vector<1x128xf32>
    %23 = vector.extract_strided_slice %10 {offsets = [0, 384], sizes = [1, 128], strides = [1, 1]} : vector<1x2048xf32> to vector<1x128xf32>
    %24 = arith.addf %20, %23 : vector<1x128xf32>
    %25 = vector.extract_strided_slice %7 {offsets = [0, 512], sizes = [1, 128], strides = [1, 1]} : vector<1x2048xf32> to vector<1x128xf32>
    %26 = arith.addf %22, %25 : vector<1x128xf32>
    %27 = vector.extract_strided_slice %10 {offsets = [0, 512], sizes = [1, 128], strides = [1, 1]} : vector<1x2048xf32> to vector<1x128xf32>
    %28 = arith.addf %24, %27 : vector<1x128xf32>
    %29 = vector.extract_strided_slice %7 {offsets = [0, 640], sizes = [1, 128], strides = [1, 1]} : vector<1x2048xf32> to vector<1x128xf32>
    %30 = arith.addf %26, %29 : vector<1x128xf32>
    %31 = vector.extract_strided_slice %10 {offsets = [0, 640], sizes = [1, 128], strides = [1, 1]} : vector<1x2048xf32> to vector<1x128xf32>
    %32 = arith.addf %28, %31 : vector<1x128xf32>
    %33 = vector.extract_strided_slice %7 {offsets = [0, 768], sizes = [1, 128], strides = [1, 1]} : vector<1x2048xf32> to vector<1x128xf32>
    %34 = arith.addf %30, %33 : vector<1x128xf32>
    %35 = vector.extract_strided_slice %10 {offsets = [0, 768], sizes = [1, 128], strides = [1, 1]} : vector<1x2048xf32> to vector<1x128xf32>
    %36 = arith.addf %32, %35 : vector<1x128xf32>
    %37 = vector.extract_strided_slice %7 {offsets = [0, 896], sizes = [1, 128], strides = [1, 1]} : vector<1x2048xf32> to vector<1x128xf32>
    %38 = arith.addf %34, %37 : vector<1x128xf32>
    %39 = vector.extract_strided_slice %10 {offsets = [0, 896], sizes = [1, 128], strides = [1, 1]} : vector<1x2048xf32> to vector<1x128xf32>
    %40 = arith.addf %36, %39 : vector<1x128xf32>
    %41 = vector.extract_strided_slice %7 {offsets = [0, 1024], sizes = [1, 128], strides = [1, 1]} : vector<1x2048xf32> to vector<1x128xf32>
    %42 = arith.addf %38, %41 : vector<1x128xf32>
    %43 = vector.extract_strided_slice %10 {offsets = [0, 1024], sizes = [1, 128], strides = [1, 1]} : vector<1x2048xf32> to vector<1x128xf32>
    %44 = arith.addf %40, %43 : vector<1x128xf32>
    %45 = vector.extract_strided_slice %7 {offsets = [0, 1152], sizes = [1, 128], strides = [1, 1]} : vector<1x2048xf32> to vector<1x128xf32>
    %46 = arith.addf %42, %45 : vector<1x128xf32>
    %47 = vector.extract_strided_slice %10 {offsets = [0, 1152], sizes = [1, 128], strides = [1, 1]} : vector<1x2048xf32> to vector<1x128xf32>
    %48 = arith.addf %44, %47 : vector<1x128xf32>
    %49 = vector.extract_strided_slice %7 {offsets = [0, 1280], sizes = [1, 128], strides = [1, 1]} : vector<1x2048xf32> to vector<1x128xf32>
    %50 = arith.addf %46, %49 : vector<1x128xf32>
    %51 = vector.extract_strided_slice %10 {offsets = [0, 1280], sizes = [1, 128], strides = [1, 1]} : vector<1x2048xf32> to vector<1x128xf32>
    %52 = arith.addf %48, %51 : vector<1x128xf32>
    %53 = vector.extract_strided_slice %7 {offsets = [0, 1408], sizes = [1, 128], strides = [1, 1]} : vector<1x2048xf32> to vector<1x128xf32>
    %54 = arith.addf %50, %53 : vector<1x128xf32>
    %55 = vector.extract_strided_slice %10 {offsets = [0, 1408], sizes = [1, 128], strides = [1, 1]} : vector<1x2048xf32> to vector<1x128xf32>
    %56 = arith.addf %52, %55 : vector<1x128xf32>
    %57 = vector.extract_strided_slice %7 {offsets = [0, 1536], sizes = [1, 128], strides = [1, 1]} : vector<1x2048xf32> to vector<1x128xf32>
    %58 = arith.addf %54, %57 : vector<1x128xf32>
    %59 = vector.extract_strided_slice %10 {offsets = [0, 1536], sizes = [1, 128], strides = [1, 1]} : vector<1x2048xf32> to vector<1x128xf32>
    %60 = arith.addf %56, %59 : vector<1x128xf32>
    %61 = vector.extract_strided_slice %7 {offsets = [0, 1664], sizes = [1, 128], strides = [1, 1]} : vector<1x2048xf32> to vector<1x128xf32>
    %62 = arith.addf %58, %61 : vector<1x128xf32>
    %63 = vector.extract_strided_slice %10 {offsets = [0, 1664], sizes = [1, 128], strides = [1, 1]} : vector<1x2048xf32> to vector<1x128xf32>
    %64 = arith.addf %60, %63 : vector<1x128xf32>
    %65 = vector.extract_strided_slice %7 {offsets = [0, 1792], sizes = [1, 128], strides = [1, 1]} : vector<1x2048xf32> to vector<1x128xf32>
    %66 = arith.addf %62, %65 : vector<1x128xf32>
    %67 = vector.extract_strided_slice %10 {offsets = [0, 1792], sizes = [1, 128], strides = [1, 1]} : vector<1x2048xf32> to vector<1x128xf32>
    %68 = arith.addf %64, %67 : vector<1x128xf32>
    %69 = vector.extract_strided_slice %7 {offsets = [0, 1920], sizes = [1, 128], strides = [1, 1]} : vector<1x2048xf32> to vector<1x128xf32>
    %70 = arith.addf %66, %69 : vector<1x128xf32>
    %71 = vector.extract_strided_slice %10 {offsets = [0, 1920], sizes = [1, 128], strides = [1, 1]} : vector<1x2048xf32> to vector<1x128xf32>
    %72 = arith.addf %68, %71 : vector<1x128xf32>
    %cst_7 = arith.constant 3.125000e-02 : f32
    %73 = vector.broadcast %cst_7 : f32 to vector<1x128xf32>
    %74 = arith.mulf %70, %73 : vector<1x128xf32>
    %cst_8 = arith.constant 3.125000e-02 : f32
    %75 = vector.broadcast %cst_8 : f32 to vector<1x128xf32>
    %76 = arith.mulf %72, %75 : vector<1x128xf32>
    %77 = arith.mulf %74, %74 : vector<1x128xf32>
    %78 = arith.subf %76, %77 : vector<1x128xf32>
    %c0_9 = arith.constant 0 : index
    %c0_10 = arith.constant 0 : index
    %79 = vector.load %arg4[%c0_9, %c0_10] : memref<1x128xf32, #tpu.memory_space<vmem>>, vector<1x128xf32>
    %cst_11 = arith.constant 9.99999974E-6 : f32
    %80 = vector.broadcast %cst_11 : f32 to vector<1x128xf32>
    %81 = arith.addf %78, %80 : vector<1x128xf32>
    %82 = math.rsqrt %81 : vector<1x128xf32>
    %83 = arith.mulf %79, %82 : vector<1x128xf32>
    %c0_12 = arith.constant 0 : index
    %c0_13 = arith.constant 0 : index
    %84 = vector.load %arg5[%c0_12, %c0_13] : memref<1x128xf32, #tpu.memory_space<vmem>>, vector<1x128xf32>
    %85 = arith.mulf %74, %83 : vector<1x128xf32>
    %86 = arith.subf %84, %85 : vector<1x128xf32>
    %87 = tpu.concatenate %83, %83, %83, %83, %83, %83, %83, %83, %83, %83, %83, %83, %83, %83, %83, %83 in 1 : vector<1x128xf32>, vector<1x128xf32>, vector<1x128xf32>, vector<1x128xf32>, vector<1x128xf32>, vector<1x128xf32>, vector<1x128xf32>, vector<1x128xf32>, vector<1x128xf32>, vector<1x128xf32>, vector<1x128xf32>, vector<1x128xf32>, vector<1x128xf32>, vector<1x128xf32>, vector<1x128xf32>, vector<1x128xf32> -> vector<1x2048xf32>
    %88 = tpu.concatenate %86, %86, %86, %86, %86, %86, %86, %86, %86, %86, %86, %86, %86, %86, %86, %86 in 1 : vector<1x128xf32>, vector<1x128xf32>, vector<1x128xf32>, vector<1x128xf32>, vector<1x128xf32>, vector<1x128xf32>, vector<1x128xf32>, vector<1x128xf32>, vector<1x128xf32>, vector<1x128xf32>, vector<1x128xf32>, vector<1x128xf32>, vector<1x128xf32>, vector<1x128xf32>, vector<1x128xf32>, vector<1x128xf32> -> vector<1x2048xf32>
    %89 = vector.broadcast %87 : vector<1x2048xf32> to vector<2x2048xf32>
    %90 = arith.mulf %5, %89 : vector<2x2048xf32>
    %91 = vector.broadcast %88 : vector<1x2048xf32> to vector<2x2048xf32>
    %92 = arith.addf %90, %91 : vector<2x2048xf32>
    %cst_14 = arith.constant 0.000000e+00 : f32
    %93 = vector.broadcast %cst_14 : f32 to vector<2x2048xf32>
    %94 = arith.maximumf %92, %93 : vector<2x2048xf32>
    %95 = arith.truncf %94 : vector<2x2048xf32> to vector<2x2048xbf16>
    %c0_15 = arith.constant 0 : index
    %c0_16 = arith.constant 0 : index
    %96 = vector.load %arg6[%c0_15, %c0_16] : memref<2x2048xbf16, #tpu.memory_space<vmem>>, vector<2x2048xbf16>
    tpu.vector_store %arg6[%c0_15, %c0_16], %95 {strides = array<i32>} : memref<2x2048xbf16, #tpu.memory_space<vmem>>, vector<2x2048xbf16>,
    return
  }
  func.func @transform_0(%arg0: i32) -> (i32, i32) {
    %c0_i32 = arith.constant 0 : i32
    %c0_i32_0 = arith.constant 0 : i32
    %c0_i32_1 = arith.constant 0 : i32
    return %c0_i32, %c0_i32_0 : i32, i32
  }
  func.func @transform_1(%arg0: i32) -> (i32, i32) {
    %c0_i32 = arith.constant 0 : i32
    %c0_i32_0 = arith.constant 0 : i32
    %c0_i32_1 = arith.constant 0 : i32
    return %c0_i32, %c0_i32_0 : i32, i32
  }
  func.func @transform_2(%arg0: i32) -> (i32, i32) {
    %c0_i32 = arith.constant 0 : i32
    %c0_i32_0 = arith.constant 0 : i32
    %c0_i32_1 = arith.constant 0 : i32
    return %c0_i32, %c0_i32_0 : i32, i32
  }
  func.func @transform_3(%arg0: i32) -> (i32, i32) {
    %c0_i32 = arith.constant 0 : i32
    %c0_i32_0 = arith.constant 0 : i32
    %c0_i32_1 = arith.constant 0 : i32
    return %c0_i32, %c0_i32_0 : i32, i32
  }
  func.func @transform_4(%arg0: i32) -> (i32, i32) {
    %c0_i32 = arith.constant 0 : i32
    %c0_i32_0 = arith.constant 0 : i32
    %c0_i32_1 = arith.constant 0 : i32
    return %c0_i32, %c0_i32_0 : i32, i32
  }
  func.func @transform_5(%arg0: i32) -> (i32, i32) {
    %c0_i32 = arith.constant 0 : i32
    %c0_i32_0 = arith.constant 0 : i32
    %c0_i32_1 = arith.constant 0 : i32
    return %c0_i32, %c0_i32_0 : i32, i32
  }
}

module attributes {stable_mosaic.version = 11 : i64} {
  func.func @_convt_bn_relu_kernel(%arg0: i32, %arg1: memref<32x288xbf16, #tpu.memory_space<vmem>>, %arg2: memref<288x128xbf16, #tpu.memory_space<vmem>>, %arg3: memref<128x128xf32, #tpu.memory_space<vmem>>, %arg4: memref<1x128xf32, #tpu.memory_space<vmem>>, %arg5: memref<1x128xf32, #tpu.memory_space<vmem>>, %arg6: memref<32x128xbf16, #tpu.memory_space<vmem>>) attributes {dimension_semantics = [#tpu.dimension_semantics<arbitrary>], iteration_bounds = array<i64: 1>, scalar_prefetch = 0 : i64, scratch_operands = 0 : i64, tpu.core_type = #tpu.core_type<tc>, window_params = [{pipeline_mode = #tpu.pipeline_mode<synchronous>, transform_indices = @transform_0, window_bounds = array<i64: 32, 288>}, {pipeline_mode = #tpu.pipeline_mode<synchronous>, transform_indices = @transform_1, window_bounds = array<i64: 288, 128>}, {pipeline_mode = #tpu.pipeline_mode<synchronous>, transform_indices = @transform_2, window_bounds = array<i64: 128, 128>}, {pipeline_mode = #tpu.pipeline_mode<synchronous>, transform_indices = @transform_3, window_bounds = array<i64: 1, 128>}, {pipeline_mode = #tpu.pipeline_mode<synchronous>, transform_indices = @transform_4, window_bounds = array<i64: 1, 128>}, {pipeline_mode = #tpu.pipeline_mode<synchronous>, transform_indices = @transform_5, window_bounds = array<i64: 32, 128>}]} {
    %c0 = arith.constant 0 : index
    %c0_0 = arith.constant 0 : index
    %0 = vector.load %arg1[%c0, %c0_0] : memref<32x288xbf16, #tpu.memory_space<vmem>>, vector<32x288xbf16>
    %c0_1 = arith.constant 0 : index
    %c0_2 = arith.constant 0 : index
    %1 = vector.load %arg2[%c0_1, %c0_2] : memref<288x128xbf16, #tpu.memory_space<vmem>>, vector<288x128xbf16>
    %cst = arith.constant dense<0.000000e+00> : vector<32x128xf32>
    %2 = tpu.matmul %0, %1, %cst {dimension_numbers = #tpu.dot_dimension_numbers<[1], [0], [0], [1], [0, 0, 1, 1], [], []>} : vector<32x288xbf16>, vector<288x128xbf16>, vector<32x128xf32> -> vector<32x128xf32>
    %cst_3 = arith.constant dense<0.000000e+00> : vector<128xf32>
    %3 = vector.multi_reduction <add>, %2, %cst_3 [0] : vector<32x128xf32> to vector<128xf32>
    %4 = vector.shape_cast %3 : vector<128xf32> to vector<1x128xf32>
    %5 = arith.mulf %2, %2 : vector<32x128xf32>
    %cst_4 = arith.constant dense<0.000000e+00> : vector<128xf32>
    %6 = vector.multi_reduction <add>, %5, %cst_4 [0] : vector<32x128xf32> to vector<128xf32>
    %7 = vector.shape_cast %6 : vector<128xf32> to vector<1x128xf32>
    %8 = tpu.concatenate %4, %7 in 0 : vector<1x128xf32>, vector<1x128xf32> -> vector<2x128xf32>
    %c0_5 = arith.constant 0 : index
    %c0_6 = arith.constant 0 : index
    %9 = vector.load %arg3[%c0_5, %c0_6] : memref<128x128xf32, #tpu.memory_space<vmem>>, vector<128x128xf32>
    %cst_7 = arith.constant dense<0.000000e+00> : vector<2x128xf32>
    %10 = tpu.matmul %8, %9, %cst_7 {dimension_numbers = #tpu.dot_dimension_numbers<[1], [0], [0], [1], [0, 0, 1, 1], [], []>} : vector<2x128xf32>, vector<128x128xf32>, vector<2x128xf32> -> vector<2x128xf32>
    %11 = vector.extract_strided_slice %10 {offsets = [0, 0], sizes = [1, 128], strides = [1, 1]} : vector<2x128xf32> to vector<1x128xf32>
    %cst_8 = arith.constant 7.812500e-03 : f32
    %12 = vector.broadcast %cst_8 : f32 to vector<1x128xf32>
    %13 = arith.mulf %11, %12 : vector<1x128xf32>
    %14 = vector.extract_strided_slice %10 {offsets = [1, 0], sizes = [1, 128], strides = [1, 1]} : vector<2x128xf32> to vector<1x128xf32>
    %cst_9 = arith.constant 7.812500e-03 : f32
    %15 = vector.broadcast %cst_9 : f32 to vector<1x128xf32>
    %16 = arith.mulf %14, %15 : vector<1x128xf32>
    %17 = arith.mulf %13, %13 : vector<1x128xf32>
    %18 = arith.subf %16, %17 : vector<1x128xf32>
    %c0_10 = arith.constant 0 : index
    %c0_11 = arith.constant 0 : index
    %19 = vector.load %arg4[%c0_10, %c0_11] : memref<1x128xf32, #tpu.memory_space<vmem>>, vector<1x128xf32>
    %cst_12 = arith.constant 9.99999974E-6 : f32
    %20 = vector.broadcast %cst_12 : f32 to vector<1x128xf32>
    %21 = arith.addf %18, %20 : vector<1x128xf32>
    %22 = math.rsqrt %21 : vector<1x128xf32>
    %23 = arith.mulf %19, %22 : vector<1x128xf32>
    %c0_13 = arith.constant 0 : index
    %c0_14 = arith.constant 0 : index
    %24 = vector.load %arg5[%c0_13, %c0_14] : memref<1x128xf32, #tpu.memory_space<vmem>>, vector<1x128xf32>
    %25 = arith.mulf %13, %23 : vector<1x128xf32>
    %26 = arith.subf %24, %25 : vector<1x128xf32>
    %27 = vector.broadcast %23 : vector<1x128xf32> to vector<32x128xf32>
    %28 = arith.mulf %2, %27 : vector<32x128xf32>
    %29 = vector.broadcast %26 : vector<1x128xf32> to vector<32x128xf32>
    %30 = arith.addf %28, %29 : vector<32x128xf32>
    %cst_15 = arith.constant 0.000000e+00 : f32
    %31 = vector.broadcast %cst_15 : f32 to vector<32x128xf32>
    %32 = arith.maximumf %30, %31 : vector<32x128xf32>
    %33 = arith.truncf %32 : vector<32x128xf32> to vector<32x128xbf16>
    %c0_16 = arith.constant 0 : index
    %c0_17 = arith.constant 0 : index
    %34 = vector.load %arg6[%c0_16, %c0_17] : memref<32x128xbf16, #tpu.memory_space<vmem>>, vector<32x128xbf16>
    tpu.vector_store %arg6[%c0_16, %c0_17], %33 {strides = array<i32>} : memref<32x128xbf16, #tpu.memory_space<vmem>>, vector<32x128xbf16>,
    return
  }
  func.func @transform_0(%arg0: i32) -> (i32, i32) {
    %c0_i32 = arith.constant 0 : i32
    %c0_i32_0 = arith.constant 0 : i32
    %c0_i32_1 = arith.constant 0 : i32
    return %c0_i32, %c0_i32_0 : i32, i32
  }
  func.func @transform_1(%arg0: i32) -> (i32, i32) {
    %c0_i32 = arith.constant 0 : i32
    %c0_i32_0 = arith.constant 0 : i32
    %c0_i32_1 = arith.constant 0 : i32
    return %c0_i32, %c0_i32_0 : i32, i32
  }
  func.func @transform_2(%arg0: i32) -> (i32, i32) {
    %c0_i32 = arith.constant 0 : i32
    %c0_i32_0 = arith.constant 0 : i32
    %c0_i32_1 = arith.constant 0 : i32
    return %c0_i32, %c0_i32_0 : i32, i32
  }
  func.func @transform_3(%arg0: i32) -> (i32, i32) {
    %c0_i32 = arith.constant 0 : i32
    %c0_i32_0 = arith.constant 0 : i32
    %c0_i32_1 = arith.constant 0 : i32
    return %c0_i32, %c0_i32_0 : i32, i32
  }
  func.func @transform_4(%arg0: i32) -> (i32, i32) {
    %c0_i32 = arith.constant 0 : i32
    %c0_i32_0 = arith.constant 0 : i32
    %c0_i32_1 = arith.constant 0 : i32
    return %c0_i32, %c0_i32_0 : i32, i32
  }
  func.func @transform_5(%arg0: i32) -> (i32, i32) {
    %c0_i32 = arith.constant 0 : i32
    %c0_i32_0 = arith.constant 0 : i32
    %c0_i32_1 = arith.constant 0 : i32
    return %c0_i32, %c0_i32_0 : i32, i32
  }
}

module attributes {stable_mosaic.version = 11 : i64} {
  func.func @_convt_bn_relu_kernel(%arg0: i32, %arg1: memref<128x144xbf16, #tpu.memory_space<vmem>>, %arg2: memref<144x128xbf16, #tpu.memory_space<vmem>>, %arg3: memref<128x128xf32, #tpu.memory_space<vmem>>, %arg4: memref<1x128xf32, #tpu.memory_space<vmem>>, %arg5: memref<1x128xf32, #tpu.memory_space<vmem>>, %arg6: memref<128x128xbf16, #tpu.memory_space<vmem>>) attributes {dimension_semantics = [#tpu.dimension_semantics<arbitrary>], iteration_bounds = array<i64: 1>, scalar_prefetch = 0 : i64, scratch_operands = 0 : i64, tpu.core_type = #tpu.core_type<tc>, window_params = [{pipeline_mode = #tpu.pipeline_mode<synchronous>, transform_indices = @transform_0, window_bounds = array<i64: 128, 144>}, {pipeline_mode = #tpu.pipeline_mode<synchronous>, transform_indices = @transform_1, window_bounds = array<i64: 144, 128>}, {pipeline_mode = #tpu.pipeline_mode<synchronous>, transform_indices = @transform_2, window_bounds = array<i64: 128, 128>}, {pipeline_mode = #tpu.pipeline_mode<synchronous>, transform_indices = @transform_3, window_bounds = array<i64: 1, 128>}, {pipeline_mode = #tpu.pipeline_mode<synchronous>, transform_indices = @transform_4, window_bounds = array<i64: 1, 128>}, {pipeline_mode = #tpu.pipeline_mode<synchronous>, transform_indices = @transform_5, window_bounds = array<i64: 128, 128>}]} {
    %c0 = arith.constant 0 : index
    %c0_0 = arith.constant 0 : index
    %0 = vector.load %arg1[%c0, %c0_0] : memref<128x144xbf16, #tpu.memory_space<vmem>>, vector<128x144xbf16>
    %c0_1 = arith.constant 0 : index
    %c0_2 = arith.constant 0 : index
    %1 = vector.load %arg2[%c0_1, %c0_2] : memref<144x128xbf16, #tpu.memory_space<vmem>>, vector<144x128xbf16>
    %cst = arith.constant dense<0.000000e+00> : vector<128x128xf32>
    %2 = tpu.matmul %0, %1, %cst {dimension_numbers = #tpu.dot_dimension_numbers<[1], [0], [0], [1], [0, 0, 1, 1], [], []>} : vector<128x144xbf16>, vector<144x128xbf16>, vector<128x128xf32> -> vector<128x128xf32>
    %cst_3 = arith.constant dense<0.000000e+00> : vector<128xf32>
    %3 = vector.multi_reduction <add>, %2, %cst_3 [0] : vector<128x128xf32> to vector<128xf32>
    %4 = vector.shape_cast %3 : vector<128xf32> to vector<1x128xf32>
    %5 = arith.mulf %2, %2 : vector<128x128xf32>
    %cst_4 = arith.constant dense<0.000000e+00> : vector<128xf32>
    %6 = vector.multi_reduction <add>, %5, %cst_4 [0] : vector<128x128xf32> to vector<128xf32>
    %7 = vector.shape_cast %6 : vector<128xf32> to vector<1x128xf32>
    %8 = tpu.concatenate %4, %7 in 0 : vector<1x128xf32>, vector<1x128xf32> -> vector<2x128xf32>
    %c0_5 = arith.constant 0 : index
    %c0_6 = arith.constant 0 : index
    %9 = vector.load %arg3[%c0_5, %c0_6] : memref<128x128xf32, #tpu.memory_space<vmem>>, vector<128x128xf32>
    %cst_7 = arith.constant dense<0.000000e+00> : vector<2x128xf32>
    %10 = tpu.matmul %8, %9, %cst_7 {dimension_numbers = #tpu.dot_dimension_numbers<[1], [0], [0], [1], [0, 0, 1, 1], [], []>} : vector<2x128xf32>, vector<128x128xf32>, vector<2x128xf32> -> vector<2x128xf32>
    %11 = vector.extract_strided_slice %10 {offsets = [0, 0], sizes = [1, 128], strides = [1, 1]} : vector<2x128xf32> to vector<1x128xf32>
    %cst_8 = arith.constant 0.001953125 : f32
    %12 = vector.broadcast %cst_8 : f32 to vector<1x128xf32>
    %13 = arith.mulf %11, %12 : vector<1x128xf32>
    %14 = vector.extract_strided_slice %10 {offsets = [1, 0], sizes = [1, 128], strides = [1, 1]} : vector<2x128xf32> to vector<1x128xf32>
    %cst_9 = arith.constant 0.001953125 : f32
    %15 = vector.broadcast %cst_9 : f32 to vector<1x128xf32>
    %16 = arith.mulf %14, %15 : vector<1x128xf32>
    %17 = arith.mulf %13, %13 : vector<1x128xf32>
    %18 = arith.subf %16, %17 : vector<1x128xf32>
    %c0_10 = arith.constant 0 : index
    %c0_11 = arith.constant 0 : index
    %19 = vector.load %arg4[%c0_10, %c0_11] : memref<1x128xf32, #tpu.memory_space<vmem>>, vector<1x128xf32>
    %cst_12 = arith.constant 9.99999974E-6 : f32
    %20 = vector.broadcast %cst_12 : f32 to vector<1x128xf32>
    %21 = arith.addf %18, %20 : vector<1x128xf32>
    %22 = math.rsqrt %21 : vector<1x128xf32>
    %23 = arith.mulf %19, %22 : vector<1x128xf32>
    %c0_13 = arith.constant 0 : index
    %c0_14 = arith.constant 0 : index
    %24 = vector.load %arg5[%c0_13, %c0_14] : memref<1x128xf32, #tpu.memory_space<vmem>>, vector<1x128xf32>
    %25 = arith.mulf %13, %23 : vector<1x128xf32>
    %26 = arith.subf %24, %25 : vector<1x128xf32>
    %27 = vector.broadcast %23 : vector<1x128xf32> to vector<128x128xf32>
    %28 = arith.mulf %2, %27 : vector<128x128xf32>
    %29 = vector.broadcast %26 : vector<1x128xf32> to vector<128x128xf32>
    %30 = arith.addf %28, %29 : vector<128x128xf32>
    %cst_15 = arith.constant 0.000000e+00 : f32
    %31 = vector.broadcast %cst_15 : f32 to vector<128x128xf32>
    %32 = arith.maximumf %30, %31 : vector<128x128xf32>
    %33 = arith.truncf %32 : vector<128x128xf32> to vector<128x128xbf16>
    %c0_16 = arith.constant 0 : index
    %c0_17 = arith.constant 0 : index
    %34 = vector.load %arg6[%c0_16, %c0_17] : memref<128x128xbf16, #tpu.memory_space<vmem>>, vector<128x128xbf16>
    tpu.vector_store %arg6[%c0_16, %c0_17], %33 {strides = array<i32>} : memref<128x128xbf16, #tpu.memory_space<vmem>>, vector<128x128xbf16>,
    return
  }
  func.func @transform_0(%arg0: i32) -> (i32, i32) {
    %c0_i32 = arith.constant 0 : i32
    %c0_i32_0 = arith.constant 0 : i32
    %c0_i32_1 = arith.constant 0 : i32
    return %c0_i32, %c0_i32_0 : i32, i32
  }
  func.func @transform_1(%arg0: i32) -> (i32, i32) {
    %c0_i32 = arith.constant 0 : i32
    %c0_i32_0 = arith.constant 0 : i32
    %c0_i32_1 = arith.constant 0 : i32
    return %c0_i32, %c0_i32_0 : i32, i32
  }
  func.func @transform_2(%arg0: i32) -> (i32, i32) {
    %c0_i32 = arith.constant 0 : i32
    %c0_i32_0 = arith.constant 0 : i32
    %c0_i32_1 = arith.constant 0 : i32
    return %c0_i32, %c0_i32_0 : i32, i32
  }
  func.func @transform_3(%arg0: i32) -> (i32, i32) {
    %c0_i32 = arith.constant 0 : i32
    %c0_i32_0 = arith.constant 0 : i32
    %c0_i32_1 = arith.constant 0 : i32
    return %c0_i32, %c0_i32_0 : i32, i32
  }
  func.func @transform_4(%arg0: i32) -> (i32, i32) {
    %c0_i32 = arith.constant 0 : i32
    %c0_i32_0 = arith.constant 0 : i32
    %c0_i32_1 = arith.constant 0 : i32
    return %c0_i32, %c0_i32_0 : i32, i32
  }
  func.func @transform_5(%arg0: i32) -> (i32, i32) {
    %c0_i32 = arith.constant 0 : i32
    %c0_i32_0 = arith.constant 0 : i32
    %c0_i32_1 = arith.constant 0 : i32
    return %c0_i32, %c0_i32_0 : i32, i32
  }
}

module attributes {stable_mosaic.version = 11 : i64} {
  func.func @_convt_bn_relu_kernel(%arg0: i32, %arg1: memref<512x72xbf16, #tpu.memory_space<vmem>>, %arg2: memref<72x128xbf16, #tpu.memory_space<vmem>>, %arg3: memref<128x128xf32, #tpu.memory_space<vmem>>, %arg4: memref<1x128xf32, #tpu.memory_space<vmem>>, %arg5: memref<1x128xf32, #tpu.memory_space<vmem>>, %arg6: memref<512x128xbf16, #tpu.memory_space<vmem>>) attributes {dimension_semantics = [#tpu.dimension_semantics<arbitrary>], iteration_bounds = array<i64: 1>, scalar_prefetch = 0 : i64, scratch_operands = 0 : i64, tpu.core_type = #tpu.core_type<tc>, window_params = [{pipeline_mode = #tpu.pipeline_mode<synchronous>, transform_indices = @transform_0, window_bounds = array<i64: 512, 72>}, {pipeline_mode = #tpu.pipeline_mode<synchronous>, transform_indices = @transform_1, window_bounds = array<i64: 72, 128>}, {pipeline_mode = #tpu.pipeline_mode<synchronous>, transform_indices = @transform_2, window_bounds = array<i64: 128, 128>}, {pipeline_mode = #tpu.pipeline_mode<synchronous>, transform_indices = @transform_3, window_bounds = array<i64: 1, 128>}, {pipeline_mode = #tpu.pipeline_mode<synchronous>, transform_indices = @transform_4, window_bounds = array<i64: 1, 128>}, {pipeline_mode = #tpu.pipeline_mode<synchronous>, transform_indices = @transform_5, window_bounds = array<i64: 512, 128>}]} {
    %c0 = arith.constant 0 : index
    %c0_0 = arith.constant 0 : index
    %0 = vector.load %arg1[%c0, %c0_0] : memref<512x72xbf16, #tpu.memory_space<vmem>>, vector<512x72xbf16>
    %c0_1 = arith.constant 0 : index
    %c0_2 = arith.constant 0 : index
    %1 = vector.load %arg2[%c0_1, %c0_2] : memref<72x128xbf16, #tpu.memory_space<vmem>>, vector<72x128xbf16>
    %cst = arith.constant dense<0.000000e+00> : vector<512x128xf32>
    %2 = tpu.matmul %0, %1, %cst {dimension_numbers = #tpu.dot_dimension_numbers<[1], [0], [0], [1], [0, 0, 1, 1], [], []>} : vector<512x72xbf16>, vector<72x128xbf16>, vector<512x128xf32> -> vector<512x128xf32>
    %cst_3 = arith.constant dense<0.000000e+00> : vector<128xf32>
    %3 = vector.multi_reduction <add>, %2, %cst_3 [0] : vector<512x128xf32> to vector<128xf32>
    %4 = vector.shape_cast %3 : vector<128xf32> to vector<1x128xf32>
    %5 = arith.mulf %2, %2 : vector<512x128xf32>
    %cst_4 = arith.constant dense<0.000000e+00> : vector<128xf32>
    %6 = vector.multi_reduction <add>, %5, %cst_4 [0] : vector<512x128xf32> to vector<128xf32>
    %7 = vector.shape_cast %6 : vector<128xf32> to vector<1x128xf32>
    %8 = tpu.concatenate %4, %7 in 0 : vector<1x128xf32>, vector<1x128xf32> -> vector<2x128xf32>
    %c0_5 = arith.constant 0 : index
    %c0_6 = arith.constant 0 : index
    %9 = vector.load %arg3[%c0_5, %c0_6] : memref<128x128xf32, #tpu.memory_space<vmem>>, vector<128x128xf32>
    %cst_7 = arith.constant dense<0.000000e+00> : vector<2x128xf32>
    %10 = tpu.matmul %8, %9, %cst_7 {dimension_numbers = #tpu.dot_dimension_numbers<[1], [0], [0], [1], [0, 0, 1, 1], [], []>} : vector<2x128xf32>, vector<128x128xf32>, vector<2x128xf32> -> vector<2x128xf32>
    %11 = vector.extract_strided_slice %10 {offsets = [0, 0], sizes = [1, 128], strides = [1, 1]} : vector<2x128xf32> to vector<1x128xf32>
    %cst_8 = arith.constant 4.8828125E-4 : f32
    %12 = vector.broadcast %cst_8 : f32 to vector<1x128xf32>
    %13 = arith.mulf %11, %12 : vector<1x128xf32>
    %14 = vector.extract_strided_slice %10 {offsets = [1, 0], sizes = [1, 128], strides = [1, 1]} : vector<2x128xf32> to vector<1x128xf32>
    %cst_9 = arith.constant 4.8828125E-4 : f32
    %15 = vector.broadcast %cst_9 : f32 to vector<1x128xf32>
    %16 = arith.mulf %14, %15 : vector<1x128xf32>
    %17 = arith.mulf %13, %13 : vector<1x128xf32>
    %18 = arith.subf %16, %17 : vector<1x128xf32>
    %c0_10 = arith.constant 0 : index
    %c0_11 = arith.constant 0 : index
    %19 = vector.load %arg4[%c0_10, %c0_11] : memref<1x128xf32, #tpu.memory_space<vmem>>, vector<1x128xf32>
    %cst_12 = arith.constant 9.99999974E-6 : f32
    %20 = vector.broadcast %cst_12 : f32 to vector<1x128xf32>
    %21 = arith.addf %18, %20 : vector<1x128xf32>
    %22 = math.rsqrt %21 : vector<1x128xf32>
    %23 = arith.mulf %19, %22 : vector<1x128xf32>
    %c0_13 = arith.constant 0 : index
    %c0_14 = arith.constant 0 : index
    %24 = vector.load %arg5[%c0_13, %c0_14] : memref<1x128xf32, #tpu.memory_space<vmem>>, vector<1x128xf32>
    %25 = arith.mulf %13, %23 : vector<1x128xf32>
    %26 = arith.subf %24, %25 : vector<1x128xf32>
    %27 = vector.broadcast %23 : vector<1x128xf32> to vector<512x128xf32>
    %28 = arith.mulf %2, %27 : vector<512x128xf32>
    %29 = vector.broadcast %26 : vector<1x128xf32> to vector<512x128xf32>
    %30 = arith.addf %28, %29 : vector<512x128xf32>
    %cst_15 = arith.constant 0.000000e+00 : f32
    %31 = vector.broadcast %cst_15 : f32 to vector<512x128xf32>
    %32 = arith.maximumf %30, %31 : vector<512x128xf32>
    %33 = arith.truncf %32 : vector<512x128xf32> to vector<512x128xbf16>
    %c0_16 = arith.constant 0 : index
    %c0_17 = arith.constant 0 : index
    %34 = vector.load %arg6[%c0_16, %c0_17] : memref<512x128xbf16, #tpu.memory_space<vmem>>, vector<512x128xbf16>
    tpu.vector_store %arg6[%c0_16, %c0_17], %33 {strides = array<i32>} : memref<512x128xbf16, #tpu.memory_space<vmem>>, vector<512x128xbf16>,
    return
  }
  func.func @transform_0(%arg0: i32) -> (i32, i32) {
    %c0_i32 = arith.constant 0 : i32
    %c0_i32_0 = arith.constant 0 : i32
    %c0_i32_1 = arith.constant 0 : i32
    return %c0_i32, %c0_i32_0 : i32, i32
  }
  func.func @transform_1(%arg0: i32) -> (i32, i32) {
    %c0_i32 = arith.constant 0 : i32
    %c0_i32_0 = arith.constant 0 : i32
    %c0_i32_1 = arith.constant 0 : i32
    return %c0_i32, %c0_i32_0 : i32, i32
  }
  func.func @transform_2(%arg0: i32) -> (i32, i32) {
    %c0_i32 = arith.constant 0 : i32
    %c0_i32_0 = arith.constant 0 : i32
    %c0_i32_1 = arith.constant 0 : i32
    return %c0_i32, %c0_i32_0 : i32, i32
  }
  func.func @transform_3(%arg0: i32) -> (i32, i32) {
    %c0_i32 = arith.constant 0 : i32
    %c0_i32_0 = arith.constant 0 : i32
    %c0_i32_1 = arith.constant 0 : i32
    return %c0_i32, %c0_i32_0 : i32, i32
  }
  func.func @transform_4(%arg0: i32) -> (i32, i32) {
    %c0_i32 = arith.constant 0 : i32
    %c0_i32_0 = arith.constant 0 : i32
    %c0_i32_1 = arith.constant 0 : i32
    return %c0_i32, %c0_i32_0 : i32, i32
  }
  func.func @transform_5(%arg0: i32) -> (i32, i32) {
    %c0_i32 = arith.constant 0 : i32
    %c0_i32_0 = arith.constant 0 : i32
    %c0_i32_1 = arith.constant 0 : i32
    return %c0_i32, %c0_i32_0 : i32, i32
  }
}

module attributes {stable_mosaic.version = 11 : i64} {
  func.func @_convt_tanh_kernel(%arg0: i32, %arg1: memref<256x36xbf16, #tpu.memory_space<vmem>>, %arg2: memref<36x128xbf16, #tpu.memory_space<vmem>>, %arg3: memref<1x128xf32, #tpu.memory_space<vmem>>, %arg4: memref<256x128xf32, #tpu.memory_space<vmem>>) attributes {dimension_semantics = [#tpu.dimension_semantics<parallel>], iteration_bounds = array<i64: 8>, scalar_prefetch = 0 : i64, scratch_operands = 0 : i64, tpu.core_type = #tpu.core_type<tc>, window_params = [{transform_indices = @transform_0, window_bounds = array<i64: 256, 36>}, {pipeline_mode = #tpu.pipeline_mode<synchronous>, transform_indices = @transform_1, window_bounds = array<i64: 36, 128>}, {pipeline_mode = #tpu.pipeline_mode<synchronous>, transform_indices = @transform_2, window_bounds = array<i64: 1, 128>}, {transform_indices = @transform_3, window_bounds = array<i64: 256, 128>}]} {
    %c0 = arith.constant 0 : index
    %c0_0 = arith.constant 0 : index
    %0 = vector.load %arg1[%c0, %c0_0] : memref<256x36xbf16, #tpu.memory_space<vmem>>, vector<256x36xbf16>
    %c0_1 = arith.constant 0 : index
    %c0_2 = arith.constant 0 : index
    %1 = vector.load %arg2[%c0_1, %c0_2] : memref<36x128xbf16, #tpu.memory_space<vmem>>, vector<36x128xbf16>
    %cst = arith.constant dense<0.000000e+00> : vector<256x128xf32>
    %2 = tpu.matmul %0, %1, %cst {dimension_numbers = #tpu.dot_dimension_numbers<[1], [0], [0], [1], [0, 0, 1, 1], [], []>} : vector<256x36xbf16>, vector<36x128xbf16>, vector<256x128xf32> -> vector<256x128xf32>
    %c0_3 = arith.constant 0 : index
    %c0_4 = arith.constant 0 : index
    %3 = vector.load %arg3[%c0_3, %c0_4] : memref<1x128xf32, #tpu.memory_space<vmem>>, vector<1x128xf32>
    %4 = vector.broadcast %3 : vector<1x128xf32> to vector<256x128xf32>
    %5 = arith.addf %2, %4 : vector<256x128xf32>
    %6 = math.tanh %5 : vector<256x128xf32>
    %c0_5 = arith.constant 0 : index
    %c0_6 = arith.constant 0 : index
    %7 = vector.load %arg4[%c0_5, %c0_6] : memref<256x128xf32, #tpu.memory_space<vmem>>, vector<256x128xf32>
    tpu.vector_store %arg4[%c0_5, %c0_6], %6 {strides = array<i32>} : memref<256x128xf32, #tpu.memory_space<vmem>>, vector<256x128xf32>,
    return
  }
  func.func @transform_0(%arg0: i32) -> (i32, i32) {
    %c0_i32 = arith.constant 0 : i32
    %c0_i32_0 = arith.constant 0 : i32
    return %arg0, %c0_i32 : i32, i32
  }
  func.func @transform_1(%arg0: i32) -> (i32, i32) {
    %c0_i32 = arith.constant 0 : i32
    %c0_i32_0 = arith.constant 0 : i32
    %c0_i32_1 = arith.constant 0 : i32
    return %c0_i32, %c0_i32_0 : i32, i32
  }
  func.func @transform_2(%arg0: i32) -> (i32, i32) {
    %c0_i32 = arith.constant 0 : i32
    %c0_i32_0 = arith.constant 0 : i32
    %c0_i32_1 = arith.constant 0 : i32
    return %c0_i32, %c0_i32_0 : i32, i32
  }
  func.func @transform_3(%arg0: i32) -> (i32, i32) {
    %c0_i32 = arith.constant 0 : i32
    %c0_i32_0 = arith.constant 0 : i32
    return %arg0, %c0_i32 : i32, i32
  }
}

</mosaic_0001>

<bundles_post_ra>
// kernel: generator_forward.6
= control target key start
LH: loop header
LB: loop body
LE: loop exit
PB: predicated region body
PF: predicated region fallthrough
CT: control target
= control target key end

     0   :  { %10 = vsyncpa [#allocation3], 0  ;;  %s852_s0 = inlined_call_operand.vmem [shape: bf16[32,288], index: 0, kind: input, shape index: {}]   ;;  %s853_s1 = inlined_call_operand.hbm [shape: bf16[288,128], index: 1, kind: input, shape index: {}]   ;;  %s854_s2 = inlined_call_operand.hbm [shape: f32[128,128], index: 2, kind: input, shape index: {}]   ;;  %s855_s3 = inlined_call_operand.hbm [shape: f32[1,128], index: 3, kind: input, shape index: {}]   ;;  %s856_s4 = inlined_call_operand.vmem [shape: f32[1,128], index: 4, kind: input, shape index: {}]   ;;  %s857_s5 = inlined_call_operand.vmem [shape: bf16[32,128], index: 5, kind: output, shape index: {}]  }
   0x1   :  { %11 = vsyncpa [#allocation5], 0  ;;  %s776_s18 = smov [#allocation4]  }
   0x2   :  { %s31_s19 = sshll.u32 %s776_s18, 4  ;;  %s32_s19 = int_to_ptr.vmem [resolvable:$true] %s31_s19 }
   0x3   :  { %s720_s20 = scalar_lea.vmem %s32_s19, 2048  ;;  %p725_p1 = scmp.lt.s32.totalorder %s32_s19, %s32_s19 }
   0x4   :  { %p721_p0 = scmp.ne.s32.totalorder %s32_s19, %s720_s20  ;;  %p726_p2 = scmp.lt.s32.totalorder %s720_s20, %s720_s20 }
   0x6   :  { %p727_p3 = por %p726_p2, %p725_p1 }
   0x8   :  { %p728_p4 = pnand %p727_p3, %p721_p0 }
   0xa   :  { %731 = shalt.err (!%p728_p4)
}
   0xb   :  { %s777_s21 = smov 128   ;;  %s778_s22 = smov 8  }
   0xc   :  { %37 = dma.hbm_to_vmem [thread:$0]  %s854_s2, 2048, %s32_s19, [#allocation5], %s777_s21, %s777_s21, %s778_s22  }
   0xd   :  { %s779_s25 = smov [#allocation2]  }
   0xe   :  { %s19_s26 = sshll.u32 %s779_s25, 4  ;;  %s20_s26 = int_to_ptr.vmem [resolvable:$true] %s19_s26 }
   0xf   :  { %s740_s27 = scalar_lea.vmem %s20_s26, 2304  ;;  %p745_p6 = scmp.lt.s32.totalorder %s20_s26, %s20_s26 }
  0x10   :  { %p741_p5 = scmp.ne.s32.totalorder %s20_s26, %s740_s27  ;;  %p746_p7 = scmp.lt.s32.totalorder %s740_s27, %s740_s27 }
  0x12   :  { %p747_p8 = por %p746_p7, %p745_p6 }
  0x14   :  { %p748_p9 = pnand %p747_p8, %p741_p5 }
  0x16   :  { %751 = shalt.err (!%p748_p9)
}
  0x17   :  { %s780_s28 = smov 64   ;;  %s781_s29 = smov 4  }
  0x18   :  { %25 = dma.hbm_to_vmem [thread:$0]  %s853_s1, 2304, %s20_s26, [#allocation3], %s780_s28, %s780_s28, %s781_s29  }
  0x19   :  { %s782_s7 = smov [#allocation6]  }
  0x1a   :  { %s44_s8 = sshll.u32 %s782_s7, 4  ;;  %s45_s8 = int_to_ptr.vmem [resolvable:$true] %s44_s8 }
  0x1b   :  { %s760_s2 = scalar_lea.vmem %s45_s8, 16  ;;  %s764_s9 = scalar_lea.vmem %s45_s8, 32 }
  0x1c   :  { %p761_p10 = scmp.ne.s32.totalorder %s45_s8, %s760_s2  ;;  %p765_p11 = scmp.lt.s32.totalorder %s45_s8, %s45_s8 }
  0x1d   :  { %p766_p12 = scmp.lt.s32.totalorder %s764_s9, %s760_s2 }
  0x1f   :  { %p767_p13 = por %p766_p12, %p765_p11 }
  0x21   :  { %p768_p0 = pnand %p767_p13, %p761_p10 }
  0x23   :  { %771 = shalt.err (!%p768_p0)
}
  0x24   :  { %47 = dma.hbm_to_vmem [thread:$0]  %s855_s3, 16, %s45_s8, [#allocation5]  }
  0x25   :  { %772 = dma.done.wait [#allocation3], 2304  }
  0x26   :  { %773 = vsyncadd [#allocation3], 4294964992 }
  0x27   :  { %774 = dma.done.wait [#allocation5], 2064  }
  0x28   :  { %775 = vsyncadd [#allocation5], 4294965232  ;;  %v684_v0 = vld [vmem:[#allocation2 + $0x78] sm:$0xff]   ;;  %v686_v2 = vld [vmem:[#allocation2 + $0x70] sm:$0xff]   ;;  %vm242_vm0 = vcmask 261120   ;;  %v783_v24 = vmov 0.0  }
  0x29   :  { %v685_v1 = vld [vmem:[#allocation2 + $0x38] sm:$0xff]   ;;  %582 = vmatprep.subr.bf16.mxu0 %v684_v0  ;;  %v687_v3 = vld [vmem:[#allocation2 + $0x30] sm:$0xff]   ;;  %v688_v4 = vld [vmem:[#allocation2 + $0x68] sm:$0xff]   ;;  %vm784_vm1 = vmmov 0   ;;  %vm369_vm2 = vcmask 1040384  }
  0x2a   :  { %583 = vmatpush3.bf16.msra.mxu0 %v685_v1  ;;  %v689_v5 = vld [vmem:[#allocation2 + $0x28] sm:$0xff]   ;;  %v690_v6 = vld [vmem:[#allocation2 + $0x60] sm:$0xff]   ;;  %v692_v8 = vld [vmem:[#allocation2 + $0x58] sm:$0xff]  }
  0x2b   :  { %584 = vmatprep.subr.bf16.mxu0 %v686_v2  ;;  %v691_v7 = vld [vmem:[#allocation2 + $0x20] sm:$0xff]   ;;  %v697_v9 = vld [vmem:[#allocation2 + $0x88] sm:$0xff]   ;;  %v693_v10 = vld [vmem:[#allocation2 + $0x18] sm:$0xff]  }
  0x2c   :  { %v694_v11 = vld [vmem:[#allocation2 + $0x50] sm:$0xff]   ;;  %631 = vmatprep.subr.bf16.mxu1 %v697_v9  ;;  %v700_v12 = vld [vmem:[#allocation2 + $0x80] sm:$0xff]   ;;  %v696_v14 = vld [vmem:[#allocation2 + $0x48] sm:$0xff]  }
  0x2d   :  { %632 = vmatpush3.bf16.msra.mxu1 %v697_v9  ;;  %v695_v13 = vld [vmem:[#allocation2 + $0x10] sm:$0xff]   ;;  %v705_v16 = vld [vmem:[%s852_s0 + $0x8] ss:$12 sps:$4 sm:$0xff]   ;;  %v698_v18 = vld [vmem:[#allocation2 + $0x8] sm:$0xff]  }
  0x2e   :  { %585 = vmatpush3.bf16.msra.mxu0 %v687_v3  ;;  %633 = vmatprep.subr.bf16.mxu1 %v700_v12  ;;  %v704_v15 = vld [vmem:[%s852_s0 + $0x4] ss:$12 sps:$4 sm:$0xff]   ;;  %v706_v17 = vld [vmem:[%s852_s0 + $0x20] ss:$12 sps:$4 sm:$0xff]   ;;  %v707_v22 = vld [vmem:[%s852_s0 + $0x1c] ss:$12 sps:$4 sm:$0xff]  }
  0x2f   :  { %586 = vmatprep.subr.bf16.mxu0 %v688_v4  ;;  %281 = vmatprep.mubr.bf16.mxu0 %v704_v15  ;;  %v699_v19 = vld [vmem:[#allocation2 + $0x40] sm:$0xff]   ;;  %v702_v21 = vld [vmem:[%s852_s0] ss:$12 sps:$4 sm:$0xff]   ;;  %v709_v23 = vld [vmem:[%s852_s0 + $0x18] ss:$12 sps:$4 sm:$0xff]  }
  0x30   :  { %635 = vmatprep.mubr.msk.bf16.mxu1 %vm242_vm0, %v705_v16  ;;  %v701_v20 = vld [vmem:[#allocation2] sm:$0xff]   ;;  %v386_v25 = vld [vmem:[#allocation4 + $0x78] sm:$0xff]  ;;  %v384_v27 = vld [vmem:[#allocation4 + $0x68] sm:$0xff] }
  0x31   :  { %634 = vmatpush3.bf16.msra.mxu1 %v700_v12  ;;  %v385_v26 = vld [vmem:[#allocation4 + $0x70] sm:$0xff]  ;;  %v383_v28 = vld [vmem:[#allocation4 + $0x60] sm:$0xff]  ;;  %v382_v29 = vld [vmem:[#allocation4 + $0x58] sm:$0xff] }
  0x32   :  { %587 = vmatpush3.bf16.msra.mxu0 %v689_v5  ;;  %639 = vmatprep.subr.mxu1 %v783_v24  ;;  %v381_v30 = vld [vmem:[#allocation4 + $0x50] sm:$0xff]  ;;  %v380_v31 = vld [vmem:[#allocation4 + $0x48] sm:$0xff]  ;;  %v379_v32 = vld [vmem:[#allocation4 + $0x40] sm:$0xff] }
  0x33   :  { %588 = vmatprep.subr.bf16.mxu0 %v690_v6  ;;  %v378_v33 = vld [vmem:[#allocation4 + $0x38] sm:$0xff]  ;;  %v377_v34 = vld [vmem:[#allocation4 + $0x30] sm:$0xff]  ;;  %v376_v35 = vld [vmem:[#allocation4 + $0x28] sm:$0xff] }
  0x34   :  { %636 = vmatmul.mubr.msk.bf16.vlgmr.msra.gmra.mxu1 %vm242_vm0, %v706_v17  ;;  %v375_v36 = vld [vmem:[#allocation4 + $0x20] sm:$0xff]  ;;  %v374_v37 = vld [vmem:[#allocation4 + $0x18] sm:$0xff]  ;;  %v373_v38 = vld [vmem:[#allocation4 + $0x10] sm:$0xff] }
  0x35   :  { %640 = vmatpush3.msra.mxu1 %v386_v25  ;;  %671 = vmatprep.mubr.msk.f32.mxu1 %vm784_vm1, %v783_v24  ;;  %v372_v39 = vld [vmem:[#allocation4 + $0x8] sm:$0xff]  ;;  %v371_v40 = vld [vmem:[#allocation4] sm:$0xff] }
  0x36   :  { %589 = vmatpush3.bf16.msra.mxu0 %v691_v7  ;;  %641 = vmatprep.subr.mxu1 %v783_v24 }
  0x37   :  { %590 = vmatprep.subr.bf16.mxu0 %v692_v8  ;;  %642 = vmatpush3.msra.mxu1 %v385_v26 }
  0x38   :  { %643 = vmatprep.subr.mxu1 %v783_v24 }
  0x39   :  { %644 = vmatpush3.msra.mxu1 %v384_v27  ;;  %v785_v27 = vmov 1966171168  }
  0x3a   :  { %591 = vmatpush3.bf16.msra.mxu0 %v693_v10  ;;  %645 = vmatprep.subr.mxu1 %v783_v24 }
  0x3b   :  { %592 = vmatprep.subr.bf16.mxu0 %v694_v11  ;;  %646 = vmatpush3.msra.mxu1 %v383_v28  ;;  %v468_v28 = vunpack.c.l.s4 %v785_v27 }
  0x3c   :  { %647 = vmatprep.subr.mxu1 %v783_v24 }
  0x3d   :  { %648 = vmatpush3.msra.mxu1 %v382_v29  ;;  %v470_v29 = vlaneseq }
  0x3e   :  { %593 = vmatpush3.bf16.msra.mxu0 %v695_v13  ;;  %649 = vmatprep.subr.mxu1 %v783_v24 }
  0x3f   :  { %594 = vmatprep.subr.bf16.mxu0 %v696_v14  ;;  %650 = vmatpush3.msra.mxu1 %v381_v30  ;;  %v469_v30 = vunpack.c.0.s8 %v468_v28 }
  0x40   :  { %651 = vmatprep.subr.mxu1 %v783_v24 }
  0x41   :  { %652 = vmatpush3.msra.mxu1 %v380_v31  ;;  %v471_v31 = vshrl.u32 %v470_v29, 7 }
  0x42   :  { %595 = vmatpush3.bf16.msra.mxu0 %v698_v18  ;;  %653 = vmatprep.subr.mxu1 %v783_v24 }
  0x43   :  { %596 = vmatprep.subr.bf16.mxu0 %v699_v19  ;;  %654 = vmatpush3.msra.mxu1 %v379_v32  ;;  %v472_v32 = vsub.s32 %v469_v30, %v471_v31 }
  0x44   :  { %655 = vmatprep.subr.mxu1 %v783_v24 }
  0x45   :  { %656 = vmatpush3.msra.mxu1 %v378_v33 }
  0x46   :  { %597 = vmatpush3.bf16.msra.mxu0 %v701_v20  ;;  %657 = vmatprep.subr.mxu1 %v783_v24 }
  0x47   :  { %658 = vmatpush3.msra.mxu1 %v377_v34 }
  0x48   :  { %659 = vmatprep.subr.mxu1 %v783_v24 }
  0x49   :  { %282 = vmatmul.mubr.bf16.vlgmr.msra.gmra.mxu0 %v702_v21  ;;  %660 = vmatpush3.msra.mxu1 %v376_v35 }
  0x4a   :  { %289 = vmatprep.mubr.bf16.mxu0 %v707_v22  ;;  %661 = vmatprep.subr.mxu1 %v783_v24 }
  0x4b   :  { %662 = vmatpush3.msra.mxu1 %v375_v36  ;;  %v463_v36 = vld [vmem:[#allocation6] sm:$0x1] }
  0x4c   :  { %663 = vmatprep.subr.mxu1 %v783_v24 }
  0x4d   :  { %664 = vmatpush3.msra.mxu1 %v374_v37 }
  0x4e   :  { %665 = vmatprep.subr.mxu1 %v783_v24 }
  0x4f   :  { %666 = vmatpush3.msra.mxu1 %v373_v38  ;;  %v490_v38 = vsub.s32 0, %v471_v31 }
  0x50   :  { %667 = vmatprep.subr.mxu1 %v783_v24 }
  0x51   :  { %290 = vmatmul.mubr.bf16.gmra.mxu0 %v709_v23  ;;  %668 = vmatpush3.msra.mxu1 %v372_v39 }
  0x52   :  { %669 = vmatprep.subr.mxu1 %v783_v24 }
  0x53   :  { %670 = vmatpush3.msra.mxu1 %v371_v40  ;;  %v484_v40 = vld [vmem:[%s856_s4] sm:$0x1] }
  0xf4   :  { %v637_v41 = vpop.f32.mrf.mxu1 }
  0xf6   :  { %v332_v43 = vpop.f32.mrf.mxu1 }
  0xf8   :  { %v638_v46 = vpop.f32.mrf.mxu1 }
  0xfa   :  { %v335_v50 = vpop.f32.mrf.mxu1 }
 0x109   :  { %v598_v42 = vpop.f32.mrf.mxu0 }
 0x10b   :  { %v599_v44 = vpop.f32.mrf.mxu0 }
 0x10c   :  { %v600_v48 = vadd.f32 %v599_v44, %v598_v42 }
 0x10d   :  { %v601_v45 = vpop.f32.mrf.mxu0 }
 0x10e   :  { %v333_v54 = vadd.f32 %v600_v48, %v332_v43 }
 0x10f   :  { %v602_v47 = vpop.f32.mrf.mxu0 }
 0x110   :  { %v603_v49 = vadd.f32 %v602_v47, %v601_v45  ;;  %v356_v60 = vmul.f32 %v333_v54, %v333_v54 }
 0x111   :  { %v604_v51 = vpop.f32.mrf.mxu0 }
 0x112   :  { %v336_v52 = vadd.f32 %v603_v49, %v335_v50 }
 0x113   :  { %v605_v53 = vpop.f32.mrf.mxu0 }
 0x114   :  { %v606_v55 = vadd.f32 %v605_v53, %v604_v51  ;;  %v357_v57 = vmul.f32 %v336_v52, %v336_v52  ;;  %v347_v61 = vadd.f32 %v336_v52, %v333_v54 }
 0x115   :  { %v607_v56 = vpop.f32.mrf.mxu0 }
 0x116   :  { %v341_v58 = vadd.f32 %v637_v41, %v606_v55  ;;  %v360_v0 = vadd.f32 %v357_v57, %v356_v60 }
 0x117   :  { %v608_v59 = vpop.f32.mrf.mxu0 }
 0x118   :  { %v358_v62 = vmul.f32 %v341_v58, %v341_v58  ;;  %v609_v63 = vadd.f32 %v608_v59, %v607_v56  ;;  %v348_v1 = vadd.f32 %v347_v61, %v341_v58 }
 0x11a   :  { %v344_v2 = vadd.f32 %v638_v46, %v609_v63  ;;  %v361_v3 = vadd.f32 %v360_v0, %v358_v62 }
 0x11c   :  { %v349_v4 = vadd.f32 %v348_v1, %v344_v2  ;;  %v359_v5 = vmul.f32 %v344_v2, %v344_v2 }
 0x11e   :  { %v350_v6 = vrot.slane %v349_v4, 4  ;;  %v362_v7 = vadd.f32 %v361_v3, %v359_v5 }
 0x120   :  { %v351_v8 = vadd.f32 %v350_v6, %v349_v4  ;;  %v363_v9 = vrot.slane %v362_v7, 4 }
 0x122   :  { %v352_v10 = vrot.slane %v351_v8, 2  ;;  %v364_v11 = vadd.f32 %v363_v9, %v362_v7 }
 0x124   :  { %v353_v12 = vadd.f32 %v352_v10, %v351_v8  ;;  %v365_v13 = vrot.slane %v364_v11, 2 }
 0x126   :  { %v354_v14 = vrot.slane %v353_v12, 1  ;;  %v366_v15 = vadd.f32 %v365_v13, %v364_v11 }
 0x128   :  { %v367_v16 = vrot.slane %v366_v15, 1  ;;  %v355_v17 = vadd.f32 %v354_v14, %v353_v12 }
 0x12a   :  { %v368_v18 = vadd.f32 %v367_v16, %v366_v15 }
 0x12c   :  { %v370_v19 = vsel %vm369_vm2, %v355_v17, %v368_v18 }
 0x12d   :  { %672 = vmatmul.mubr.f32.vlgmr.msra.gmra.mxu1 %v370_v19 }
 0x1ed   :  { %v453_v20 = vpop.f32.mrf.mxu1 }
 0x1ee   :  { %v457_v21 = vmul.f32 0.0078125, %v453_v20 }
 0x1ef   :  { %v673_v22 = vpop.f32.mrf.mxu1 }
 0x1f0   :  { %v458_v23 = vmul.f32 %v457_v21, %v457_v21 }
 0x1f2   :  { %v460_v24 = vrot.slane %v458_v23, 7 }
 0x1f4   :  { %v462_v25 = vsub.f32 %v457_v21, %v460_v24 }
 0x1f6   :  { %v464_v26 = vadd.f32 1e-05, %v462_v25 }
 0x1f8   :  { %710 = vrsqrt.f32 %v464_v26 }
 0x205   :  { %v711_v33 = vpop.eup %710 }
 0x206   :  { %v473_v34 = vrot.slane %v711_v33, %v472_v32 }
 0x208   :  { %v474_v35 = vcombine.high %v473_v34, %v473_v34 }
 0x20a   :  { %v481_v37 = vrot.slane %v474_v35, %v472_v32 }
 0x20c   :  { %v483_v39 = vmul.f32 %v481_v37, %v463_v36 }
 0x20e   :  { %v485_v41 = vmul.f32 %v483_v39, %v457_v21  ;;  %v491_v42 = vrot.slane %v483_v39, %v490_v38 }
 0x210   :  { %v486_v43 = vsub.f32 %v484_v40, %v485_v41  ;;  %v493_v44 = vmul.f32 %v491_v42, %v333_v54  ;;  %v494_v45 = vmul.f32 %v491_v42, %v336_v52  ;;  %v495_v46 = vmul.f32 %v491_v42, %v341_v58 }
 0x211   :  { %v496_v47 = vmul.f32 %v491_v42, %v344_v2 }
 0x212   :  { %v501_v48 = vrot.slane %v486_v43, %v490_v38 }
 0x214   :  { %v503_v49 = vadd.f32 %v501_v48, %v493_v44  ;;  %v504_v50 = vadd.f32 %v501_v48, %v494_v45  ;;  %v505_v51 = vadd.f32 %v501_v48, %v495_v46  ;;  %v506_v53 = vadd.f32 %v501_v48, %v496_v47 }
 0x216   :  { %v507_v55 = vmax.f32 %v503_v49, 0.0  ;;  %v508_v56 = vmax.f32 %v504_v50, 0.0  ;;  %v509_v57 = vmax.f32 %v505_v51, 0.0  ;;  %v510_v59 = vmax.f32 %v506_v53, 0.0 }
 0x218   :  { %v574_v60 = vpack.c.bf16 %v508_v56, %v507_v55  ;;  %v579_v61 = vpack.c.bf16 %v510_v59, %v509_v57 }
 0x21a   :  { %575 = vst [vmem:[%s857_s5] sm:$0xff] %v574_v60   ;;  %581 = vst [vmem:[%s857_s5 + $0x8] sm:$0xff] %v579_v61  }
 0x21b   :  { %535 = vsyncpa [#allocation3], 1 }
 0x21c   :  { %536 = vsyncpa [#allocation5], 1 }

// kernel: generator_forward.5
= control target key start
LH: loop header
LB: loop body
LE: loop exit
PB: predicated region body
PF: predicated region fallthrough
CT: control target
= control target key end

     0   :  { %10 = vsyncpa [#allocation3], 0  ;;  %s1510_s0 = inlined_call_operand.vmem [shape: bf16[2,8], index: 0, kind: input, shape index: {}]   ;;  %s1511_s1 = inlined_call_operand.hbm [shape: bf16[8,2048], index: 1, kind: input, shape index: {}]   ;;  %s1512_s2 = inlined_call_operand.hbm [shape: f32[1,2048], index: 2, kind: input, shape index: {}]   ;;  %s1513_s3 = inlined_call_operand.hbm [shape: f32[1,128], index: 3, kind: input, shape index: {}]   ;;  %s1514_s4 = inlined_call_operand.vmem [shape: f32[1,128], index: 4, kind: input, shape index: {}]   ;;  %s1515_s5 = inlined_call_operand.vmem [shape: bf16[2,2048], index: 5, kind: output, shape index: {}]  }
   0x1   :  { %11 = vsyncpa [#allocation5], 0  ;;  %s1175_s18 = smov [#allocation4]   ;;  %s1176_s20 = smov [#allocation2]  }
   0x2   :  { %s30_s19 = sshll.u32 %s1175_s18, 4  ;;  %s20_s21 = sshll.u32 %s1176_s20, 4  ;;  %s31_s19 = int_to_ptr.vmem [resolvable:$true] %s30_s19  ;;  %s21_s21 = int_to_ptr.vmem [resolvable:$true] %s20_s21 }
   0x3   :  { %s1119_s22 = scalar_lea.vmem %s31_s19, 256  ;;  %p1124_p1 = scmp.lt.s32.totalorder %s31_s19, %s31_s19 }
   0x4   :  { %p1120_p0 = scmp.ne.s32.totalorder %s31_s19, %s1119_s22  ;;  %p1125_p2 = scmp.lt.s32.totalorder %s1119_s22, %s1119_s22 }
   0x6   :  { %p1126_p3 = por %p1125_p2, %p1124_p1 }
   0x8   :  { %p1127_p4 = pnand %p1126_p3, %p1120_p0 }
   0xa   :  { %1130 = shalt.err (!%p1127_p4)
}
   0xb   :  { %33 = dma.hbm_to_vmem [thread:$0]  %s1512_s2, 256, %s31_s19, [#allocation5]  }
   0xc   :  { %s1139_s25 = scalar_lea.vmem %s21_s21, 1024  ;;  %p1144_p6 = scmp.lt.s32.totalorder %s21_s21, %s21_s21 }
   0xd   :  { %p1140_p5 = scmp.ne.s32.totalorder %s21_s21, %s1139_s25  ;;  %p1145_p7 = scmp.lt.s32.totalorder %s1139_s25, %s1139_s25 }
   0xf   :  { %p1146_p8 = por %p1145_p7, %p1144_p6 }
  0x11   :  { %p1147_p9 = pnand %p1146_p8, %p1140_p5 }
  0x13   :  { %1150 = shalt.err (!%p1147_p9)
}
  0x14   :  { %23 = dma.hbm_to_vmem [thread:$0]  %s1511_s1, 1024, %s21_s21, [#allocation3]  }
  0x15   :  { %s1177_s28 = smov [#allocation6]  }
  0x16   :  { %s40_s29 = sshll.u32 %s1177_s28, 4  ;;  %s41_s29 = int_to_ptr.vmem [resolvable:$true] %s40_s29 }
  0x17   :  { %s1159_s30 = scalar_lea.vmem %s41_s29, 16  ;;  %s1163_s6 = scalar_lea.vmem %s41_s29, 32 }
  0x18   :  { %p1160_p10 = scmp.ne.s32.totalorder %s41_s29, %s1159_s30  ;;  %p1164_p11 = scmp.lt.s32.totalorder %s41_s29, %s41_s29 }
  0x19   :  { %p1165_p12 = scmp.lt.s32.totalorder %s1163_s6, %s1159_s30 }
  0x1b   :  { %p1166_p13 = por %p1165_p12, %p1164_p11 }
  0x1d   :  { %p1167_p0 = pnand %p1166_p13, %p1160_p10 }
  0x1f   :  { %1170 = shalt.err (!%p1167_p0)
}
  0x20   :  { %43 = dma.hbm_to_vmem [thread:$0]  %s1513_s3, 16, %s41_s29, [#allocation5]  }
  0x21   :  { %1171 = dma.done.wait [#allocation3], 1024  }
  0x22   :  { %1172 = vsyncadd [#allocation3], 4294966272 }
  0x23   :  { %1173 = dma.done.wait [#allocation5], 272  }
  0x24   :  { %1174 = vsyncadd [#allocation5], 4294967024  ;;  %v1178_v0 = vmov 0   ;;  %v57_v1 = vld [vmem:[#allocation2] sm:$0xff]  ;;  %vm193_vm0 = vcmask 1043456   ;;  %v58_v2 = vld [vmem:[#allocation2 + $0x8] sm:$0xff]  ;;  %v69_v34 = vlaneseq }
  0x25   :  { %274 = vmatprep.mubr.bf16.mxu0 %v1178_v0  ;;  %315 = vmatprep.mubr.bf16.mxu1 %v1178_v0  ;;  %v1049_v3 = vcombine.high %v57_v1, %v57_v1  ;;  %v1051_v4 = vcombine.high %v58_v2, %v58_v2  ;;  %v1048_v5 = vcombine.low %v57_v1, %v57_v1  ;;  %v59_v7 = vld [vmem:[#allocation2 + $0x10] sm:$0xff]  ;;  %v60_v8 = vld [vmem:[#allocation2 + $0x18] sm:$0xff]  ;;  %v61_v15 = vld [vmem:[#allocation2 + $0x20] sm:$0xff]  ;;  %vm189_vm1 = vcmask 64512  }
  0x26   :  { %v1050_v6 = vcombine.low %v58_v2, %v58_v2  ;;  %v1053_v9 = vcombine.high %v59_v7, %v59_v7  ;;  %v1052_v10 = vcombine.low %v59_v7, %v59_v7  ;;  %v1055_v11 = vcombine.high %v60_v8, %v60_v8  ;;  %v62_v16 = vld [vmem:[#allocation2 + $0x28] sm:$0xff]  ;;  %v56_v17 = vld [vmem:[%s1510_s0] sm:$0x1]  ;;  %v64_v25 = vld [vmem:[#allocation2 + $0x38] sm:$0xff] }
  0x27   :  { %v1054_v12 = vcombine.low %v60_v8, %v60_v8  ;;  %1064 = vmatprep.subr.msk.bf16.mxu0 %vm193_vm0, %v1049_v3  ;;  %1066 = vmatprep.subr.msk.bf16.mxu1 %vm193_vm0, %v1051_v4  ;;  %v195_v13 = vsel %vm193_vm0, %v1048_v5, 0  ;;  %v1057_v20 = vcombine.high %v61_v15, %v61_v15  ;;  %v1059_v21 = vcombine.high %v62_v16, %v62_v16  ;;  %v63_v24 = vld [vmem:[#allocation2 + $0x30] sm:$0xff]  ;;  %v65_v38 = vld [vmem:[#allocation4] sm:$0xff]  ;;  %v1291_v59 = vld [vmem:[#allocation4 + $0x8] sm:$0xff] }
  0x28   :  { %v201_v14 = vsel %vm193_vm0, %v1050_v6, 0  ;;  %257 = vmatpush1.bf16.msra.mxu0 %v195_v13  ;;  %v207_v18 = vsel %vm193_vm0, %v1052_v10, 0  ;;  %v1056_v22 = vcombine.low %v61_v15, %v61_v15  ;;  %v1058_v23 = vcombine.low %v62_v16, %v62_v16 }
  0x29   :  { %298 = vmatpush1.bf16.msra.mxu1 %v201_v14  ;;  %1068 = vmatprep.subr.msk.bf16.mxu0 %vm193_vm0, %v1053_v9  ;;  %v213_v19 = vsel %vm193_vm0, %v1054_v12, 0  ;;  %v1061_v28 = vcombine.high %v63_v24, %v63_v24  ;;  %v1063_v29 = vcombine.high %v64_v25, %v64_v25  ;;  %v1060_v30 = vcombine.low %v63_v24, %v63_v24 }
  0x2a   :  { %1070 = vmatprep.subr.msk.bf16.mxu1 %vm193_vm0, %v1055_v11  ;;  %v219_v26 = vsel %vm193_vm0, %v1056_v22, 0  ;;  %v225_v27 = vsel %vm193_vm0, %v1058_v23, 0  ;;  %v1062_v31 = vcombine.low %v64_v25, %v64_v25  ;;  %v1254_v35 = vshrl.u32 %v69_v34, 7 }
  0x2b   :  { %1065 = vmatmul.mubr.msk.bf16.vlgmr.msra.gmra.mxu0 %vm189_vm1, %v56_v17  ;;  %v231_v32 = vsel %vm193_vm0, %v1060_v30, 0  ;;  %vm570_vm2 = vcmask 1041408  }
  0x2c   :  { %1067 = vmatmul.mubr.msk.bf16.vlgmr.msra.gmra.mxu1 %vm189_vm1, %v56_v17  ;;  %339 = vmatpush1.bf16.msra.mxu0 %v207_v18  ;;  %v237_v33 = vsel %vm193_vm0, %v1062_v31, 0  ;;  %v1257_v36 = vsub.s32 0, %v1254_v35  ;;  %v79_v37 = vsub.s32 2, %v1254_v35  ;;  %v75_v39 = vsub.s32 1, %v1254_v35 }
  0x2d   :  { %380 = vmatpush1.bf16.msra.mxu1 %v213_v19  ;;  %356 = vmatprep.mubr.bf16.mxu0 %v1178_v0  ;;  %v83_v40 = vsub.s32 3, %v1254_v35  ;;  %v87_v43 = vsub.s32 4, %v1254_v35  ;;  %v95_v44 = vsub.s32 6, %v1254_v35  ;;  %v91_v45 = vsub.s32 5, %v1254_v35 }
  0x2e   :  { %397 = vmatprep.mubr.bf16.mxu1 %v1178_v0  ;;  %1072 = vmatprep.subr.msk.bf16.mxu0 %vm193_vm0, %v1057_v20  ;;  %v72_v41 = vrot.slane %v65_v38, %v1257_v36  ;;  %v80_v42 = vrot.slane %v65_v38, %v79_v37  ;;  %v99_v46 = vsub.s32 7, %v1254_v35  ;;  %v76_v49 = vrot.slane %v65_v38, %v75_v39 }
  0x2f   :  { %1074 = vmatprep.subr.msk.bf16.mxu1 %vm193_vm0, %v1059_v21  ;;  %v84_v50 = vrot.slane %v65_v38, %v83_v40  ;;  %v1277_v55 = vrot.slane %v65_v38, %v87_v43  ;;  %v1281_v56 = vrot.slane %v65_v38, %v95_v44  ;;  %v1285_v57 = vrot.slane %v65_v38, %v91_v45 }
  0x30   :  { %v1289_v58 = vrot.slane %v65_v38, %v99_v46  ;;  %v104_v8 = vrot.slane %v1291_v59, %v1257_v36  ;;  %v1310_v9 = vrot.slane %v1291_v59, %v79_v37 }
  0x33   :  { %1069 = vmatmul.mubr.msk.bf16.vlgmr.msra.gmra.mxu0 %vm189_vm1, %v56_v17 }
  0x34   :  { %1071 = vmatmul.mubr.msk.bf16.vlgmr.msra.gmra.mxu1 %vm189_vm1, %v56_v17  ;;  %421 = vmatpush1.bf16.msra.mxu0 %v219_v26 }
  0x35   :  { %462 = vmatpush1.bf16.msra.mxu1 %v225_v27  ;;  %438 = vmatprep.mubr.bf16.mxu0 %v1178_v0 }
  0x36   :  { %479 = vmatprep.mubr.bf16.mxu1 %v1178_v0  ;;  %1076 = vmatprep.subr.msk.bf16.mxu0 %vm193_vm0, %v1061_v28 }
  0x37   :  { %1078 = vmatprep.subr.msk.bf16.mxu1 %vm193_vm0, %v1063_v29 }
  0x3b   :  { %1073 = vmatmul.mubr.msk.bf16.vlgmr.msra.gmra.mxu0 %vm189_vm1, %v56_v17 }
  0x3c   :  { %1075 = vmatmul.mubr.msk.bf16.vlgmr.msra.gmra.mxu1 %vm189_vm1, %v56_v17  ;;  %503 = vmatpush1.bf16.msra.mxu0 %v231_v32 }
  0x3d   :  { %544 = vmatpush1.bf16.msra.mxu1 %v237_v33  ;;  %520 = vmatprep.mubr.bf16.mxu0 %v1178_v0 }
  0x3e   :  { %561 = vmatprep.mubr.bf16.mxu1 %v1178_v0 }
  0x43   :  { %1077 = vmatmul.mubr.msk.bf16.vlgmr.msra.gmra.mxu0 %vm189_vm1, %v56_v17 }
  0x44   :  { %1079 = vmatmul.mubr.msk.bf16.vlgmr.msra.gmra.mxu1 %vm189_vm1, %v56_v17 }
  0xeb   :  { %v276_v47 = vpop.f32.mrf.mxu0 }
  0xec   :  { %v317_v48 = vpop.f32.mrf.mxu1  ;;  %v1271_v51 = vadd.f32 %v276_v47, %v72_v41 }
  0xed   :  { %v1273_v52 = vadd.f32 %v317_v48, %v80_v42  ;;  %v278_v53 = vpop.f32.mrf.mxu0 }
  0xee   :  { %v319_v54 = vpop.f32.mrf.mxu1  ;;  %v571_v60 = vsel %vm570_vm2, %v1271_v51, 0.0  ;;  %v683_v61 = vmul.f32 %v1271_v51, %v1271_v51  ;;  %v1301_v2 = vadd.f32 %v278_v53, %v76_v49 }
  0xef   :  { %v585_v62 = vsel %vm570_vm2, %v1273_v52, 0.0  ;;  %v685_v63 = vmul.f32 %v1273_v52, %v1273_v52  ;;  %v572_v0 = vrot.slane %v571_v60, 4  ;;  %v1303_v3 = vadd.f32 %v319_v54, %v84_v50  ;;  %v280_v4 = vpop.f32.mrf.mxu0 }
  0xf0   :  { %v586_v1 = vrot.slane %v585_v62, 4  ;;  %v321_v5 = vpop.f32.mrf.mxu1  ;;  %v699_v6 = vsel %vm570_vm2, %v683_v61, 0.0  ;;  %v578_v16 = vsel %vm570_vm2, %v1301_v2, 0.0  ;;  %v684_v17 = vmul.f32 %v1301_v2, %v1301_v2 }
  0xf1   :  { %v713_v7 = vsel %vm570_vm2, %v685_v63, 0.0  ;;  %v573_v10 = vadd.f32 %v572_v0, %v571_v60  ;;  %v700_v11 = vrot.slane %v699_v6, 4  ;;  %v281_v14 = vpop.f32.mrf.mxu0  ;;  %v592_v18 = vsel %vm570_vm2, %v1303_v3, 0.0 }
  0xf2   :  { %v587_v12 = vadd.f32 %v586_v1, %v585_v62  ;;  %v714_v13 = vrot.slane %v713_v7, 4  ;;  %v322_v15 = vpop.f32.mrf.mxu1  ;;  %v686_v19 = vmul.f32 %v1303_v3, %v1303_v3  ;;  %v579_v26 = vrot.slane %v578_v16, 4 }
  0xf3   :  { %v574_v20 = vrot.slane %v573_v10, 2  ;;  %v701_v21 = vadd.f32 %v700_v11, %v699_v6  ;;  %v358_v24 = vpop.f32.mrf.mxu0  ;;  %v706_v27 = vsel %vm570_vm2, %v684_v17, 0.0  ;;  %v593_v28 = vrot.slane %v592_v18, 4 }
  0xf4   :  { %v588_v22 = vrot.slane %v587_v12, 2  ;;  %v715_v23 = vadd.f32 %v714_v13, %v713_v7  ;;  %v399_v25 = vpop.f32.mrf.mxu1  ;;  %v720_v29 = vsel %vm570_vm2, %v686_v19, 0.0  ;;  %v580_v38 = vadd.f32 %v579_v26, %v578_v16 }
  0xf5   :  { %v575_v30 = vadd.f32 %v574_v20, %v573_v10  ;;  %v702_v31 = vrot.slane %v701_v21, 2  ;;  %v360_v34 = vpop.f32.mrf.mxu0  ;;  %v707_v41 = vrot.slane %v706_v27, 4  ;;  %v594_v42 = vadd.f32 %v593_v28, %v592_v18 }
  0xf6   :  { %v589_v32 = vadd.f32 %v588_v22, %v587_v12  ;;  %v716_v33 = vrot.slane %v715_v23, 2  ;;  %v1322_v37 = vpop.f32.mrf.mxu1  ;;  %v721_v47 = vrot.slane %v720_v29, 4  ;;  %v581_v61 = vrot.slane %v580_v38, 2 }
  0xf7   :  { %v576_v48 = vrot.slane %v575_v30, 1  ;;  %v703_v49 = vadd.f32 %v702_v31, %v701_v21  ;;  %v362_v54 = vpop.f32.mrf.mxu0  ;;  %v708_v62 = vadd.f32 %v707_v41, %v706_v27  ;;  %v595_v63 = vrot.slane %v594_v42, 2 }
  0xf8   :  { %v590_v50 = vrot.slane %v589_v32, 1  ;;  %v717_v53 = vadd.f32 %v716_v33, %v715_v23  ;;  %v403_v60 = vpop.f32.mrf.mxu1  ;;  %v722_v0 = vadd.f32 %v721_v47, %v720_v29  ;;  %v1327_v7 = vrot.slane %v1291_v59, %v75_v39 }
  0xf9   :  { %v704_v1 = vrot.slane %v703_v49, 1  ;;  %v363_v5 = vpop.f32.mrf.mxu0  ;;  %v1332_v10 = vrot.slane %v1291_v59, %v83_v40  ;;  %v582_v11 = vadd.f32 %v581_v61, %v580_v38  ;;  %v709_v12 = vrot.slane %v708_v62, 2 }
  0xfa   :  { %v718_v4 = vrot.slane %v717_v53, 1  ;;  %v404_v6 = vpop.f32.mrf.mxu1  ;;  %v596_v13 = vadd.f32 %v595_v63, %v594_v42  ;;  %v723_v14 = vrot.slane %v722_v0, 2  ;;  %v577_v15 = vadd.f32 %v576_v48, %v575_v30 }
  0xfb   :  { %v591_v16 = vadd.f32 %v590_v50, %v589_v32  ;;  %v1335_v17 = vadd.f32 %v358_v24, %v1277_v55  ;;  %v1338_v18 = vadd.f32 %v399_v25, %v1281_v56  ;;  %v1340_v19 = vpop.f32.mrf.mxu0  ;;  %v705_v20 = vadd.f32 %v704_v1, %v703_v49 }
  0xfc   :  { %v1342_v39 = vpop.f32.mrf.mxu1  ;;  %v583_v21 = vrot.slane %v582_v11, 1  ;;  %v710_v40 = vadd.f32 %v709_v12, %v708_v62  ;;  %v724_v22 = vadd.f32 %v723_v14, %v722_v0  ;;  %v719_v27 = vadd.f32 %v718_v4, %v717_v53 }
  0xfd   :  { %v599_v23 = vsel %vm570_vm2, %v1335_v17, 0.0  ;;  %v687_v26 = vmul.f32 %v1335_v17, %v1335_v17  ;;  %v613_v55 = vsel %vm570_vm2, %v1338_v18, 0.0  ;;  %v689_v56 = vmul.f32 %v1338_v18, %v1338_v18  ;;  %v1352_v24 = vpop.f32.mrf.mxu0 }
  0xfe   :  { %v1354_v25 = vpop.f32.mrf.mxu1  ;;  %v584_v28 = vadd.f32 %v583_v21, %v582_v11  ;;  %v711_v29 = vrot.slane %v710_v40, 1  ;;  %v597_v30 = vrot.slane %v596_v13, 1  ;;  %v600_v31 = vrot.slane %v599_v23, 4 }
  0xff   :  { %v727_v32 = vsel %vm570_vm2, %v687_v26, 0.0  ;;  %v614_v33 = vrot.slane %v613_v55, 4  ;;  %v741_v38 = vsel %vm570_vm2, %v689_v56, 0.0  ;;  %v444_v41 = vpop.f32.mrf.mxu0  ;;  %v725_v49 = vrot.slane %v724_v22, 1 }
 0x100   :  { %v485_v42 = vpop.f32.mrf.mxu1  ;;  %v712_v47 = vadd.f32 %v711_v29, %v710_v40  ;;  %v811_v48 = vadd.f32 %v584_v28, %v577_v15  ;;  %v728_v50 = vrot.slane %v727_v32, 4  ;;  %v601_v54 = vadd.f32 %v600_v31, %v599_v23 }
 0x101   :  { %v615_v60 = vadd.f32 %v614_v33, %v613_v55  ;;  %v742_v61 = vrot.slane %v741_v38, 4  ;;  %v1359_v53 = vadd.f32 %v360_v34, %v1285_v57  ;;  %v445_v62 = vpop.f32.mrf.mxu0  ;;  %v1363_v5 = vadd.f32 %v1322_v37, %v1289_v58 }
 0x102   :  { %v486_v63 = vpop.f32.mrf.mxu1  ;;  %v812_v0 = vadd.f32 %v712_v47, %v705_v20  ;;  %v813_v1 = vadd.f32 %v811_v48, %v591_v16  ;;  %v729_v4 = vadd.f32 %v728_v50, %v727_v32  ;;  %v602_v6 = vrot.slane %v601_v54, 2 }
 0x103   :  { %v616_v11 = vrot.slane %v615_v60, 2  ;;  %v743_v12 = vadd.f32 %v742_v61, %v741_v38  ;;  %v606_v14 = vsel %vm570_vm2, %v1359_v53, 0.0  ;;  %v1367_v15 = vpop.f32.mrf.mxu0  ;;  %v598_v57 = vadd.f32 %v597_v30, %v596_v13 }
 0x104   :  { %v1369_v21 = vpop.f32.mrf.mxu1  ;;  %v726_v34 = vadd.f32 %v725_v49, %v724_v22  ;;  %v730_v40 = vrot.slane %v729_v4, 2  ;;  %v607_v20 = vrot.slane %v606_v14, 4  ;;  %v814_v16 = vadd.f32 %v812_v0, %v719_v27 }
 0x105   :  { %v603_v23 = vadd.f32 %v602_v6, %v601_v54  ;;  %v744_v26 = vrot.slane %v743_v12, 2  ;;  %v688_v58 = vmul.f32 %v1359_v53, %v1359_v53  ;;  %v1373_v37 = vpop.f32.mrf.mxu0  ;;  %v617_v28 = vadd.f32 %v616_v11, %v615_v60 }
 0x106   :  { %v1375_v55 = vpop.f32.mrf.mxu1  ;;  %v731_v56 = vadd.f32 %v730_v40, %v729_v4  ;;  %v608_v29 = vadd.f32 %v607_v20, %v606_v14  ;;  %v620_v31 = vsel %vm570_vm2, %v1363_v5, 0.0  ;;  %v815_v13 = vadd.f32 %v813_v1, %v598_v57 }
 0x107   :  { %v604_v22 = vrot.slane %v603_v23, 1  ;;  %v745_v30 = vadd.f32 %v744_v26, %v743_v12  ;;  %v734_v27 = vsel %vm570_vm2, %v688_v58, 0.0  ;;  %v526_v32 = vpop.f32.mrf.mxu0  ;;  %v621_v47 = vrot.slane %v620_v31, 4 }
 0x108   :  { %v567_v33 = vpop.f32.mrf.mxu1  ;;  %v732_v38 = vrot.slane %v731_v56, 1  ;;  %v609_v41 = vrot.slane %v608_v29, 2  ;;  %v735_v42 = vrot.slane %v734_v27, 4  ;;  %v816_v48 = vadd.f32 %v814_v16, %v726_v34 }
 0x109   :  { %v605_v49 = vadd.f32 %v604_v22, %v603_v23  ;;  %v690_v50 = vmul.f32 %v1363_v5, %v1363_v5  ;;  %v1385_v54 = vrot.slane %v1291_v59, %v87_v43  ;;  %v527_v60 = vpop.f32.mrf.mxu0  ;;  %v618_v62 = vrot.slane %v617_v28, 1 }
 0x10a   :  { %v568_v61 = vpop.f32.mrf.mxu1  ;;  %v610_v63 = vadd.f32 %v609_v41, %v608_v29  ;;  %v736_v0 = vadd.f32 %v735_v42, %v734_v27  ;;  %v622_v1 = vadd.f32 %v621_v47, %v620_v31  ;;  %v733_v4 = vadd.f32 %v732_v38, %v731_v56 }
 0x10b   :  { %v746_v6 = vrot.slane %v745_v30, 1  ;;  %v748_v11 = vsel %vm570_vm2, %v690_v50, 0.0  ;;  %v1392_v12 = vadd.f32 %v1340_v19, %v104_v8  ;;  %v817_v14 = vadd.f32 %v815_v13, %v605_v49 }
 0x10c   :  { %v611_v57 = vrot.slane %v610_v63, 1  ;;  %v737_v43 = vrot.slane %v736_v0, 2  ;;  %v623_v34 = vrot.slane %v622_v1, 2  ;;  %v749_v40 = vrot.slane %v748_v11, 4 }
 0x10d   :  { %v627_v20 = vsel %vm570_vm2, %v1392_v12, 0.0  ;;  %v691_v16 = vmul.f32 %v1392_v12, %v1392_v12  ;;  %v1400_v23 = vadd.f32 %v1342_v39, %v1310_v9  ;;  %v818_v22 = vadd.f32 %v816_v48, %v733_v4 }
 0x10e   :  { %v612_v26 = vadd.f32 %v611_v57, %v610_v63  ;;  %v738_v58 = vadd.f32 %v737_v43, %v736_v0  ;;  %v624_v56 = vadd.f32 %v623_v34, %v622_v1  ;;  %v628_v8 = vrot.slane %v627_v20, 4 }
 0x10f   :  { %v750_v19 = vadd.f32 %v749_v40, %v748_v11  ;;  %v755_v29 = vsel %vm570_vm2, %v691_v16, 0.0  ;;  %v641_v31 = vsel %vm570_vm2, %v1400_v23, 0.0  ;;  %v693_v13 = vmul.f32 %v1400_v23, %v1400_v23 }
 0x110   :  { %v739_v27 = vrot.slane %v738_v58, 1  ;;  %v819_v32 = vadd.f32 %v817_v14, %v612_v26  ;;  %v629_v33 = vadd.f32 %v628_v8, %v627_v20  ;;  %v756_v9 = vrot.slane %v755_v29, 4 }
 0x111   :  { %v751_v38 = vrot.slane %v750_v19, 2  ;;  %v642_v39 = vrot.slane %v641_v31, 4  ;;  %v769_v41 = vsel %vm570_vm2, %v693_v13, 0.0  ;;  %v619_v42 = vadd.f32 %v618_v62, %v617_v28 }
 0x112   :  { %v740_v47 = vadd.f32 %v739_v27, %v738_v58  ;;  %v625_v49 = vrot.slane %v624_v56, 1  ;;  %v630_v50 = vrot.slane %v629_v33, 2  ;;  %v757_v61 = vadd.f32 %v756_v9, %v755_v29 }
 0x113   :  { %v752_v60 = vadd.f32 %v751_v38, %v750_v19  ;;  %v643_v63 = vadd.f32 %v642_v39, %v641_v31  ;;  %v770_v0 = vrot.slane %v769_v41, 4  ;;  %v747_v1 = vadd.f32 %v746_v6, %v745_v30 }
 0x114   :  { %v820_v11 = vadd.f32 %v818_v22, %v740_v47  ;;  %v631_v57 = vadd.f32 %v630_v50, %v629_v33  ;;  %v1410_v48 = vadd.f32 %v1352_v24, %v1327_v7  ;;  %v821_v14 = vadd.f32 %v819_v32, %v619_v42 }
 0x115   :  { %v753_v4 = vrot.slane %v752_v60, 1  ;;  %v758_v43 = vrot.slane %v757_v61, 2  ;;  %v771_v34 = vadd.f32 %v770_v0, %v769_v41  ;;  %v626_v40 = vadd.f32 %v625_v49, %v624_v56 }
 0x116   :  { %v632_v28 = vrot.slane %v631_v57, 1  ;;  %v634_v62 = vsel %vm570_vm2, %v1410_v48, 0.0  ;;  %v692_v20 = vmul.f32 %v1410_v48, %v1410_v48  ;;  %v822_v16 = vadd.f32 %v820_v11, %v747_v1 }
 0x117   :  { %v759_v30 = vadd.f32 %v758_v43, %v757_v61  ;;  %v644_v6 = vrot.slane %v643_v63, 2  ;;  %v772_v26 = vrot.slane %v771_v34, 2  ;;  %v635_v58 = vrot.slane %v634_v62, 4 }
 0x118   :  { %v762_v7 = vsel %vm570_vm2, %v692_v20, 0.0  ;;  %v1419_v24 = vadd.f32 %v1354_v25, %v1332_v10  ;;  %v128_v56 = vrot.slane %v1291_v59, %v95_v44  ;;  %v754_v8 = vadd.f32 %v753_v4, %v752_v60 }
 0x119   :  { %v823_v19 = vadd.f32 %v821_v14, %v626_v40  ;;  %v633_v29 = vadd.f32 %v632_v28, %v631_v57  ;;  %v760_v31 = vrot.slane %v759_v30, 1  ;;  %v636_v13 = vadd.f32 %v635_v58, %v634_v62 }
 0x11a   :  { %v763_v22 = vrot.slane %v762_v7, 4  ;;  %v648_v27 = vsel %vm570_vm2, %v1419_v24, 0.0  ;;  %v124_v32 = vrot.slane %v1291_v59, %v91_v45  ;;  %v824_v33 = vadd.f32 %v822_v16, %v754_v8 }
 0x11b   :  { %v645_v10 = vadd.f32 %v644_v6, %v643_v63  ;;  %v773_v25 = vadd.f32 %v772_v26, %v771_v34  ;;  %v649_v38 = vrot.slane %v648_v27, 4  ;;  %v637_v9 = vrot.slane %v636_v13, 2 }
 0x11c   :  { %v764_v39 = vadd.f32 %v763_v22, %v762_v7  ;;  %v694_v44 = vmul.f32 %v1419_v24, %v1419_v24  ;;  %v1433_v41 = vadd.f32 %v1367_v15, %v1385_v54  ;;  %v761_v42 = vadd.f32 %v760_v31, %v759_v30 }
 0x11d   :  { %v825_v47 = vadd.f32 %v823_v19, %v633_v29  ;;  %v650_v49 = vadd.f32 %v649_v38, %v648_v27  ;;  %v1436_v50 = vadd.f32 %v1369_v21, %v128_v56  ;;  %v638_v45 = vadd.f32 %v637_v9, %v636_v13 }
 0x11e   :  { %v765_v60 = vrot.slane %v764_v39, 2  ;;  %v776_v61 = vsel %vm570_vm2, %v694_v44, 0.0  ;;  %v655_v63 = vsel %vm570_vm2, %v1433_v41, 0.0  ;;  %v695_v15 = vmul.f32 %v1433_v41, %v1433_v41 }
 0x11f   :  { %v651_v0 = vrot.slane %v650_v49, 2  ;;  %v777_v1 = vrot.slane %v776_v61, 4  ;;  %v656_v11 = vrot.slane %v655_v63, 4  ;;  %v639_v54 = vrot.slane %v638_v45, 1 }
 0x120   :  { %v766_v57 = vadd.f32 %v765_v60, %v764_v39  ;;  %v669_v4 = vsel %vm570_vm2, %v1436_v50, 0.0  ;;  %v697_v21 = vmul.f32 %v1436_v50, %v1436_v50  ;;  %v826_v14 = vadd.f32 %v824_v33, %v761_v42 }
 0x121   :  { %v778_v43 = vadd.f32 %v777_v1, %v776_v61  ;;  %v657_v34 = vadd.f32 %v656_v11, %v655_v63  ;;  %v783_v40 = vsel %vm570_vm2, %v695_v15, 0.0  ;;  %v640_v28 = vadd.f32 %v639_v54, %v638_v45 }
 0x122   :  { %v767_v62 = vrot.slane %v766_v57, 1  ;;  %v784_v20 = vrot.slane %v783_v40, 4  ;;  %v670_v16 = vrot.slane %v669_v4, 4  ;;  %v652_v30 = vadd.f32 %v651_v0, %v650_v49 }
 0x123   :  { %v779_v6 = vrot.slane %v778_v43, 2  ;;  %v658_v26 = vrot.slane %v657_v34, 2  ;;  %v797_v58 = vsel %vm570_vm2, %v697_v21, 0.0  ;;  %v646_v7 = vrot.slane %v645_v10, 1 }
 0x124   :  { %v768_v56 = vadd.f32 %v767_v62, %v766_v57  ;;  %v785_v8 = vadd.f32 %v784_v20, %v783_v40  ;;  %v671_v19 = vadd.f32 %v670_v16, %v669_v4  ;;  %v774_v29 = vrot.slane %v773_v25, 1 }
 0x125   :  { %v798_v31 = vrot.slane %v797_v58, 4  ;;  %v827_v13 = vadd.f32 %v825_v47, %v640_v28  ;;  %v659_v22 = vadd.f32 %v658_v26, %v657_v34  ;;  %v132_v33 = vrot.slane %v1291_v59, %v99_v46 }
 0x126   :  { %v786_v27 = vrot.slane %v785_v8, 2  ;;  %v828_v38 = vadd.f32 %v826_v14, %v768_v56  ;;  %v653_v9 = vrot.slane %v652_v30, 1  ;;  %v780_v39 = vadd.f32 %v779_v6, %v778_v43 }
 0x127   :  { %v1453_v44 = vadd.f32 %v1373_v37, %v124_v32  ;;  %v647_v42 = vadd.f32 %v646_v7, %v645_v10  ;;  %v672_v49 = vrot.slane %v671_v19, 2  ;;  %v799_v45 = vadd.f32 %v798_v31, %v797_v58 }
 0x128   :  { %v775_v60 = vadd.f32 %v774_v29, %v773_v25  ;;  %v787_v61 = vadd.f32 %v786_v27, %v785_v8  ;;  %v660_v0 = vrot.slane %v659_v22, 1  ;;  %v654_v59 = vadd.f32 %v653_v9, %v652_v30 }
 0x129   :  { %v662_v47 = vsel %vm570_vm2, %v1453_v44, 0.0  ;;  %v829_v63 = vadd.f32 %v827_v13, %v647_v42  ;;  %v696_v46 = vmul.f32 %v1453_v44, %v1453_v44  ;;  %v781_v11 = vrot.slane %v780_v39, 1 }
 0x12a   :  { %v663_v1 = vrot.slane %v662_v47, 4  ;;  %v830_v15 = vadd.f32 %v828_v38, %v775_v60  ;;  %v1460_v37 = vadd.f32 %v1375_v55, %v132_v33  ;;  %v673_v32 = vadd.f32 %v672_v49, %v671_v19 }
 0x12b   :  { %v800_v10 = vrot.slane %v799_v45, 2  ;;  %v790_v25 = vsel %vm570_vm2, %v696_v46, 0.0  ;;  %v788_v57 = vrot.slane %v787_v61, 1  ;;  %v831_v43 = vadd.f32 %v829_v63, %v654_v59 }
 0x12c   :  { %v664_v54 = vadd.f32 %v663_v1, %v662_v47  ;;  %v791_v4 = vrot.slane %v790_v25, 4  ;;  %v676_v21 = vsel %vm570_vm2, %v1460_v37, 0.0  ;;  %v698_v14 = vmul.f32 %v1460_v37, %v1460_v37 }
 0x12d   :  { %v661_v34 = vadd.f32 %v660_v0, %v659_v22  ;;  %v677_v28 = vrot.slane %v676_v21, 4  ;;  %v782_v62 = vadd.f32 %v781_v11, %v780_v39  ;;  %v674_v16 = vrot.slane %v673_v32, 1 }
 0x12e   :  { %v665_v40 = vrot.slane %v664_v54, 2  ;;  %v792_v55 = vadd.f32 %v791_v4, %v790_v25  ;;  %v804_v20 = vsel %vm570_vm2, %v698_v14, 0.0  ;;  %v789_v7 = vadd.f32 %v788_v57, %v787_v61 }
 0x12f   :  { %v678_v6 = vadd.f32 %v677_v28, %v676_v21  ;;  %v805_v26 = vrot.slane %v804_v20, 4  ;;  %v832_v58 = vadd.f32 %v830_v15, %v782_v62  ;;  %v801_v56 = vadd.f32 %v800_v10, %v799_v45  ;;  %v849_v62 = vld [vmem:[%s1514_s4] sm:$0x1] }
 0x130   :  { %v666_v30 = vadd.f32 %v665_v40, %v664_v54  ;;  %v793_v8 = vrot.slane %v792_v55, 2  ;;  %v833_v19 = vadd.f32 %v831_v43, %v661_v34  ;;  %v675_v49 = vadd.f32 %v674_v16, %v673_v32  ;;  %v845_v32 = vld [vmem:[#allocation6] sm:$0x1] }
 0x131   :  { %v679_v31 = vrot.slane %v678_v6, 2  ;;  %v806_v13 = vadd.f32 %v805_v26, %v804_v20  ;;  %v834_v9 = vadd.f32 %v832_v58, %v789_v7  ;;  %v802_v39 = vrot.slane %v801_v56, 1 }
 0x132   :  { %v667_v29 = vrot.slane %v666_v30, 1  ;;  %v794_v27 = vadd.f32 %v793_v8, %v792_v55  ;;  %v1179_v43 = vmov 1966171168  }
 0x133   :  { %v680_v33 = vadd.f32 %v679_v31, %v678_v6  ;;  %v807_v38 = vrot.slane %v806_v13, 2  ;;  %v803_v46 = vadd.f32 %v802_v39, %v801_v56  ;;  %v945_v34 = vunpack.c.l.s4 %v1179_v43 }
 0x134   :  { %v668_v22 = vadd.f32 %v667_v29, %v666_v30  ;;  %v795_v42 = vrot.slane %v794_v27, 1 }
 0x135   :  { %v681_v47 = vrot.slane %v680_v33, 1  ;;  %v808_v63 = vadd.f32 %v807_v38, %v806_v13  ;;  %v946_v55 = vunpack.c.0.s8 %v945_v34 }
 0x136   :  { %v835_v60 = vadd.f32 %v833_v19, %v668_v22  ;;  %v796_v0 = vadd.f32 %v795_v42, %v794_v27 }
 0x137   :  { %v682_v1 = vadd.f32 %v681_v47, %v680_v33  ;;  %v809_v61 = vrot.slane %v808_v63, 1  ;;  %v1474_v26 = vsub.s32 %v946_v55, %v1254_v35 }
 0x138   :  { %v837_v45 = vadd.f32 %v835_v60, %v675_v49  ;;  %v836_v59 = vadd.f32 %v834_v9, %v796_v0 }
 0x139   :  { %v810_v15 = vadd.f32 %v809_v61, %v808_v63 }
 0x13a   :  { %v839_v11 = vadd.f32 %v837_v45, %v682_v1  ;;  %v838_v10 = vadd.f32 %v836_v59, %v803_v46 }
 0x13c   :  { %v841_v54 = vmul.f32 0.03125, %v839_v11  ;;  %v840_v25 = vadd.f32 %v838_v10, %v810_v15 }
 0x13e   :  { %v843_v57 = vmul.f32 %v841_v54, %v841_v54  ;;  %v842_v4 = vmul.f32 0.03125, %v840_v25 }
 0x140   :  { %v844_v21 = vsub.f32 %v842_v4, %v843_v57 }
 0x142   :  { %v846_v14 = vadd.f32 1e-05, %v844_v21 }
 0x144   :  { %1109 = vrsqrt.f32 %v846_v14 }
 0x151   :  { %v1110_v40 = vpop.eup %1109 }
 0x152   :  { %v848_v28 = vmul.f32 %v1110_v40, %v845_v32 }
 0x154   :  { %v850_v20 = vmul.f32 %v848_v28, %v841_v54  ;;  %v855_v16 = vrot.slane %v848_v28, %v1257_v36 }
 0x156   :  { %v851_v30 = vsub.f32 %v849_v62, %v850_v20  ;;  %v856_v6 = vmul.f32 %v855_v16, %v1271_v51  ;;  %v857_v58 = vmul.f32 %v855_v16, %v1301_v2  ;;  %v858_v7 = vmul.f32 %v855_v16, %v1273_v52 }
 0x157   :  { %v859_v56 = vmul.f32 %v855_v16, %v1303_v3  ;;  %v860_v8 = vmul.f32 %v855_v16, %v1335_v17  ;;  %v861_v19 = vmul.f32 %v855_v16, %v1359_v53  ;;  %v862_v29 = vmul.f32 %v855_v16, %v1338_v18 }
 0x158   :  { %v863_v31 = vmul.f32 %v855_v16, %v1363_v5  ;;  %v864_v13 = vmul.f32 %v855_v16, %v1392_v12  ;;  %v865_v51 = vmul.f32 %v855_v16, %v1410_v48  ;;  %v866_v35 = vmul.f32 %v855_v16, %v1400_v23 }
 0x159   :  { %v867_v2 = vmul.f32 %v855_v16, %v1419_v24  ;;  %v875_v52 = vrot.slane %v851_v30, %v1257_v36  ;;  %v868_v3 = vmul.f32 %v855_v16, %v1433_v41  ;;  %v869_v17 = vmul.f32 %v855_v16, %v1453_v44 }
 0x15a   :  { %v870_v53 = vmul.f32 %v855_v16, %v1436_v50  ;;  %v871_v18 = vmul.f32 %v855_v16, %v1460_v37 }
 0x15b   :  { %v876_v27 = vadd.f32 %v875_v52, %v856_v6  ;;  %v877_v5 = vadd.f32 %v875_v52, %v857_v58  ;;  %v878_v22 = vadd.f32 %v875_v52, %v858_v7  ;;  %v879_v12 = vadd.f32 %v875_v52, %v859_v56 }
 0x15c   :  { %v880_v33 = vadd.f32 %v875_v52, %v860_v8  ;;  %v881_v48 = vadd.f32 %v875_v52, %v861_v19  ;;  %v882_v38 = vadd.f32 %v875_v52, %v862_v29  ;;  %v883_v23 = vadd.f32 %v875_v52, %v863_v31 }
 0x15d   :  { %v884_v9 = vadd.f32 %v875_v52, %v864_v13  ;;  %v885_v24 = vadd.f32 %v875_v52, %v865_v51  ;;  %v886_v39 = vadd.f32 %v875_v52, %v866_v35  ;;  %v887_v36 = vadd.f32 %v875_v52, %v867_v2 }
 0x15e   :  { %v888_v42 = vadd.f32 %v875_v52, %v868_v3  ;;  %v889_v41 = vadd.f32 %v875_v52, %v869_v17  ;;  %v890_v49 = vadd.f32 %v875_v52, %v870_v53  ;;  %v891_v44 = vadd.f32 %v875_v52, %v871_v18 }
 0x15f   :  { %v892_v60 = vmax.f32 %v876_v27, 0.0  ;;  %v893_v50 = vmax.f32 %v877_v5, 0.0  ;;  %v894_v47 = vmax.f32 %v878_v22, 0.0  ;;  %v895_v37 = vmax.f32 %v879_v12, 0.0 }
 0x160   :  { %v896_v63 = vmax.f32 %v880_v33, 0.0  ;;  %v897_v0 = vmax.f32 %v881_v48, 0.0  ;;  %v898_v1 = vmax.f32 %v882_v38, 0.0  ;;  %v899_v61 = vmax.f32 %v883_v23, 0.0 }
 0x161   :  { %v900_v45 = vmax.f32 %v884_v9, 0.0  ;;  %v901_v46 = vmax.f32 %v885_v24, 0.0  ;;  %v902_v59 = vmax.f32 %v886_v39, 0.0  ;;  %v903_v11 = vmax.f32 %v887_v36, 0.0 }
 0x162   :  { %v904_v15 = vmax.f32 %v888_v42, 0.0  ;;  %v905_v10 = vmax.f32 %v889_v41, 0.0  ;;  %v906_v54 = vmax.f32 %v890_v49, 0.0  ;;  %v907_v25 = vmax.f32 %v891_v44, 0.0 }
 0x163   :  { %v1080_v57 = vpack.c.bf16 %v893_v50, %v892_v60  ;;  %v1081_v4 = vpack.c.bf16 %v895_v37, %v894_v47  ;;  %v1082_v21 = vpack.c.bf16 %v897_v0, %v896_v63  ;;  %v1083_v14 = vpack.c.bf16 %v899_v61, %v898_v1 }
 0x164   :  { %v1084_v32 = vpack.c.bf16 %v901_v46, %v900_v45  ;;  %v1085_v43 = vpack.c.bf16 %v903_v11, %v902_v59  ;;  %v1086_v34 = vpack.c.bf16 %v905_v10, %v904_v15  ;;  %v1087_v40 = vpack.c.bf16 %v907_v25, %v906_v54 }
 0x165   :  { %v950_v28 = vrot.slane %v1080_v57, %v1474_v26  ;;  %v957_v62 = vrot.slane %v1081_v4, %v1474_v26  ;;  %v964_v55 = vrot.slane %v1082_v21, %v1474_v26  ;;  %v971_v20 = vrot.slane %v1083_v14, %v1474_v26 }
 0x166   :  { %v999_v16 = vrot.slane %v1084_v32, %v1474_v26  ;;  %v1006_v30 = vrot.slane %v1085_v43, %v1474_v26  ;;  %v1013_v6 = vrot.slane %v1086_v34, %v1474_v26  ;;  %v1020_v58 = vrot.slane %v1087_v40, %v1474_v26 }
 0x167   :  { %v972_v7 = vcombine.low %v950_v28, %v957_v62  ;;  %v973_v56 = vcombine.low %v964_v55, %v971_v20 }
 0x168   :  { %v1021_v8 = vcombine.low %v999_v16, %v1006_v30  ;;  %v1022_v19 = vcombine.low %v1013_v6, %v1020_v58 }
 0x169   :  { %v980_v29 = vrot.slane %v972_v7, %v1474_v26  ;;  %v987_v31 = vrot.slane %v973_v56, %v1474_v26 }
 0x16a   :  { %v1029_v13 = vrot.slane %v1021_v8, %v1474_v26  ;;  %v1036_v51 = vrot.slane %v1022_v19, %v1474_v26 }
 0x16b   :  { %v988_v35 = vcombine.low %v980_v29, %v987_v31 }
 0x16c   :  { %v1037_v2 = vcombine.low %v1029_v13, %v1036_v51 }
 0x16d   :  { %1040 = vst [vmem:[%s1515_s5] sm:$0xff] %v988_v35 }
 0x16e   :  { %1041 = vst [vmem:[%s1515_s5 + $0x8] sm:$0xff] %v1037_v2 }
 0x16f   :  { %1046 = vsyncpa [#allocation3], 1 }
 0x170   :  { %1047 = vsyncpa [#allocation5], 1 }

// kernel: generator_forward.7
= control target key start
LH: loop header
LB: loop body
LE: loop exit
PB: predicated region body
PF: predicated region fallthrough
CT: control target
= control target key end

     0   :  { %10 = vsyncpa [#allocation3], 0  ;;  %s1185_s0 = inlined_call_operand.vmem [shape: bf16[128,144], index: 0, kind: input, shape index: {}]   ;;  %s1186_s1 = inlined_call_operand.hbm [shape: bf16[144,128], index: 1, kind: input, shape index: {}]   ;;  %s1187_s2 = inlined_call_operand.hbm [shape: f32[128,128], index: 2, kind: input, shape index: {}]   ;;  %s1188_s3 = inlined_call_operand.hbm [shape: f32[1,128], index: 3, kind: input, shape index: {}]   ;;  %s1189_s4 = inlined_call_operand.vmem [shape: f32[1,128], index: 4, kind: input, shape index: {}]   ;;  %s1190_s5 = inlined_call_operand.vmem [shape: bf16[128,128], index: 5, kind: output, shape index: {}]  }
   0x1   :  { %11 = vsyncpa [#allocation5], 0  ;;  %s956_s18 = smov [#allocation4]  }
   0x2   :  { %s31_s19 = sshll.u32 %s956_s18, 4  ;;  %s32_s19 = int_to_ptr.vmem [resolvable:$true] %s31_s19 }
   0x3   :  { %s900_s20 = scalar_lea.vmem %s32_s19, 2048  ;;  %p905_p1 = scmp.lt.s32.totalorder %s32_s19, %s32_s19 }
   0x4   :  { %p901_p0 = scmp.ne.s32.totalorder %s32_s19, %s900_s20  ;;  %p906_p2 = scmp.lt.s32.totalorder %s900_s20, %s900_s20 }
   0x6   :  { %p907_p3 = por %p906_p2, %p905_p1 }
   0x8   :  { %p908_p4 = pnand %p907_p3, %p901_p0 }
   0xa   :  { %911 = shalt.err (!%p908_p4)
}
   0xb   :  { %s957_s21 = smov 128   ;;  %s958_s22 = smov 8  }
   0xc   :  { %37 = dma.hbm_to_vmem [thread:$0]  %s1187_s2, 2048, %s32_s19, [#allocation5], %s957_s21, %s957_s21, %s958_s22  }
   0xd   :  { %s959_s25 = smov [#allocation2]  }
   0xe   :  { %s19_s26 = sshll.u32 %s959_s25, 4  ;;  %s20_s26 = int_to_ptr.vmem [resolvable:$true] %s19_s26 }
   0xf   :  { %s920_s27 = scalar_lea.vmem %s20_s26, 1152  ;;  %p925_p6 = scmp.lt.s32.totalorder %s20_s26, %s20_s26 }
  0x10   :  { %p921_p5 = scmp.ne.s32.totalorder %s20_s26, %s920_s27  ;;  %p926_p7 = scmp.lt.s32.totalorder %s920_s27, %s920_s27 }
  0x12   :  { %p927_p8 = por %p926_p7, %p925_p6 }
  0x14   :  { %p928_p9 = pnand %p927_p8, %p921_p5 }
  0x16   :  { %931 = shalt.err (!%p928_p9)
}
  0x17   :  { %s960_s28 = smov 64   ;;  %s961_s29 = smov 4  }
  0x18   :  { %25 = dma.hbm_to_vmem [thread:$0]  %s1186_s1, 1152, %s20_s26, [#allocation3], %s960_s28, %s960_s28, %s961_s29  }
  0x19   :  { %s962_s7 = smov [#allocation6]  }
  0x1a   :  { %s44_s8 = sshll.u32 %s962_s7, 4  ;;  %s45_s8 = int_to_ptr.vmem [resolvable:$true] %s44_s8 }
  0x1b   :  { %s940_s2 = scalar_lea.vmem %s45_s8, 16  ;;  %s944_s9 = scalar_lea.vmem %s45_s8, 32 }
  0x1c   :  { %p941_p10 = scmp.ne.s32.totalorder %s45_s8, %s940_s2  ;;  %p945_p11 = scmp.lt.s32.totalorder %s45_s8, %s45_s8 }
  0x1d   :  { %p946_p12 = scmp.lt.s32.totalorder %s944_s9, %s940_s2 }
  0x1f   :  { %p947_p13 = por %p946_p12, %p945_p11 }
  0x21   :  { %p948_p0 = pnand %p947_p13, %p941_p10 }
  0x23   :  { %951 = shalt.err (!%p948_p0)
}
  0x24   :  { %47 = dma.hbm_to_vmem [thread:$0]  %s1188_s3, 16, %s45_s8, [#allocation5]  }
  0x25   :  { %952 = dma.done.wait [#allocation3], 1152  }
  0x26   :  { %953 = vsyncadd [#allocation3], 4294966144 }
  0x27   :  { %954 = dma.done.wait [#allocation5], 2064  }
  0x28   :  { %955 = vsyncadd [#allocation5], 4294965232  ;;  %v963_v0 = vmov 0   ;;  %v857_v1 = vld [vmem:[#allocation2 + $0x38] sm:$0xff]   ;;  %v858_v2 = vld [vmem:[#allocation2 + $0x30] sm:$0xff]   ;;  %vm220_vm0 = vcmask 130048  }
  0x29   :  { %245 = vmatprep.subr.bf16.mxu0 %v963_v0  ;;  %828 = vmatprep.subr.bf16.mxu1 %v963_v0  ;;  %v859_v3 = vld [vmem:[#allocation2 + $0x28] sm:$0xff]   ;;  %v860_v4 = vld [vmem:[#allocation2 + $0x20] sm:$0xff]   ;;  %v868_v5 = vld [vmem:[%s1185_s0 + $0x4] ss:$8 sps:$4 sm:$0xff]   ;;  %v964_v26 = vmov 0.0   ;;  %vm965_vm1 = vmmov 0  }
  0x2a   :  { %246 = vmatpush1.bf16.msra.mxu0 %v857_v1  ;;  %837 = vmatpush1.bf16.msra.mxu1 %v857_v1  ;;  %v874_v6 = vld [vmem:[%s1185_s0 + $0x44] ss:$8 sps:$4 sm:$0xff]   ;;  %v863_v9 = vld [vmem:[#allocation2 + $0x8] sm:$0xff]   ;;  %v864_v10 = vld [vmem:[#allocation2] sm:$0xff]   ;;  %vm400_vm2 = vcmask 1040384  }
  0x2b   :  { %247 = vmatprep.subr.bf16.mxu0 %v963_v0  ;;  %829 = vmatprep.subr.bf16.mxu1 %v963_v0  ;;  %v861_v7 = vld [vmem:[#allocation2 + $0x18] sm:$0xff]   ;;  %v862_v8 = vld [vmem:[#allocation2 + $0x10] sm:$0xff]   ;;  %v865_v11 = vld [vmem:[#allocation2 + $0x40] sm:$0xff]  }
  0x2c   :  { %689 = vmatprep.mubr.msk.bf16.mxu0 %vm220_vm0, %v868_v5  ;;  %693 = vmatprep.mubr.msk.bf16.mxu1 %vm220_vm0, %v874_v6  ;;  %v866_v12 = vld [vmem:[%s1185_s0] ss:$8 sps:$4 sm:$0xff]   ;;  %v869_v14 = vld [vmem:[%s1185_s0 + $0x14] ss:$8 sps:$4 sm:$0xff]   ;;  %v871_v16 = vld [vmem:[%s1185_s0 + $0x10] ss:$8 sps:$4 sm:$0xff]  }
  0x2d   :  { %v872_v13 = vld [vmem:[%s1185_s0 + $0x40] ss:$8 sps:$4 sm:$0xff]   ;;  %v878_v15 = vld [vmem:[%s1185_s0 + $0x54] ss:$8 sps:$4 sm:$0xff]   ;;  %v880_v17 = vld [vmem:[%s1185_s0 + $0x50] ss:$8 sps:$4 sm:$0xff]  }
  0x2e   :  { %248 = vmatpush1.bf16.msra.mxu0 %v858_v2  ;;  %838 = vmatpush1.bf16.msra.mxu1 %v858_v2  ;;  %v875_v18 = vld [vmem:[%s1185_s0 + $0x24] ss:$8 sps:$4 sm:$0xff]   ;;  %v877_v20 = vld [vmem:[%s1185_s0 + $0x20] ss:$8 sps:$4 sm:$0xff]   ;;  %v881_v22 = vld [vmem:[%s1185_s0 + $0x34] ss:$8 sps:$4 sm:$0xff]  }
  0x2f   :  { %249 = vmatprep.subr.bf16.mxu0 %v963_v0  ;;  %830 = vmatprep.subr.bf16.mxu1 %v963_v0  ;;  %v884_v19 = vld [vmem:[%s1185_s0 + $0x64] ss:$8 sps:$4 sm:$0xff]   ;;  %v886_v21 = vld [vmem:[%s1185_s0 + $0x60] ss:$8 sps:$4 sm:$0xff]   ;;  %v887_v23 = vld [vmem:[%s1185_s0 + $0x74] ss:$8 sps:$4 sm:$0xff]  }
  0x30   :  { %v883_v24 = vld [vmem:[%s1185_s0 + $0x30] ss:$8 sps:$4 sm:$0xff]   ;;  %v416_v28 = vld [vmem:[#allocation4 + $0x70] sm:$0xff]  ;;  %v415_v29 = vld [vmem:[#allocation4 + $0x68] sm:$0xff] }
  0x31   :  { %v889_v25 = vld [vmem:[%s1185_s0 + $0x70] ss:$8 sps:$4 sm:$0xff]   ;;  %v412_v32 = vld [vmem:[#allocation4 + $0x50] sm:$0xff]  ;;  %v411_v33 = vld [vmem:[#allocation4 + $0x48] sm:$0xff] }
  0x32   :  { %250 = vmatpush1.bf16.msra.mxu0 %v859_v3  ;;  %839 = vmatpush1.bf16.msra.mxu1 %v859_v3  ;;  %v417_v27 = vld [vmem:[#allocation4 + $0x78] sm:$0xff]  ;;  %v414_v30 = vld [vmem:[#allocation4 + $0x60] sm:$0xff]  ;;  %v408_v36 = vld [vmem:[#allocation4 + $0x30] sm:$0xff] }
  0x33   :  { %251 = vmatprep.subr.bf16.mxu0 %v963_v0  ;;  %831 = vmatprep.subr.bf16.mxu1 %v963_v0  ;;  %v413_v31 = vld [vmem:[#allocation4 + $0x58] sm:$0xff]  ;;  %v410_v34 = vld [vmem:[#allocation4 + $0x40] sm:$0xff]  ;;  %v407_v37 = vld [vmem:[#allocation4 + $0x28] sm:$0xff] }
  0x34   :  { %v409_v35 = vld [vmem:[#allocation4 + $0x38] sm:$0xff]  ;;  %v406_v38 = vld [vmem:[#allocation4 + $0x20] sm:$0xff]  ;;  %v404_v40 = vld [vmem:[#allocation4 + $0x10] sm:$0xff] }
  0x35   :  { %v405_v39 = vld [vmem:[#allocation4 + $0x18] sm:$0xff]  ;;  %v403_v41 = vld [vmem:[#allocation4 + $0x8] sm:$0xff]  ;;  %v402_v42 = vld [vmem:[#allocation4] sm:$0xff] }
  0x36   :  { %252 = vmatpush1.bf16.msra.mxu0 %v860_v4  ;;  %840 = vmatpush1.bf16.msra.mxu1 %v860_v4 }
  0x37   :  { %253 = vmatprep.subr.bf16.mxu0 %v963_v0  ;;  %832 = vmatprep.subr.bf16.mxu1 %v963_v0 }
  0x3a   :  { %254 = vmatpush1.bf16.msra.mxu0 %v861_v7  ;;  %841 = vmatpush1.bf16.msra.mxu1 %v861_v7 }
  0x3b   :  { %255 = vmatprep.subr.bf16.mxu0 %v963_v0  ;;  %833 = vmatprep.subr.bf16.mxu1 %v963_v0 }
  0x3e   :  { %256 = vmatpush1.bf16.msra.mxu0 %v862_v8  ;;  %842 = vmatpush1.bf16.msra.mxu1 %v862_v8 }
  0x3f   :  { %257 = vmatprep.subr.bf16.mxu0 %v963_v0  ;;  %834 = vmatprep.subr.bf16.mxu1 %v963_v0 }
  0x42   :  { %258 = vmatpush1.bf16.msra.mxu0 %v863_v9  ;;  %843 = vmatpush1.bf16.msra.mxu1 %v863_v9 }
  0x43   :  { %259 = vmatprep.subr.bf16.mxu0 %v963_v0  ;;  %835 = vmatprep.subr.bf16.mxu1 %v963_v0 }
  0x46   :  { %260 = vmatpush1.bf16.msra.mxu0 %v864_v10  ;;  %844 = vmatpush1.bf16.msra.mxu1 %v864_v10 }
  0x47   :  { %275 = vmatprep.subr.bf16.mxu0 %v963_v0  ;;  %836 = vmatprep.subr.bf16.mxu1 %v963_v0 }
  0x4a   :  { %276 = vmatpush2.bf16.msra.mxu0 %v865_v11  ;;  %845 = vmatpush2.bf16.msra.mxu1 %v865_v11 }
  0x4b   :  { %793 = vmatprep.subr.mxu1 %v964_v26 }
  0x4d   :  { %278 = vmatmul.mubr.bf16.vlgmr.msra.gmra.mxu0 %v866_v12  ;;  %310 = vmatmul.mubr.bf16.vlgmr.msra.gmra.mxu1 %v872_v13 }
  0x4e   :  { %690 = vmatprep.mubr.msk.bf16.mxu0 %vm220_vm0, %v869_v14  ;;  %694 = vmatprep.mubr.msk.bf16.mxu1 %vm220_vm0, %v878_v15 }
  0x4f   :  { %794 = vmatpush3.msra.mxu1 %v417_v27 }
  0x50   :  { %795 = vmatprep.subr.mxu1 %v964_v26 }
  0x51   :  { %796 = vmatpush3.msra.mxu1 %v416_v28 }
  0x52   :  { %797 = vmatprep.subr.mxu1 %v964_v26 }
  0x53   :  { %798 = vmatpush3.msra.mxu1 %v415_v29 }
  0x54   :  { %799 = vmatprep.subr.mxu1 %v964_v26 }
  0x55   :  { %286 = vmatmul.mubr.bf16.gmra.mxu0 %v871_v16  ;;  %318 = vmatmul.mubr.bf16.gmra.mxu1 %v880_v17 }
  0x56   :  { %691 = vmatprep.mubr.msk.bf16.mxu0 %vm220_vm0, %v875_v18  ;;  %695 = vmatprep.mubr.msk.bf16.mxu1 %vm220_vm0, %v884_v19 }
  0x57   :  { %800 = vmatpush3.msra.mxu1 %v414_v30 }
  0x58   :  { %801 = vmatprep.subr.mxu1 %v964_v26 }
  0x59   :  { %802 = vmatpush3.msra.mxu1 %v413_v31 }
  0x5a   :  { %803 = vmatprep.subr.mxu1 %v964_v26 }
  0x5b   :  { %804 = vmatpush3.msra.mxu1 %v412_v32 }
  0x5c   :  { %805 = vmatprep.subr.mxu1 %v964_v26 }
  0x5d   :  { %294 = vmatmul.mubr.bf16.gmra.mxu0 %v877_v20  ;;  %326 = vmatmul.mubr.bf16.gmra.mxu1 %v886_v21 }
  0x5e   :  { %692 = vmatprep.mubr.msk.bf16.mxu0 %vm220_vm0, %v881_v22  ;;  %696 = vmatprep.mubr.msk.bf16.mxu1 %vm220_vm0, %v887_v23 }
  0x5f   :  { %806 = vmatpush3.msra.mxu1 %v411_v33 }
  0x60   :  { %807 = vmatprep.subr.mxu1 %v964_v26 }
  0x61   :  { %808 = vmatpush3.msra.mxu1 %v410_v34 }
  0x62   :  { %809 = vmatprep.subr.mxu1 %v964_v26 }
  0x63   :  { %810 = vmatpush3.msra.mxu1 %v409_v35 }
  0x64   :  { %811 = vmatprep.subr.mxu1 %v964_v26 }
  0x65   :  { %302 = vmatmul.mubr.bf16.gmra.mxu0 %v883_v24  ;;  %334 = vmatmul.mubr.bf16.gmra.mxu1 %v889_v25 }
  0x66   :  { %812 = vmatpush3.msra.mxu1 %v408_v36  ;;  %825 = vmatprep.mubr.msk.f32.mxu1 %vm965_vm1, %v964_v26 }
  0x67   :  { %813 = vmatprep.subr.mxu1 %v964_v26 }
  0x68   :  { %814 = vmatpush3.msra.mxu1 %v407_v37 }
  0x69   :  { %815 = vmatprep.subr.mxu1 %v964_v26 }
  0x6a   :  { %816 = vmatpush3.msra.mxu1 %v406_v38 }
  0x6b   :  { %817 = vmatprep.subr.mxu1 %v964_v26 }
  0x6c   :  { %818 = vmatpush3.msra.mxu1 %v405_v39 }
  0x6d   :  { %819 = vmatprep.subr.mxu1 %v964_v26 }
  0x6e   :  { %820 = vmatpush3.msra.mxu1 %v404_v40 }
  0x6f   :  { %821 = vmatprep.subr.mxu1 %v964_v26 }
  0x70   :  { %822 = vmatpush3.msra.mxu1 %v403_v41 }
  0x71   :  { %823 = vmatprep.subr.mxu1 %v964_v26 }
  0x72   :  { %824 = vmatpush3.msra.mxu1 %v402_v42 }
 0x10d   :  { %v1062_v43 = vpop.f32.mrf.mxu0  ;;  %v1064_v44 = vpop.f32.mrf.mxu1 }
 0x10e   :  { %v363_v62 = vmul.f32 %v1062_v43, %v1062_v43  ;;  %v371_v32 = vmul.f32 %v1064_v44, %v1064_v44 }
 0x10f   :  { %v281_v45 = vpop.f32.mrf.mxu0  ;;  %v313_v46 = vpop.f32.mrf.mxu1 }
 0x111   :  { %v1066_v47 = vpop.f32.mrf.mxu0  ;;  %v1068_v48 = vpop.f32.mrf.mxu1 }
 0x112   :  { %v364_v59 = vmul.f32 %v1066_v47, %v1066_v47  ;;  %v342_v63 = vadd.f32 %v1066_v47, %v1062_v43  ;;  %v372_v35 = vmul.f32 %v1068_v48, %v1068_v48 }
 0x113   :  { %v284_v49 = vpop.f32.mrf.mxu0  ;;  %v316_v50 = vpop.f32.mrf.mxu1 }
 0x114   :  { %v379_v3 = vadd.f32 %v364_v59, %v363_v62 }
 0x115   :  { %v1070_v51 = vpop.f32.mrf.mxu0  ;;  %v1072_v52 = vpop.f32.mrf.mxu1 }
 0x116   :  { %v365_v0 = vmul.f32 %v1070_v51, %v1070_v51  ;;  %v343_v4 = vadd.f32 %v342_v63, %v1070_v51  ;;  %v373_v38 = vmul.f32 %v1072_v52, %v1072_v52 }
 0x117   :  { %v289_v53 = vpop.f32.mrf.mxu0  ;;  %v321_v54 = vpop.f32.mrf.mxu1 }
 0x118   :  { %v380_v8 = vadd.f32 %v379_v3, %v365_v0 }
 0x119   :  { %v1074_v55 = vpop.f32.mrf.mxu0  ;;  %v1076_v56 = vpop.f32.mrf.mxu1 }
 0x11a   :  { %v366_v5 = vmul.f32 %v1074_v55, %v1074_v55  ;;  %v344_v9 = vadd.f32 %v343_v4, %v1074_v55  ;;  %v374_v41 = vmul.f32 %v1076_v56, %v1076_v56 }
 0x11b   :  { %v292_v57 = vpop.f32.mrf.mxu0  ;;  %v324_v58 = vpop.f32.mrf.mxu1 }
 0x11c   :  { %v381_v13 = vadd.f32 %v380_v8, %v366_v5 }
 0x11d   :  { %v1080_v60 = vpop.f32.mrf.mxu0  ;;  %v1082_v61 = vpop.f32.mrf.mxu1 }
 0x11e   :  { %v367_v10 = vmul.f32 %v1080_v60, %v1080_v60  ;;  %v345_v14 = vadd.f32 %v344_v9, %v1080_v60  ;;  %v375_v46 = vmul.f32 %v1082_v61, %v1082_v61 }
 0x11f   :  { %v297_v1 = vpop.f32.mrf.mxu0  ;;  %v329_v2 = vpop.f32.mrf.mxu1 }
 0x120   :  { %v382_v18 = vadd.f32 %v381_v13, %v367_v10 }
 0x121   :  { %v1093_v6 = vpop.f32.mrf.mxu0  ;;  %v1095_v7 = vpop.f32.mrf.mxu1 }
 0x122   :  { %v368_v15 = vmul.f32 %v1093_v6, %v1093_v6  ;;  %v346_v19 = vadd.f32 %v345_v14, %v1093_v6  ;;  %v376_v54 = vmul.f32 %v1095_v7, %v1095_v7 }
 0x123   :  { %v300_v11 = vpop.f32.mrf.mxu0  ;;  %v332_v12 = vpop.f32.mrf.mxu1 }
 0x124   :  { %v383_v23 = vadd.f32 %v382_v18, %v368_v15 }
 0x125   :  { %v1103_v16 = vpop.f32.mrf.mxu0  ;;  %v1105_v17 = vpop.f32.mrf.mxu1 }
 0x126   :  { %v369_v20 = vmul.f32 %v1103_v16, %v1103_v16  ;;  %v347_v24 = vadd.f32 %v346_v19, %v1103_v16  ;;  %v377_v62 = vmul.f32 %v1105_v17, %v1105_v17 }
 0x127   :  { %v305_v21 = vpop.f32.mrf.mxu0  ;;  %v337_v22 = vpop.f32.mrf.mxu1 }
 0x128   :  { %v384_v27 = vadd.f32 %v383_v23, %v369_v20 }
 0x129   :  { %v1111_v25 = vpop.f32.mrf.mxu0  ;;  %v1113_v26 = vpop.f32.mrf.mxu1 }
 0x12a   :  { %v348_v28 = vadd.f32 %v347_v24, %v1111_v25  ;;  %v370_v29 = vmul.f32 %v1111_v25, %v1111_v25  ;;  %v378_v1 = vmul.f32 %v1113_v26, %v1113_v26 }
 0x12b   :  { %v308_v30 = vpop.f32.mrf.mxu0  ;;  %v340_v31 = vpop.f32.mrf.mxu1 }
 0x12c   :  { %v349_v33 = vadd.f32 %v348_v28, %v1064_v44  ;;  %v385_v34 = vadd.f32 %v384_v27, %v370_v29  ;;  %v966_v29 = vmov 1966171168   ;;  %v501_v31 = vlaneseq }
 0x12d   :  { %v499_v30 = vunpack.c.l.s4 %v966_v29 }
 0x12e   :  { %v350_v36 = vadd.f32 %v349_v33, %v1068_v48  ;;  %v386_v37 = vadd.f32 %v385_v34, %v371_v32  ;;  %v502_v33 = vshrl.u32 %v501_v31, 7 }
 0x12f   :  { %v500_v32 = vunpack.c.0.s8 %v499_v30 }
 0x130   :  { %v387_v39 = vadd.f32 %v386_v37, %v372_v35  ;;  %v351_v40 = vadd.f32 %v350_v36, %v1072_v52 }
 0x131   :  { %v503_v34 = vsub.s32 %v500_v32, %v502_v33 }
 0x132   :  { %v352_v42 = vadd.f32 %v351_v40, %v1076_v56  ;;  %v388_v45 = vadd.f32 %v387_v39, %v373_v38  ;;  %v494_v38 = vld [vmem:[#allocation6] sm:$0x1]  ;;  %v521_v40 = vsub.s32 0, %v502_v33 }
 0x134   :  { %v353_v49 = vadd.f32 %v352_v42, %v1082_v61  ;;  %v389_v50 = vadd.f32 %v388_v45, %v374_v41  ;;  %v515_v42 = vld [vmem:[%s1189_s4] sm:$0x1] }
 0x136   :  { %v354_v53 = vadd.f32 %v353_v49, %v1095_v7  ;;  %v390_v57 = vadd.f32 %v389_v50, %v375_v46 }
 0x138   :  { %v391_v58 = vadd.f32 %v390_v57, %v376_v54  ;;  %v355_v59 = vadd.f32 %v354_v53, %v1105_v17 }
 0x13a   :  { %v392_v63 = vadd.f32 %v391_v58, %v377_v62  ;;  %v356_v0 = vadd.f32 %v355_v59, %v1113_v26 }
 0x13c   :  { %v357_v2 = vrot.slane %v356_v0, 4  ;;  %v393_v3 = vadd.f32 %v392_v63, %v378_v1 }
 0x13e   :  { %v358_v4 = vadd.f32 %v357_v2, %v356_v0  ;;  %v394_v5 = vrot.slane %v393_v3, 4 }
 0x140   :  { %v359_v8 = vrot.slane %v358_v4, 2  ;;  %v395_v9 = vadd.f32 %v394_v5, %v393_v3 }
 0x142   :  { %v360_v10 = vadd.f32 %v359_v8, %v358_v4  ;;  %v396_v11 = vrot.slane %v395_v9, 2 }
 0x144   :  { %v361_v12 = vrot.slane %v360_v10, 1  ;;  %v397_v13 = vadd.f32 %v396_v11, %v395_v9 }
 0x146   :  { %v398_v14 = vrot.slane %v397_v13, 1  ;;  %v362_v15 = vadd.f32 %v361_v12, %v360_v10 }
 0x148   :  { %v399_v18 = vadd.f32 %v398_v14, %v397_v13 }
 0x14a   :  { %v401_v19 = vsel %vm400_vm2, %v362_v15, %v399_v18 }
 0x14b   :  { %826 = vmatmul.mubr.f32.vlgmr.msra.gmra.mxu1 %v401_v19 }
 0x20b   :  { %v484_v20 = vpop.f32.mrf.mxu1 }
 0x20c   :  { %v488_v21 = vmul.f32 0.001953125, %v484_v20 }
 0x20d   :  { %v827_v22 = vpop.f32.mrf.mxu1 }
 0x20e   :  { %v489_v23 = vmul.f32 %v488_v21, %v488_v21 }
 0x210   :  { %v491_v24 = vrot.slane %v489_v23, 7 }
 0x212   :  { %v493_v27 = vsub.f32 %v488_v21, %v491_v24 }
 0x214   :  { %v495_v28 = vadd.f32 1e-05, %v493_v27 }
 0x216   :  { %890 = vrsqrt.f32 %v495_v28 }
 0x223   :  { %v891_v35 = vpop.eup %890 }
 0x224   :  { %v504_v36 = vrot.slane %v891_v35, %v503_v34 }
 0x226   :  { %v505_v37 = vcombine.high %v504_v36, %v504_v36 }
 0x228   :  { %v512_v39 = vrot.slane %v505_v37, %v503_v34 }
 0x22a   :  { %v514_v41 = vmul.f32 %v512_v39, %v494_v38 }
 0x22c   :  { %v516_v45 = vmul.f32 %v514_v41, %v488_v21  ;;  %v522_v46 = vrot.slane %v514_v41, %v521_v40 }
 0x22e   :  { %v517_v49 = vsub.f32 %v515_v42, %v516_v45  ;;  %v524_v50 = vmul.f32 %v522_v46, %v1062_v43  ;;  %v525_v53 = vmul.f32 %v522_v46, %v1066_v47  ;;  %v526_v54 = vmul.f32 %v522_v46, %v1070_v51 }
 0x22f   :  { %v527_v57 = vmul.f32 %v522_v46, %v1074_v55  ;;  %v528_v58 = vmul.f32 %v522_v46, %v1080_v60  ;;  %v529_v59 = vmul.f32 %v522_v46, %v1093_v6  ;;  %v530_v62 = vmul.f32 %v522_v46, %v1103_v16 }
 0x230   :  { %v531_v63 = vmul.f32 %v522_v46, %v1111_v25  ;;  %v532_v0 = vmul.f32 %v522_v46, %v1064_v44  ;;  %v533_v1 = vmul.f32 %v522_v46, %v1068_v48  ;;  %v534_v43 = vmul.f32 %v522_v46, %v1072_v52 }
 0x231   :  { %v535_v47 = vmul.f32 %v522_v46, %v1076_v56  ;;  %v544_v2 = vrot.slane %v517_v49, %v521_v40  ;;  %v536_v51 = vmul.f32 %v522_v46, %v1082_v61  ;;  %v537_v55 = vmul.f32 %v522_v46, %v1095_v7 }
 0x232   :  { %v538_v60 = vmul.f32 %v522_v46, %v1105_v17  ;;  %v539_v6 = vmul.f32 %v522_v46, %v1113_v26 }
 0x233   :  { %v546_v16 = vadd.f32 %v544_v2, %v524_v50  ;;  %v547_v3 = vadd.f32 %v544_v2, %v525_v53  ;;  %v548_v25 = vadd.f32 %v544_v2, %v526_v54  ;;  %v549_v4 = vadd.f32 %v544_v2, %v527_v57 }
 0x234   :  { %v550_v44 = vadd.f32 %v544_v2, %v528_v58  ;;  %v551_v5 = vadd.f32 %v544_v2, %v529_v59  ;;  %v552_v48 = vadd.f32 %v544_v2, %v530_v62  ;;  %v553_v8 = vadd.f32 %v544_v2, %v531_v63 }
 0x235   :  { %v554_v52 = vadd.f32 %v544_v2, %v532_v0  ;;  %v555_v9 = vadd.f32 %v544_v2, %v533_v1  ;;  %v556_v56 = vadd.f32 %v544_v2, %v534_v43  ;;  %v557_v10 = vadd.f32 %v544_v2, %v535_v47 }
 0x236   :  { %v558_v11 = vadd.f32 %v544_v2, %v536_v51  ;;  %v559_v61 = vadd.f32 %v544_v2, %v537_v55  ;;  %v560_v12 = vadd.f32 %v544_v2, %v538_v60  ;;  %v561_v7 = vadd.f32 %v544_v2, %v539_v6 }
 0x237   :  { %v562_v13 = vmax.f32 %v546_v16, 0.0  ;;  %v563_v17 = vmax.f32 %v547_v3, 0.0  ;;  %v564_v14 = vmax.f32 %v548_v25, 0.0  ;;  %v565_v26 = vmax.f32 %v549_v4, 0.0 }
 0x238   :  { %v566_v15 = vmax.f32 %v550_v44, 0.0  ;;  %v567_v18 = vmax.f32 %v551_v5, 0.0  ;;  %v568_v19 = vmax.f32 %v552_v48, 0.0  ;;  %v569_v20 = vmax.f32 %v553_v8, 0.0 }
 0x239   :  { %v570_v21 = vmax.f32 %v554_v52, 0.0  ;;  %v571_v22 = vmax.f32 %v555_v9, 0.0  ;;  %v572_v23 = vmax.f32 %v556_v56, 0.0  ;;  %v573_v24 = vmax.f32 %v557_v10, 0.0 }
 0x23a   :  { %v574_v27 = vmax.f32 %v558_v11, 0.0  ;;  %v575_v28 = vmax.f32 %v559_v61, 0.0  ;;  %v576_v29 = vmax.f32 %v560_v12, 0.0  ;;  %v577_v30 = vmax.f32 %v561_v7, 0.0 }
 0x23b   :  { %v732_v31 = vpack.c.bf16 %v563_v17, %v562_v13  ;;  %v737_v32 = vpack.c.bf16 %v565_v26, %v564_v14  ;;  %v742_v33 = vpack.c.bf16 %v567_v18, %v566_v15  ;;  %v747_v34 = vpack.c.bf16 %v569_v20, %v568_v19 }
 0x23c   :  { %v752_v35 = vpack.c.bf16 %v571_v22, %v570_v21  ;;  %v757_v36 = vpack.c.bf16 %v573_v24, %v572_v23  ;;  %v762_v37 = vpack.c.bf16 %v575_v28, %v574_v27  ;;  %v767_v38 = vpack.c.bf16 %v577_v30, %v576_v29 }
 0x23d   :  { %733 = vst [vmem:[%s1190_s5] sm:$0xff] %v732_v31   ;;  %769 = vst [vmem:[%s1190_s5 + $0x8] sm:$0xff] %v737_v32  }
 0x23e   :  { %770 = vst [vmem:[%s1190_s5 + $0x10] sm:$0xff] %v742_v33   ;;  %771 = vst [vmem:[%s1190_s5 + $0x18] sm:$0xff] %v747_v34  }
 0x23f   :  { %772 = vst [vmem:[%s1190_s5 + $0x20] sm:$0xff] %v752_v35   ;;  %773 = vst [vmem:[%s1190_s5 + $0x28] sm:$0xff] %v757_v36  }
 0x240   :  { %774 = vst [vmem:[%s1190_s5 + $0x30] sm:$0xff] %v762_v37   ;;  %775 = vst [vmem:[%s1190_s5 + $0x38] sm:$0xff] %v767_v38  }
 0x241   :  { %662 = vsyncpa [#allocation3], 1 }
 0x242   :  { %663 = vsyncpa [#allocation5], 1 }

// kernel: generator_forward.8
= control target key start
LH: loop header
LB: loop body
LE: loop exit
PB: predicated region body
PF: predicated region fallthrough
CT: control target
= control target key end

     0   :  { %vm378_vm0 = vcmask 1043456   ;;  %vm281_vm1 = vcmask 588800   ;;  %v2124_v38 = vmov 0.0   ;;  %vm2125_vm2 = vmmov 0   ;;  %s3391_s1 = inlined_call_operand.vmem [shape: bf16[72,128], index: 1, kind: input, shape index: {}]   ;;  %s3392_s0 = inlined_call_operand.vmem [shape: bf16[512,72], index: 0, kind: input, shape index: {}]   ;;  %s3393_s2 = inlined_call_operand.vmem [shape: f32[128,128], index: 2, kind: input, shape index: {}]   ;;  %s3394_s3 = inlined_call_operand.vmem [shape: f32[1,128], index: 3, kind: input, shape index: {}]   ;;  %s3395_s4 = inlined_call_operand.vmem [shape: f32[1,128], index: 4, kind: input, shape index: {}]   ;;  %s3396_s5 = inlined_call_operand.vmem [shape: bf16[512,128], index: 5, kind: output, shape index: {}]  }
   0x1   :  { %v2085_v0 = vld [vmem:[%s3391_s1 + $0x20] ss:$0 sps:$4 sm:$0xff]   ;;  %v2086_v1 = vld [vmem:[%s3391_s1 + $0x18] sm:$0xff]   ;;  %v2087_v3 = vld [vmem:[%s3391_s1 + $0x10] sm:$0xff]   ;;  %vm873_vm3 = vcmask 1040384  }
   0x2   :  { %2080 = vmatprep.subr.msk.bf16.mxu0 %vm378_vm0, %v2085_v0  ;;  %v380_v2 = vsel %vm378_vm0, %v2085_v0, 0  ;;  %2081 = vmatprep.subr.msk.bf16.mxu1 %vm378_vm0, %v2085_v0  ;;  %v2090_v4 = vld [vmem:[%s3392_s0] sm:$0xff]   ;;  %v2088_v5 = vld [vmem:[%s3391_s1 + $0x8] sm:$0xff]   ;;  %v2092_v8 = vld [vmem:[%s3392_s0 + $0x10] sm:$0xff]  }
   0x3   :  { %1962 = vmatpush3.bf16.msra.mxu0 %v380_v2  ;;  %2075 = vmatpush3.bf16.msra.mxu1 %v380_v2  ;;  %v2089_v6 = vld [vmem:[%s3391_s1] sm:$0xff]   ;;  %v2091_v7 = vld [vmem:[%s3392_s0 + $0x8] sm:$0xff]   ;;  %v2108_v9 = vld [vmem:[%s3392_s0 + $0x90] sm:$0xff]  }
   0x4   :  { %1963 = vmatprep.subr.bf16.mxu0 %v2086_v1  ;;  %2071 = vmatprep.subr.bf16.mxu1 %v2086_v1  ;;  %v2109_v10 = vld [vmem:[%s3392_s0 + $0x98] sm:$0xff]   ;;  %v2110_v11 = vld [vmem:[%s3392_s0 + $0xa0] sm:$0xff]   ;;  %v2111_v14 = vld [vmem:[%s3392_s0 + $0xa8] sm:$0xff]  }
   0x5   :  { %1971 = vmatprep.mubr.msk.bf16.mxu0 %vm281_vm1, %v2090_v4  ;;  %2007 = vmatprep.mubr.msk.bf16.mxu1 %vm281_vm1, %v2108_v9  ;;  %v2093_v12 = vld [vmem:[%s3392_s0 + $0x18] sm:$0xff]   ;;  %v2094_v13 = vld [vmem:[%s3392_s0 + $0x20] sm:$0xff]   ;;  %v2112_v15 = vld [vmem:[%s3392_s0 + $0xb0] sm:$0xff]  }
   0x6   :  { %v2095_v16 = vld [vmem:[%s3392_s0 + $0x28] sm:$0xff]   ;;  %v2096_v17 = vld [vmem:[%s3392_s0 + $0x30] sm:$0xff]   ;;  %v2113_v18 = vld [vmem:[%s3392_s0 + $0xb8] sm:$0xff]  }
   0x7   :  { %1964 = vmatpush3.bf16.msra.mxu0 %v2086_v1  ;;  %2076 = vmatpush3.bf16.msra.mxu1 %v2086_v1  ;;  %v2114_v19 = vld [vmem:[%s3392_s0 + $0xc0] sm:$0xff]   ;;  %v2097_v20 = vld [vmem:[%s3392_s0 + $0x38] sm:$0xff]   ;;  %v2115_v22 = vld [vmem:[%s3392_s0 + $0xc8] sm:$0xff]  }
   0x8   :  { %1965 = vmatprep.subr.bf16.mxu0 %v2087_v3  ;;  %2072 = vmatprep.subr.bf16.mxu1 %v2087_v3  ;;  %v2098_v21 = vld [vmem:[%s3392_s0 + $0x40] sm:$0xff]   ;;  %v2116_v23 = vld [vmem:[%s3392_s0 + $0xd0] sm:$0xff]   ;;  %v2099_v24 = vld [vmem:[%s3392_s0 + $0x48] sm:$0xff]  }
   0x9   :  { %v2100_v25 = vld [vmem:[%s3392_s0 + $0x50] sm:$0xff]   ;;  %v2117_v26 = vld [vmem:[%s3392_s0 + $0xd8] sm:$0xff]   ;;  %v2118_v27 = vld [vmem:[%s3392_s0 + $0xe0] sm:$0xff]  }
   0xa   :  { %v2101_v28 = vld [vmem:[%s3392_s0 + $0x58] sm:$0xff]   ;;  %v2102_v29 = vld [vmem:[%s3392_s0 + $0x60] sm:$0xff]   ;;  %v2119_v30 = vld [vmem:[%s3392_s0 + $0xe8] sm:$0xff]  }
   0xb   :  { %1966 = vmatpush3.bf16.msra.mxu0 %v2087_v3  ;;  %2077 = vmatpush3.bf16.msra.mxu1 %v2087_v3  ;;  %v2120_v31 = vld [vmem:[%s3392_s0 + $0xf0] sm:$0xff]   ;;  %v2103_v32 = vld [vmem:[%s3392_s0 + $0x68] sm:$0xff]   ;;  %v2121_v34 = vld [vmem:[%s3392_s0 + $0xf8] sm:$0xff]  }
   0xc   :  { %1967 = vmatprep.subr.bf16.mxu0 %v2088_v5  ;;  %2073 = vmatprep.subr.bf16.mxu1 %v2088_v5  ;;  %v2104_v33 = vld [vmem:[%s3392_s0 + $0x70] sm:$0xff]   ;;  %v2105_v35 = vld [vmem:[%s3392_s0 + $0x78] sm:$0xff]   ;;  %v2106_v36 = vld [vmem:[%s3392_s0 + $0x80] sm:$0xff]  }
   0xd   :  { %v2107_v37 = vld [vmem:[%s3392_s0 + $0x88] sm:$0xff]   ;;  %v890_v39 = vld [vmem:[%s3393_s2 + $0x78] sm:$0xff]  ;;  %v889_v40 = vld [vmem:[%s3393_s2 + $0x70] sm:$0xff] }
   0xe   :  { %v888_v41 = vld [vmem:[%s3393_s2 + $0x68] sm:$0xff]  ;;  %v887_v42 = vld [vmem:[%s3393_s2 + $0x60] sm:$0xff]  ;;  %v886_v43 = vld [vmem:[%s3393_s2 + $0x58] sm:$0xff] }
   0xf   :  { %1968 = vmatpush3.bf16.msra.mxu0 %v2088_v5  ;;  %2078 = vmatpush3.bf16.msra.mxu1 %v2088_v5  ;;  %v885_v44 = vld [vmem:[%s3393_s2 + $0x50] sm:$0xff]  ;;  %v884_v45 = vld [vmem:[%s3393_s2 + $0x48] sm:$0xff]  ;;  %v883_v46 = vld [vmem:[%s3393_s2 + $0x40] sm:$0xff] }
  0x10   :  { %1969 = vmatprep.subr.bf16.mxu0 %v2089_v6  ;;  %2074 = vmatprep.subr.bf16.mxu1 %v2089_v6  ;;  %v882_v50 = vld [vmem:[%s3393_s2 + $0x38] sm:$0xff]  ;;  %v881_v52 = vld [vmem:[%s3393_s2 + $0x30] sm:$0xff]  ;;  %v880_v57 = vld [vmem:[%s3393_s2 + $0x28] sm:$0xff] }
  0x11   :  { %v879_v62 = vld [vmem:[%s3393_s2 + $0x20] sm:$0xff]  ;;  %v878_v2 = vld [vmem:[%s3393_s2 + $0x18] sm:$0xff]  ;;  %v877_v4 = vld [vmem:[%s3393_s2 + $0x10] sm:$0xff] }
  0x12   :  { %v876_v9 = vld [vmem:[%s3393_s2 + $0x8] sm:$0xff] }
  0x13   :  { %1970 = vmatpush3.bf16.msra.mxu0 %v2089_v6  ;;  %2079 = vmatpush3.bf16.msra.mxu1 %v2089_v6 }
  0x14   :  { %2035 = vmatprep.subr.mxu1 %v2124_v38 }
  0x16   :  { %1972 = vmatmul.mubr.msk.bf16.vlgmr.msra.gmra.mxu0 %vm281_vm1, %v2091_v7  ;;  %2008 = vmatmul.mubr.msk.bf16.vlgmr.msra.gmra.mxu1 %vm281_vm1, %v2109_v10 }
  0x17   :  { %1975 = vmatprep.mubr.msk.bf16.mxu0 %vm281_vm1, %v2092_v8  ;;  %2011 = vmatprep.mubr.msk.bf16.mxu1 %vm281_vm1, %v2110_v11 }
  0x18   :  { %2036 = vmatpush3.msra.mxu1 %v890_v39 }
  0x19   :  { %2037 = vmatprep.subr.mxu1 %v2124_v38 }
  0x1a   :  { %2038 = vmatpush3.msra.mxu1 %v889_v40 }
  0x1b   :  { %2039 = vmatprep.subr.mxu1 %v2124_v38 }
  0x1c   :  { %2040 = vmatpush3.msra.mxu1 %v888_v41 }
  0x1d   :  { %2041 = vmatprep.subr.mxu1 %v2124_v38 }
  0x1e   :  { %1976 = vmatmul.mubr.msk.bf16.gmra.mxu0 %vm281_vm1, %v2093_v12  ;;  %2012 = vmatmul.mubr.msk.bf16.gmra.mxu1 %vm281_vm1, %v2111_v14 }
  0x1f   :  { %1979 = vmatprep.mubr.msk.bf16.mxu0 %vm281_vm1, %v2094_v13  ;;  %2015 = vmatprep.mubr.msk.bf16.mxu1 %vm281_vm1, %v2112_v15  ;;  %v875_v15 = vld [vmem:[%s3393_s2] sm:$0xff] }
  0x20   :  { %2042 = vmatpush3.msra.mxu1 %v887_v42 }
  0x21   :  { %2043 = vmatprep.subr.mxu1 %v2124_v38 }
  0x22   :  { %2044 = vmatpush3.msra.mxu1 %v886_v43 }
  0x23   :  { %2045 = vmatprep.subr.mxu1 %v2124_v38 }
  0x24   :  { %2046 = vmatpush3.msra.mxu1 %v885_v44 }
  0x25   :  { %2047 = vmatprep.subr.mxu1 %v2124_v38 }
  0x26   :  { %1980 = vmatmul.mubr.msk.bf16.gmra.mxu0 %vm281_vm1, %v2095_v16  ;;  %2016 = vmatmul.mubr.msk.bf16.gmra.mxu1 %vm281_vm1, %v2113_v18 }
  0x27   :  { %1983 = vmatprep.mubr.msk.bf16.mxu0 %vm281_vm1, %v2096_v17  ;;  %2019 = vmatprep.mubr.msk.bf16.mxu1 %vm281_vm1, %v2114_v19 }
  0x28   :  { %2048 = vmatpush3.msra.mxu1 %v884_v45 }
  0x29   :  { %2049 = vmatprep.subr.mxu1 %v2124_v38 }
  0x2a   :  { %2050 = vmatpush3.msra.mxu1 %v883_v46 }
  0x2b   :  { %2051 = vmatprep.subr.mxu1 %v2124_v38 }
  0x2c   :  { %2052 = vmatpush3.msra.mxu1 %v882_v50 }
  0x2d   :  { %2053 = vmatprep.subr.mxu1 %v2124_v38 }
  0x2e   :  { %1984 = vmatmul.mubr.msk.bf16.gmra.mxu0 %vm281_vm1, %v2097_v20  ;;  %2020 = vmatmul.mubr.msk.bf16.gmra.mxu1 %vm281_vm1, %v2115_v22 }
  0x2f   :  { %1987 = vmatprep.mubr.msk.bf16.mxu0 %vm281_vm1, %v2098_v21  ;;  %2023 = vmatprep.mubr.msk.bf16.mxu1 %vm281_vm1, %v2116_v23 }
  0x30   :  { %2054 = vmatpush3.msra.mxu1 %v881_v52 }
  0x31   :  { %2055 = vmatprep.subr.mxu1 %v2124_v38 }
  0x32   :  { %2056 = vmatpush3.msra.mxu1 %v880_v57 }
  0x33   :  { %2057 = vmatprep.subr.mxu1 %v2124_v38 }
  0x34   :  { %2058 = vmatpush3.msra.mxu1 %v879_v62 }
  0x35   :  { %2059 = vmatprep.subr.mxu1 %v2124_v38 }
  0x36   :  { %1988 = vmatmul.mubr.msk.bf16.gmra.mxu0 %vm281_vm1, %v2099_v24  ;;  %2024 = vmatmul.mubr.msk.bf16.gmra.mxu1 %vm281_vm1, %v2117_v26 }
  0x37   :  { %1991 = vmatprep.mubr.msk.bf16.mxu0 %vm281_vm1, %v2100_v25  ;;  %2027 = vmatprep.mubr.msk.bf16.mxu1 %vm281_vm1, %v2118_v27 }
  0x38   :  { %2060 = vmatpush3.msra.mxu1 %v878_v2 }
  0x39   :  { %2061 = vmatprep.subr.mxu1 %v2124_v38 }
  0x3a   :  { %2062 = vmatpush3.msra.mxu1 %v877_v4 }
  0x3b   :  { %2063 = vmatprep.subr.mxu1 %v2124_v38 }
  0x3c   :  { %2064 = vmatpush3.msra.mxu1 %v876_v9 }
  0x3d   :  { %2065 = vmatprep.subr.mxu1 %v2124_v38 }
  0x3e   :  { %1992 = vmatmul.mubr.msk.bf16.gmra.mxu0 %vm281_vm1, %v2101_v28  ;;  %2028 = vmatmul.mubr.msk.bf16.gmra.mxu1 %vm281_vm1, %v2119_v30 }
  0x3f   :  { %1995 = vmatprep.mubr.msk.bf16.mxu0 %vm281_vm1, %v2102_v29  ;;  %2031 = vmatprep.mubr.msk.bf16.mxu1 %vm281_vm1, %v2120_v31 }
  0x40   :  { %2066 = vmatpush3.msra.mxu1 %v875_v15 }
  0x46   :  { %1996 = vmatmul.mubr.msk.bf16.gmra.mxu0 %vm281_vm1, %v2103_v32  ;;  %2032 = vmatmul.mubr.msk.bf16.gmra.mxu1 %vm281_vm1, %v2121_v34 }
  0x47   :  { %1999 = vmatprep.mubr.msk.bf16.mxu0 %vm281_vm1, %v2104_v33  ;;  %2067 = vmatprep.mubr.msk.f32.mxu1 %vm2125_vm2, %v2124_v38 }
  0x4e   :  { %2000 = vmatmul.mubr.msk.bf16.gmra.mxu0 %vm281_vm1, %v2105_v35 }
  0x4f   :  { %2003 = vmatprep.mubr.msk.bf16.mxu0 %vm281_vm1, %v2106_v36 }
  0x56   :  { %2004 = vmatmul.mubr.msk.bf16.gmra.mxu0 %vm281_vm1, %v2107_v37 }
  0xd6   :  { %v2332_v47 = vpop.f32.mrf.mxu0  ;;  %v2396_v14 = vpop.f32.mrf.mxu1 }
  0xd7   :  { %v742_v58 = vmul.f32 %v2332_v47, %v2332_v47 }
  0xd8   :  { %v2335_v48 = vpop.f32.mrf.mxu0  ;;  %v2413_v24 = vpop.f32.mrf.mxu1 }
  0xd9   :  { %v740_v53 = vmul.f32 %v2335_v48, %v2335_v48  ;;  %3425 = vst [vmem:[#allocation2_spill] sm:$0xff] %v2413_v24 }
  0xda   :  { %v2337_v49 = vpop.f32.mrf.mxu0  ;;  %v2425_v33 = vpop.f32.mrf.mxu1 }
  0xdb   :  { %v743_v63 = vmul.f32 %v2337_v49, %v2337_v49 }
  0xdc   :  { %v2342_v51 = vpop.f32.mrf.mxu0  ;;  %v2437_v42 = vpop.f32.mrf.mxu1 }
  0xdd   :  { %v671_v54 = vadd.f32 %v2342_v51, %v2335_v48  ;;  %v741_v55 = vmul.f32 %v2342_v51, %v2342_v51  ;;  %3426 = vst [vmem:[#allocation3_spill] sm:$0xff] %v2437_v42 }
  0xde   :  { %v2354_v56 = vpop.f32.mrf.mxu0 }
  0xdf   :  { %v672_v59 = vadd.f32 %v2332_v47, %v671_v54  ;;  %v804_v60 = vadd.f32 %v741_v55, %v740_v53  ;;  %v746_v16 = vmul.f32 %v2354_v56, %v2354_v56  ;;  %v2449_v55 = vpop.f32.mrf.mxu1 }
  0xe0   :  { %v2363_v61 = vpop.f32.mrf.mxu0 }
  0xe1   :  { %v805_v0 = vadd.f32 %v804_v60, %v742_v58  ;;  %v673_v1 = vadd.f32 %v2337_v49, %v672_v59  ;;  %v744_v6 = vmul.f32 %v2363_v61, %v2363_v61  ;;  %v2461_v2 = vpop.f32.mrf.mxu1 }
  0xe2   :  { %v2375_v3 = vpop.f32.mrf.mxu0  ;;  %3427 = vst [vmem:[#allocation4_spill] sm:$0xff] %v2461_v2 }
  0xe3   :  { %v674_v5 = vadd.f32 %v673_v1, %v2363_v61  ;;  %v806_v7 = vadd.f32 %v805_v0, %v743_v63  ;;  %v747_v20 = vmul.f32 %v2375_v3, %v2375_v3  ;;  %v2473_v15 = vpop.f32.mrf.mxu1 }
  0xe4   :  { %v2384_v8 = vpop.f32.mrf.mxu0 }
  0xe5   :  { %v807_v10 = vadd.f32 %v806_v7, %v744_v6  ;;  %v675_v11 = vadd.f32 %v674_v5, %v2384_v8  ;;  %v745_v12 = vmul.f32 %v2384_v8, %v2384_v8 }
  0xe6   :  { %v2394_v13 = vpop.f32.mrf.mxu0 }
  0xe7   :  { %v676_v17 = vadd.f32 %v2354_v56, %v675_v11  ;;  %v808_v18 = vadd.f32 %v807_v10, %v745_v12  ;;  %v750_v34 = vmul.f32 %v2394_v13, %v2394_v13 }
  0xe8   :  { %v2405_v19 = vpop.f32.mrf.mxu0 }
  0xe9   :  { %v809_v21 = vadd.f32 %v808_v18, %v746_v16  ;;  %v677_v22 = vadd.f32 %v2375_v3, %v676_v17  ;;  %v748_v26 = vmul.f32 %v2405_v19, %v2405_v19 }
  0xea   :  { %v2411_v23 = vpop.f32.mrf.mxu0 }
  0xeb   :  { %v678_v25 = vadd.f32 %v677_v22, %v2405_v19  ;;  %v810_v27 = vadd.f32 %v809_v21, %v747_v20  ;;  %v751_v38 = vmul.f32 %v2411_v23, %v2411_v23 }
  0xec   :  { %v2418_v28 = vpop.f32.mrf.mxu0 }
  0xed   :  { %v811_v29 = vadd.f32 %v810_v27, %v748_v26  ;;  %v679_v30 = vadd.f32 %v678_v25, %v2418_v28  ;;  %v749_v31 = vmul.f32 %v2418_v28, %v2418_v28  ;;  %v2485_v27 = vpop.f32.mrf.mxu1 }
  0xee   :  { %v2423_v32 = vpop.f32.mrf.mxu0  ;;  %3428 = vst [vmem:[#allocation5_spill] sm:$0xff] %v2485_v27 }
  0xef   :  { %v680_v35 = vadd.f32 %v2394_v13, %v679_v30  ;;  %v812_v36 = vadd.f32 %v811_v29, %v749_v31  ;;  %v754_v57 = vmul.f32 %v2423_v32, %v2423_v32 }
  0xf0   :  { %v2430_v37 = vpop.f32.mrf.mxu0 }
  0xf1   :  { %v813_v39 = vadd.f32 %v812_v36, %v750_v34  ;;  %v681_v40 = vadd.f32 %v2411_v23, %v680_v35  ;;  %v752_v44 = vmul.f32 %v2430_v37, %v2430_v37 }
  0xf2   :  { %v2435_v41 = vpop.f32.mrf.mxu0 }
  0xf3   :  { %v682_v43 = vadd.f32 %v681_v40, %v2430_v37  ;;  %v814_v45 = vadd.f32 %v813_v39, %v751_v38  ;;  %v755_v62 = vmul.f32 %v2435_v41, %v2435_v41  ;;  %v2497_v40 = vpop.f32.mrf.mxu1 }
  0xf4   :  { %v2442_v46 = vpop.f32.mrf.mxu0 }
  0xf5   :  { %v815_v50 = vadd.f32 %v814_v45, %v752_v44  ;;  %v683_v52 = vadd.f32 %v682_v43, %v2442_v46  ;;  %v753_v53 = vmul.f32 %v2442_v46, %v2442_v46 }
  0xf6   :  { %v2447_v54 = vpop.f32.mrf.mxu0 }
  0xf7   :  { %v684_v58 = vadd.f32 %v2423_v32, %v683_v52  ;;  %v816_v59 = vadd.f32 %v815_v50, %v753_v53  ;;  %v758_v16 = vmul.f32 %v2447_v54, %v2447_v54 }
  0xf8   :  { %v2454_v60 = vpop.f32.mrf.mxu0 }
  0xf9   :  { %v817_v63 = vadd.f32 %v816_v59, %v754_v57  ;;  %v685_v0 = vadd.f32 %v2435_v41, %v684_v58  ;;  %v756_v5 = vmul.f32 %v2454_v60, %v2454_v60  ;;  %v2509_v59 = vpop.f32.mrf.mxu1 }
  0xfa   :  { %v2459_v1 = vpop.f32.mrf.mxu0  ;;  %3429 = vst [vmem:[#allocation6_spill] sm:$0xff] %v2509_v59 }
  0xfb   :  { %v686_v4 = vadd.f32 %v685_v0, %v2454_v60  ;;  %v818_v6 = vadd.f32 %v817_v63, %v755_v62  ;;  %v759_v21 = vmul.f32 %v2459_v1, %v2459_v1 }
  0xfc   :  { %v2466_v7 = vpop.f32.mrf.mxu0 }
  0xfd   :  { %v819_v9 = vadd.f32 %v818_v6, %v756_v5  ;;  %v687_v10 = vadd.f32 %v686_v4, %v2466_v7  ;;  %v757_v11 = vmul.f32 %v2466_v7, %v2466_v7 }
  0xfe   :  { %v2471_v12 = vpop.f32.mrf.mxu0 }
  0xff   :  { %v688_v17 = vadd.f32 %v2447_v54, %v687_v10  ;;  %v820_v18 = vadd.f32 %v819_v9, %v757_v11  ;;  %v762_v43 = vmul.f32 %v2471_v12, %v2471_v12  ;;  %v2521_v11 = vpop.f32.mrf.mxu1 }
 0x100   :  { %v2478_v20 = vpop.f32.mrf.mxu0 }
 0x101   :  { %v821_v22 = vadd.f32 %v820_v18, %v758_v16  ;;  %v689_v25 = vadd.f32 %v2459_v1, %v688_v17  ;;  %v760_v30 = vmul.f32 %v2478_v20, %v2478_v20 }
 0x102   :  { %v2483_v26 = vpop.f32.mrf.mxu0 }
 0x103   :  { %v690_v29 = vadd.f32 %v689_v25, %v2478_v20  ;;  %v822_v31 = vadd.f32 %v821_v22, %v759_v21  ;;  %v763_v52 = vmul.f32 %v2483_v26, %v2483_v26 }
 0x104   :  { %v2490_v34 = vpop.f32.mrf.mxu0 }
 0x105   :  { %v823_v35 = vadd.f32 %v822_v31, %v760_v30  ;;  %v691_v36 = vadd.f32 %v690_v29, %v2490_v34  ;;  %v761_v38 = vmul.f32 %v2490_v34, %v2490_v34  ;;  %v2533_v31 = vpop.f32.mrf.mxu1 }
 0x106   :  { %v2495_v39 = vpop.f32.mrf.mxu0  ;;  %3430 = vst [vmem:[#allocation7_spill] sm:$0xff] %v2533_v31 }
 0x107   :  { %v692_v44 = vadd.f32 %v2471_v12, %v691_v36  ;;  %v824_v45 = vadd.f32 %v823_v35, %v761_v38  ;;  %v766_v16 = vmul.f32 %v2495_v39, %v2495_v39 }
 0x108   :  { %v2502_v50 = vpop.f32.mrf.mxu0 }
 0x109   :  { %v825_v53 = vadd.f32 %v824_v45, %v762_v43  ;;  %v693_v57 = vadd.f32 %v2483_v26, %v692_v44  ;;  %v764_v63 = vmul.f32 %v2502_v50, %v2502_v50 }
 0x10a   :  { %v2507_v58 = vpop.f32.mrf.mxu0 }
 0x10b   :  { %v694_v62 = vadd.f32 %v693_v57, %v2502_v50  ;;  %v826_v0 = vadd.f32 %v825_v53, %v763_v52  ;;  %v767_v22 = vmul.f32 %v2507_v58, %v2507_v58  ;;  %v2545_v57 = vpop.f32.mrf.mxu1 }
 0x10c   :  { %v2514_v4 = vpop.f32.mrf.mxu0 }
 0x10d   :  { %v827_v5 = vadd.f32 %v826_v0, %v764_v63  ;;  %v695_v6 = vadd.f32 %v694_v62, %v2514_v4  ;;  %v765_v9 = vmul.f32 %v2514_v4, %v2514_v4 }
 0x10e   :  { %v2519_v10 = vpop.f32.mrf.mxu0 }
 0x10f   :  { %v696_v17 = vadd.f32 %v2495_v39, %v695_v6  ;;  %v828_v18 = vadd.f32 %v827_v5, %v765_v9  ;;  %v770_v62 = vmul.f32 %v2519_v10, %v2519_v10 }
 0x110   :  { %v2526_v21 = vpop.f32.mrf.mxu0 }
 0x111   :  { %v829_v25 = vadd.f32 %v828_v18, %v766_v16  ;;  %v697_v29 = vadd.f32 %v2507_v58, %v696_v17  ;;  %v768_v36 = vmul.f32 %v2526_v21, %v2526_v21  ;;  %v2557_v18 = vpop.f32.mrf.mxu1 }
 0x112   :  { %v2531_v30 = vpop.f32.mrf.mxu0  ;;  %3432 = vst [vmem:[#allocation9_spill] sm:$0xff] %v2557_v18 }
 0x113   :  { %v698_v35 = vadd.f32 %v697_v29, %v2526_v21  ;;  %v830_v38 = vadd.f32 %v829_v25, %v767_v22  ;;  %v771_v6 = vmul.f32 %v2531_v30, %v2531_v30 }
 0x114   :  { %v2538_v43 = vpop.f32.mrf.mxu0 }
 0x115   :  { %v831_v44 = vadd.f32 %v830_v38, %v768_v36  ;;  %v699_v45 = vadd.f32 %v698_v35, %v2538_v43  ;;  %v769_v52 = vmul.f32 %v2538_v43, %v2538_v43 }
 0x116   :  { %v2543_v53 = vpop.f32.mrf.mxu0 }
 0x117   :  { %v700_v63 = vadd.f32 %v2519_v10, %v699_v45  ;;  %v832_v0 = vadd.f32 %v831_v44, %v769_v52  ;;  %v2567_v45 = vpop.f32.mrf.mxu1  ;;  %v774_v52 = vmul.f32 %v2543_v53, %v2543_v53 }
 0x118   :  { %v2550_v5 = vpop.f32.mrf.mxu0  ;;  %3434 = vst [vmem:[#allocation11_spill] sm:$0xff] %v2567_v45 }
 0x119   :  { %v833_v9 = vadd.f32 %v832_v0, %v770_v62  ;;  %v701_v16 = vadd.f32 %v2531_v30, %v700_v63  ;;  %v772_v25 = vmul.f32 %v2550_v5, %v2550_v5 }
 0x11a   :  { %v2555_v17 = vpop.f32.mrf.mxu0 }
 0x11b   :  { %3431 = vst [vmem:[#allocation8_spill] sm:$0xff] %v2555_v17  ;;  %v702_v22 = vadd.f32 %v701_v16, %v2550_v5  ;;  %v834_v29 = vadd.f32 %v833_v9, %v771_v6  ;;  %v775_v0 = vmul.f32 %v2555_v17, %v2555_v17  ;;  %v2575_v16 = vpop.f32.mrf.mxu1 }
 0x11c   :  { %v2562_v35 = vpop.f32.mrf.mxu0  ;;  %3435 = vst [vmem:[#allocation12_spill] sm:$0xff] %v2575_v16 }
 0x11d   :  { %3433 = vst [vmem:[#allocation10_spill] sm:$0xff] %v2562_v35  ;;  %v835_v36 = vadd.f32 %v834_v29, %v772_v25  ;;  %v703_v38 = vadd.f32 %v702_v22, %v2562_v35  ;;  %v773_v44 = vmul.f32 %v2562_v35, %v2562_v35  ;;  %v776_v22 = vmul.f32 %v2413_v24, %v2413_v24 }
 0x11f   :  { %v704_v62 = vadd.f32 %v2543_v53, %v703_v38  ;;  %v836_v63 = vadd.f32 %v835_v36, %v773_v44  ;;  %v777_v38 = vmul.f32 %v2437_v42, %v2437_v42  ;;  %v2583_v44 = vpop.f32.mrf.mxu1 }
 0x120   :  { %3436 = vst [vmem:[#allocation13_spill] sm:$0xff] %v2583_v44 }
 0x121   :  { %v705_v6 = vadd.f32 %v2555_v17, %v704_v62  ;;  %v837_v9 = vadd.f32 %v836_v63, %v774_v52  ;;  %v778_v62 = vmul.f32 %v2396_v14, %v2396_v14  ;;  %v779_v17 = vmul.f32 %v2425_v33, %v2425_v33 }
 0x123   :  { %v838_v25 = vadd.f32 %v837_v9, %v775_v0  ;;  %v706_v29 = vadd.f32 %v705_v6, %v2413_v24  ;;  %v2591_v9 = vpop.f32.mrf.mxu1 }
 0x124   :  { %3437 = vst [vmem:[#allocation14_spill] sm:$0xff] %v2591_v9 }
 0x125   :  { %v707_v35 = vadd.f32 %v706_v29, %v2437_v42  ;;  %v839_v36 = vadd.f32 %v838_v25, %v776_v22  ;;  %v780_v22 = vmul.f32 %v2461_v2, %v2461_v2 }
 0x127   :  { %v708_v52 = vadd.f32 %v2396_v14, %v707_v35  ;;  %v840_v63 = vadd.f32 %v839_v36, %v777_v38  ;;  %v781_v35 = vmul.f32 %v2485_v27, %v2485_v27  ;;  %v2599_v38 = vpop.f32.mrf.mxu1  ;;  %v782_v36 = vmul.f32 %v2449_v55, %v2449_v55 }
 0x128   :  { %3438 = vst [vmem:[#allocation15_spill] sm:$0xff] %v2599_v38 }
 0x129   :  { %v841_v0 = vadd.f32 %v840_v63, %v778_v62  ;;  %v709_v6 = vadd.f32 %v2425_v33, %v708_v52  ;;  %v783_v63 = vmul.f32 %v2473_v15, %v2473_v15 }
 0x12b   :  { %v710_v29 = vadd.f32 %v709_v6, %v2461_v2  ;;  %v842_v25 = vadd.f32 %v841_v0, %v779_v17  ;;  %v2607_v0 = vpop.f32.mrf.mxu1 }
 0x12c   :  { %3439 = vst [vmem:[#allocation16_spill] sm:$0xff] %v2607_v0 }
 0x12d   :  { %v843_v42 = vadd.f32 %v842_v25, %v780_v22  ;;  %v711_v24 = vadd.f32 %v710_v29, %v2485_v27  ;;  %v784_v22 = vmul.f32 %v2509_v59, %v2509_v59 }
 0x12f   :  { %v712_v62 = vadd.f32 %v2449_v55, %v711_v24  ;;  %v844_v52 = vadd.f32 %v843_v42, %v781_v35  ;;  %v785_v24 = vmul.f32 %v2533_v31, %v2533_v31  ;;  %v2615_v42 = vpop.f32.mrf.mxu1  ;;  %v786_v35 = vmul.f32 %v2497_v40, %v2497_v40 }
 0x130   :  { %3440 = vst [vmem:[#allocation17_spill] sm:$0xff] %v2615_v42 }
 0x131   :  { %v845_v6 = vadd.f32 %v844_v52, %v782_v36  ;;  %v713_v17 = vadd.f32 %v2473_v15, %v712_v62  ;;  %v787_v52 = vmul.f32 %v2521_v11, %v2521_v11 }
 0x133   :  { %v714_v29 = vadd.f32 %v713_v17, %v2509_v59  ;;  %v846_v25 = vadd.f32 %v845_v6, %v783_v63  ;;  %v2623_v6 = vpop.f32.mrf.mxu1 }
 0x134   :  { %3441 = vst [vmem:[#allocation18_spill] sm:$0xff] %v2623_v6 }
 0x135   :  { %v847_v27 = vadd.f32 %v846_v25, %v784_v22  ;;  %v715_v2 = vadd.f32 %v714_v29, %v2533_v31  ;;  %v788_v22 = vmul.f32 %v2557_v18, %v2557_v18 }
 0x137   :  { %v716_v36 = vadd.f32 %v2497_v40, %v715_v2  ;;  %v848_v62 = vadd.f32 %v847_v27, %v785_v24  ;;  %v789_v2 = vmul.f32 %v2575_v16, %v2575_v16  ;;  %v2631_v27 = vpop.f32.mrf.mxu1  ;;  %v790_v24 = vmul.f32 %v2545_v57, %v2545_v57 }
 0x138   :  { %3442 = vst [vmem:[#allocation19_spill] sm:$0xff] %v2631_v27 }
 0x139   :  { %v849_v17 = vadd.f32 %v848_v62, %v786_v35  ;;  %v717_v63 = vadd.f32 %v2521_v11, %v716_v36  ;;  %v791_v62 = vmul.f32 %v2567_v45, %v2567_v45 }
 0x13b   :  { %v718_v29 = vadd.f32 %v717_v63, %v2557_v18  ;;  %v850_v25 = vadd.f32 %v849_v17, %v787_v52  ;;  %v2639_v17 = vpop.f32.mrf.mxu1 }
 0x13c   :  { %3443 = vst [vmem:[#allocation20_spill] sm:$0xff] %v2639_v17 }
 0x13d   :  { %v851_v31 = vadd.f32 %v850_v25, %v788_v22  ;;  %v719_v59 = vadd.f32 %v718_v29, %v2575_v16  ;;  %v792_v22 = vmul.f32 %v2591_v9, %v2591_v9 }
 0x13f   :  { %v720_v35 = vadd.f32 %v2545_v57, %v719_v59  ;;  %v852_v36 = vadd.f32 %v851_v31, %v789_v2  ;;  %v793_v59 = vmul.f32 %v2607_v0, %v2607_v0  ;;  %v2647_v31 = vpop.f32.mrf.mxu1  ;;  %v794_v2 = vmul.f32 %v2583_v44, %v2583_v44 }
 0x140   :  { %3444 = vst [vmem:[#allocation21_spill] sm:$0xff] %v2647_v31 }
 0x141   :  { %v853_v63 = vadd.f32 %v852_v36, %v790_v24  ;;  %v721_v52 = vadd.f32 %v2567_v45, %v720_v35  ;;  %v795_v36 = vmul.f32 %v2599_v38, %v2599_v38 }
 0x143   :  { %v722_v29 = vadd.f32 %v721_v52, %v2591_v9  ;;  %v854_v25 = vadd.f32 %v853_v63, %v791_v62  ;;  %v2655_v63 = vpop.f32.mrf.mxu1 }
 0x144   :  { %3445 = vst [vmem:[#allocation22_spill] sm:$0xff] %v2655_v63 }
 0x145   :  { %v855_v16 = vadd.f32 %v854_v25, %v792_v22  ;;  %v723_v18 = vadd.f32 %v722_v29, %v2607_v0  ;;  %v796_v22 = vmul.f32 %v2623_v6, %v2623_v6 }
 0x147   :  { %v724_v24 = vadd.f32 %v2583_v44, %v723_v18  ;;  %v856_v35 = vadd.f32 %v855_v16, %v793_v59  ;;  %v797_v18 = vmul.f32 %v2639_v17, %v2639_v17  ;;  %v2663_v16 = vpop.f32.mrf.mxu1  ;;  %v798_v59 = vmul.f32 %v2615_v42, %v2615_v42 }
 0x149   :  { %v857_v52 = vadd.f32 %v856_v35, %v794_v2  ;;  %v725_v62 = vadd.f32 %v2599_v38, %v724_v24  ;;  %v799_v35 = vmul.f32 %v2631_v27, %v2631_v27 }
 0x14b   :  { %v726_v29 = vadd.f32 %v725_v62, %v2623_v6  ;;  %v858_v25 = vadd.f32 %v857_v52, %v795_v36  ;;  %v2671_v52 = vpop.f32.mrf.mxu1 }
 0x14c   :  { %3446 = vst [vmem:[#allocation23_spill] sm:$0xff] %v2671_v52 }
 0x14d   :  { %v859_v0 = vadd.f32 %v858_v25, %v796_v22  ;;  %v727_v9 = vadd.f32 %v726_v29, %v2639_v17  ;;  %v800_v22 = vmul.f32 %v2655_v63, %v2655_v63 }
 0x14f   :  { %v728_v2 = vadd.f32 %v2615_v42, %v727_v9  ;;  %v860_v24 = vadd.f32 %v859_v0, %v797_v18  ;;  %v801_v9 = vmul.f32 %v2671_v52, %v2671_v52  ;;  %v802_v0 = vmul.f32 %v2647_v31, %v2647_v31 }
 0x151   :  { %v861_v62 = vadd.f32 %v860_v24, %v798_v59  ;;  %v729_v36 = vadd.f32 %v2631_v27, %v728_v2  ;;  %v803_v2 = vmul.f32 %v2663_v16, %v2663_v16 }
 0x153   :  { %v730_v29 = vadd.f32 %v729_v36, %v2655_v63  ;;  %v862_v25 = vadd.f32 %v861_v62, %v799_v35 }
 0x155   :  { %v863_v17 = vadd.f32 %v862_v25, %v800_v22  ;;  %v731_v6 = vadd.f32 %v730_v29, %v2671_v52 }
 0x157   :  { %v732_v18 = vadd.f32 %v2647_v31, %v731_v6  ;;  %v864_v59 = vadd.f32 %v863_v17, %v801_v9 }
 0x159   :  { %v733_v24 = vadd.f32 %v2663_v16, %v732_v18  ;;  %v865_v36 = vadd.f32 %v864_v59, %v802_v0 }
 0x15b   :  { %v734_v63 = vrot.slane %v733_v24, 4  ;;  %v866_v35 = vadd.f32 %v865_v36, %v803_v2 }
 0x15d   :  { %v735_v62 = vadd.f32 %v734_v63, %v733_v24  ;;  %v867_v22 = vrot.slane %v866_v35, 4  ;;  %v2126_v24 = vmov 1966171168  }
 0x15e   :  { %v972_v36 = vunpack.c.l.s4 %v2126_v24  ;;  %v3447_v24 = vld [vmem:[#allocation10_spill] sm:$0xff] }
 0x15f   :  { %v736_v29 = vrot.slane %v735_v62, 2  ;;  %v868_v25 = vadd.f32 %v867_v22, %v866_v35  ;;  %v974_v35 = vlaneseq }
 0x161   :  { %v737_v27 = vadd.f32 %v736_v29, %v735_v62  ;;  %v869_v52 = vrot.slane %v868_v25, 2  ;;  %v973_v62 = vunpack.c.0.s8 %v972_v36  ;;  %v2685_v22 = vshrl.u32 %v974_v35, 7  ;;  %v3448_v36 = vld [vmem:[#allocation8_spill] sm:$0xff]  ;;  %v3449_v35 = vld [vmem:[#allocation2_spill] sm:$0xff] }
 0x163   :  { %v738_v42 = vrot.slane %v737_v27, 1  ;;  %v870_v38 = vadd.f32 %v869_v52, %v868_v25  ;;  %v976_v52 = vsub.s32 %v973_v62, %v2685_v22  ;;  %v3419_v29 = vsub.s32 0, %v2685_v22  ;;  %v3450_v62 = vld [vmem:[#allocation3_spill] sm:$0xff] }
 0x165   :  { %v871_v44 = vrot.slane %v870_v38, 1  ;;  %v739_v6 = vadd.f32 %v738_v42, %v737_v27  ;;  %v967_v27 = vld [vmem:[%s3394_s3] sm:$0x1] }
 0x167   :  { %v872_v17 = vadd.f32 %v871_v44, %v870_v38 }
 0x169   :  { %v874_v9 = vsel %vm873_vm3, %v739_v6, %v872_v17  ;;  %v2695_v6 = vld [vmem:[%s3395_s4] sm:$0x1] }
 0x16a   :  { %2068 = vmatmul.mubr.f32.vlgmr.msra.gmra.mxu1 %v874_v9 }
 0x22a   :  { %v957_v31 = vpop.f32.mrf.mxu1 }
 0x22b   :  { %v961_v45 = vmul.f32 0.00048828125, %v957_v31 }
 0x22c   :  { %v2069_v18 = vpop.f32.mrf.mxu1 }
 0x22d   :  { %v962_v0 = vmul.f32 %v961_v45, %v961_v45 }
 0x22f   :  { %v964_v59 = vrot.slane %v962_v0, 7 }
 0x231   :  { %v966_v2 = vsub.f32 %v961_v45, %v964_v59 }
 0x233   :  { %v968_v63 = vadd.f32 1e-05, %v966_v2 }
 0x235   :  { %2122 = vrsqrt.f32 %v968_v63 }
 0x242   :  { %v2123_v42 = vpop.eup %2122 }
 0x243   :  { %v977_v44 = vrot.slane %v2123_v42, %v976_v52  ;;  %v3451_v42 = vld [vmem:[#allocation4_spill] sm:$0xff] }
 0x245   :  { %v978_v38 = vcombine.high %v977_v44, %v977_v44 }
 0x247   :  { %v985_v31 = vrot.slane %v978_v38, %v976_v52  ;;  %v3452_v38 = vld [vmem:[#allocation5_spill] sm:$0xff] }
 0x249   :  { %v987_v25 = vmul.f32 %v985_v31, %v967_v27 }
 0x24b   :  { %v2697_v17 = vmul.f32 %v987_v25, %v961_v45  ;;  %v2701_v9 = vrot.slane %v987_v25, %v3419_v29  ;;  %v3453_v25 = vld [vmem:[#allocation6_spill] sm:$0xff]  ;;  %v3465_v29 = vld [vmem:[#allocation13_spill] sm:$0xff] }
 0x24d   :  { %v990_v18 = vsub.f32 %v2695_v6, %v2697_v17  ;;  %v2707_v0 = vmul.f32 %v2701_v9, %v2335_v48  ;;  %v2711_v59 = vmul.f32 %v2701_v9, %v2342_v51  ;;  %v2715_v2 = vmul.f32 %v2332_v47, %v2701_v9  ;;  %v3454_v6 = vld [vmem:[#allocation7_spill] sm:$0xff] }
 0x24e   :  { %v2719_v45 = vmul.f32 %v2337_v49, %v2701_v9  ;;  %v2723_v63 = vmul.f32 %v2701_v9, %v2363_v61  ;;  %v2727_v48 = vmul.f32 %v2701_v9, %v2384_v8  ;;  %v2731_v51 = vmul.f32 %v2354_v56, %v2701_v9 }
 0x24f   :  { %v2735_v47 = vmul.f32 %v2375_v3, %v2701_v9  ;;  %v2739_v49 = vmul.f32 %v2701_v9, %v2405_v19  ;;  %v2743_v61 = vmul.f32 %v2701_v9, %v2418_v28  ;;  %v2747_v8 = vmul.f32 %v2394_v13, %v2701_v9 }
 0x250   :  { %v2751_v56 = vmul.f32 %v2411_v23, %v2701_v9  ;;  %v2755_v3 = vmul.f32 %v2701_v9, %v2430_v37  ;;  %v2759_v19 = vmul.f32 %v2701_v9, %v2442_v46  ;;  %v2763_v28 = vmul.f32 %v2423_v32, %v2701_v9 }
 0x251   :  { %v2767_v13 = vmul.f32 %v2435_v41, %v2701_v9  ;;  %v2771_v23 = vmul.f32 %v2701_v9, %v2454_v60  ;;  %v2775_v37 = vmul.f32 %v2701_v9, %v2466_v7  ;;  %v2779_v46 = vmul.f32 %v2447_v54, %v2701_v9 }
 0x252   :  { %v2783_v32 = vmul.f32 %v2459_v1, %v2701_v9  ;;  %v2787_v41 = vmul.f32 %v2701_v9, %v2478_v20  ;;  %v2791_v60 = vmul.f32 %v2701_v9, %v2490_v34  ;;  %v2795_v7 = vmul.f32 %v2471_v12, %v2701_v9 }
 0x253   :  { %v2799_v54 = vmul.f32 %v2483_v26, %v2701_v9  ;;  %v2803_v1 = vmul.f32 %v2701_v9, %v2502_v50  ;;  %v2807_v20 = vmul.f32 %v2701_v9, %v2514_v4  ;;  %v2811_v34 = vmul.f32 %v2495_v39, %v2701_v9 }
 0x254   :  { %v2815_v12 = vmul.f32 %v2507_v58, %v2701_v9  ;;  %v2819_v26 = vmul.f32 %v2701_v9, %v2526_v21  ;;  %v2823_v50 = vmul.f32 %v2701_v9, %v2538_v43  ;;  %v2827_v4 = vmul.f32 %v2519_v10, %v2701_v9 }
 0x255   :  { %v2831_v39 = vmul.f32 %v2531_v30, %v2701_v9  ;;  %v2835_v58 = vmul.f32 %v2701_v9, %v2550_v5  ;;  %v2839_v21 = vmul.f32 %v2701_v9, %v3447_v24  ;;  %v2843_v43 = vmul.f32 %v2543_v53, %v2701_v9 }
 0x256   :  { %v2847_v10 = vmul.f32 %v3448_v36, %v2701_v9  ;;  %v2851_v30 = vmul.f32 %v2701_v9, %v3449_v35  ;;  %v2855_v5 = vmul.f32 %v2701_v9, %v3450_v62  ;;  %v2859_v52 = vmul.f32 %v2396_v14, %v2701_v9  ;;  %v3455_v36 = vld [vmem:[#allocation9_spill] sm:$0xff]  ;;  %v3456_v35 = vld [vmem:[#allocation12_spill] sm:$0xff] }
 0x257   :  { %v2863_v53 = vmul.f32 %v2425_v33, %v2701_v9  ;;  %v2867_v44 = vmul.f32 %v2701_v9, %v3451_v42  ;;  %v2871_v27 = vmul.f32 %v2701_v9, %v3452_v38  ;;  %v2875_v31 = vmul.f32 %v2449_v55, %v2701_v9  ;;  %v3459_v38 = vld [vmem:[#allocation11_spill] sm:$0xff] }
 0x258   :  { %v2879_v14 = vmul.f32 %v2473_v15, %v2701_v9  ;;  %v2883_v33 = vmul.f32 %v2701_v9, %v3453_v25  ;;  %v2887_v17 = vmul.f32 %v2701_v9, %v3454_v6  ;;  %v2891_v24 = vmul.f32 %v2497_v40, %v2701_v9  ;;  %v3461_v25 = vld [vmem:[#allocation14_spill] sm:$0xff]  ;;  %v3463_v6 = vld [vmem:[#allocation16_spill] sm:$0xff] }
 0x259   :  { %v2895_v55 = vmul.f32 %v2521_v11, %v2701_v9  ;;  %v2899_v15 = vmul.f32 %v2701_v9, %v3455_v36  ;;  %v2903_v62 = vmul.f32 %v2701_v9, %v3456_v35  ;;  %v2907_v42 = vmul.f32 %v2545_v57, %v2701_v9 }
 0x25a   :  { %v2911_v40 = vmul.f32 %v3459_v38, %v2701_v9  ;;  %v2915_v11 = vmul.f32 %v2701_v9, %v3461_v25  ;;  %v2919_v36 = vmul.f32 %v2701_v9, %v3463_v6  ;;  %v2923_v35 = vmul.f32 %v3465_v29, %v2701_v9 }
 0x25b   :  { %3457 = vst [vmem:[#allocation10_spill] sm:$0xff] %v2903_v62  ;;  %3458 = vst [vmem:[#allocation8_spill] sm:$0xff] %v2907_v42  ;;  %v3467_v62 = vld [vmem:[#allocation15_spill] sm:$0xff]  ;;  %v3469_v42 = vld [vmem:[#allocation18_spill] sm:$0xff] }
 0x25c   :  { %3460 = vst [vmem:[#allocation2_spill] sm:$0xff] %v2911_v40  ;;  %3462 = vst [vmem:[#allocation3_spill] sm:$0xff] %v2915_v11  ;;  %v2927_v57 = vmul.f32 %v3467_v62, %v2701_v9  ;;  %v2931_v38 = vmul.f32 %v2701_v9, %v3469_v42  ;;  %v3471_v40 = vld [vmem:[#allocation20_spill] sm:$0xff]  ;;  %v3473_v11 = vld [vmem:[#allocation17_spill] sm:$0xff] }
 0x25d   :  { %3464 = vst [vmem:[#allocation4_spill] sm:$0xff] %v2919_v36  ;;  %3466 = vst [vmem:[#allocation5_spill] sm:$0xff] %v2923_v35  ;;  %v2935_v25 = vmul.f32 %v2701_v9, %v3471_v40  ;;  %v2939_v6 = vmul.f32 %v3473_v11, %v2701_v9  ;;  %v3474_v36 = vld [vmem:[#allocation19_spill] sm:$0xff]  ;;  %v3475_v35 = vsub.s32 0, %v2685_v22 }
 0x25e   :  { %3468 = vst [vmem:[#allocation6_spill] sm:$0xff] %v2927_v57  ;;  %3470 = vst [vmem:[#allocation7_spill] sm:$0xff] %v2931_v38  ;;  %v2943_v29 = vmul.f32 %v3474_v36, %v2701_v9  ;;  %v3476_v57 = vld [vmem:[#allocation22_spill] sm:$0xff]  ;;  %v3477_v38 = vld [vmem:[#allocation23_spill] sm:$0xff]  ;;  %v2963_v36 = vmul.f32 %v2663_v16, %v2701_v9 }
 0x25f   :  { %3472 = vst [vmem:[#allocation9_spill] sm:$0xff] %v2935_v25  ;;  %v2947_v62 = vrot.slane %v990_v18, %v3475_v35  ;;  %v2951_v42 = vmul.f32 %v2701_v9, %v3476_v57  ;;  %v2955_v40 = vmul.f32 %v2701_v9, %v3477_v38  ;;  %v3478_v25 = vld [vmem:[#allocation21_spill] sm:$0xff] }
 0x260   :  { %v2959_v11 = vmul.f32 %v3478_v25, %v2701_v9 }
 0x261   :  { %v2967_v22 = vadd.f32 %v2947_v62, %v2707_v0  ;;  %v2971_v18 = vadd.f32 %v2947_v62, %v2711_v59  ;;  %v2975_v35 = vadd.f32 %v2947_v62, %v2715_v2  ;;  %v2979_v57 = vadd.f32 %v2947_v62, %v2719_v45 }
 0x262   :  { %v2983_v16 = vadd.f32 %v2947_v62, %v2723_v63  ;;  %v2987_v9 = vadd.f32 %v2947_v62, %v2727_v48  ;;  %v2991_v0 = vadd.f32 %v2947_v62, %v2731_v51  ;;  %v2995_v59 = vadd.f32 %v2947_v62, %v2735_v47  ;;  %v3489_v38 = vld [vmem:[#allocation8_spill] sm:$0xff] }
 0x263   :  { %3479 = vst [vmem:[#allocation12_spill] sm:$0xff] %v2967_v22  ;;  %3480 = vst [vmem:[#allocation11_spill] sm:$0xff] %v2971_v18  ;;  %v2999_v2 = vadd.f32 %v2947_v62, %v2739_v49  ;;  %v3003_v45 = vadd.f32 %v2947_v62, %v2743_v61  ;;  %v3007_v63 = vadd.f32 %v2947_v62, %v2747_v8  ;;  %v3491_v25 = vld [vmem:[#allocation2_spill] sm:$0xff] }
 0x264   :  { %3481 = vst [vmem:[#allocation14_spill] sm:$0xff] %v2975_v35  ;;  %3482 = vst [vmem:[#allocation16_spill] sm:$0xff] %v2979_v57  ;;  %v3011_v48 = vadd.f32 %v2947_v62, %v2751_v56  ;;  %v3015_v51 = vadd.f32 %v2947_v62, %v2755_v3  ;;  %v3019_v47 = vadd.f32 %v2947_v62, %v2759_v19 }
 0x265   :  { %3483 = vst [vmem:[#allocation13_spill] sm:$0xff] %v2983_v16  ;;  %v3023_v49 = vadd.f32 %v2947_v62, %v2763_v28  ;;  %v3027_v61 = vadd.f32 %v2947_v62, %v2767_v13  ;;  %v3031_v8 = vadd.f32 %v2947_v62, %v2771_v23  ;;  %v3035_v56 = vadd.f32 %v2947_v62, %v2775_v37 }
 0x266   :  { %v3039_v3 = vadd.f32 %v2947_v62, %v2779_v46  ;;  %v3043_v19 = vadd.f32 %v2947_v62, %v2783_v32  ;;  %v3047_v28 = vadd.f32 %v2947_v62, %v2787_v41  ;;  %v3051_v13 = vadd.f32 %v2947_v62, %v2791_v60 }
 0x267   :  { %v3055_v23 = vadd.f32 %v2947_v62, %v2795_v7  ;;  %v3059_v37 = vadd.f32 %v2947_v62, %v2799_v54  ;;  %v3063_v46 = vadd.f32 %v2947_v62, %v2803_v1  ;;  %v3067_v32 = vadd.f32 %v2947_v62, %v2807_v20 }
 0x268   :  { %v3071_v41 = vadd.f32 %v2947_v62, %v2811_v34  ;;  %v3075_v60 = vadd.f32 %v2947_v62, %v2815_v12  ;;  %v3079_v7 = vadd.f32 %v2947_v62, %v2819_v26  ;;  %v3083_v54 = vadd.f32 %v2947_v62, %v2823_v50 }
 0x269   :  { %v3087_v1 = vadd.f32 %v2947_v62, %v2827_v4  ;;  %v3091_v20 = vadd.f32 %v2947_v62, %v2831_v39  ;;  %v3095_v34 = vadd.f32 %v2947_v62, %v2835_v58  ;;  %v3099_v12 = vadd.f32 %v2947_v62, %v2839_v21 }
 0x26a   :  { %v3103_v26 = vadd.f32 %v2947_v62, %v2843_v43  ;;  %v3107_v50 = vadd.f32 %v2947_v62, %v2847_v10  ;;  %v3111_v4 = vadd.f32 %v2947_v62, %v2851_v30  ;;  %v3115_v39 = vadd.f32 %v2947_v62, %v2855_v5 }
 0x26b   :  { %v3119_v58 = vadd.f32 %v2947_v62, %v2859_v52  ;;  %v3123_v21 = vadd.f32 %v2947_v62, %v2863_v53  ;;  %v3127_v43 = vadd.f32 %v2947_v62, %v2867_v44  ;;  %v3131_v10 = vadd.f32 %v2947_v62, %v2871_v27 }
 0x26c   :  { %v3135_v30 = vadd.f32 %v2947_v62, %v2875_v31  ;;  %v3139_v5 = vadd.f32 %v2947_v62, %v2879_v14  ;;  %v3143_v52 = vadd.f32 %v2947_v62, %v2883_v33  ;;  %v3147_v53 = vadd.f32 %v2947_v62, %v2887_v17  ;;  %v3487_v14 = vld [vmem:[#allocation10_spill] sm:$0xff] }
 0x26d   :  { %v3151_v44 = vadd.f32 %v2947_v62, %v2891_v24  ;;  %v3155_v27 = vadd.f32 %v2947_v62, %v2895_v55  ;;  %v3159_v31 = vadd.f32 %v2947_v62, %v2899_v15  ;;  %v3163_v33 = vadd.f32 %v2947_v62, %v3487_v14 }
 0x26e   :  { %v3167_v17 = vadd.f32 %v2947_v62, %v3489_v38  ;;  %v3171_v24 = vadd.f32 %v2947_v62, %v3491_v25 }
 0x26f   :  { %3484 = vst [vmem:[#allocation15_spill] sm:$0xff] %v3151_v44  ;;  %3485 = vst [vmem:[#allocation18_spill] sm:$0xff] %v3155_v27  ;;  %v3493_v44 = vld [vmem:[#allocation3_spill] sm:$0xff]  ;;  %v3494_v27 = vld [vmem:[#allocation4_spill] sm:$0xff] }
 0x270   :  { %3486 = vst [vmem:[#allocation20_spill] sm:$0xff] %v3159_v31  ;;  %3488 = vst [vmem:[#allocation17_spill] sm:$0xff] %v3163_v33  ;;  %v3175_v55 = vadd.f32 %v2947_v62, %v3493_v44  ;;  %v3179_v15 = vadd.f32 %v2947_v62, %v3494_v27  ;;  %v3495_v31 = vld [vmem:[#allocation5_spill] sm:$0xff]  ;;  %v3496_v33 = vld [vmem:[#allocation6_spill] sm:$0xff]  ;;  %v3199_v27 = vadd.f32 %v2947_v62, %v2939_v6 }
 0x271   :  { %3490 = vst [vmem:[#allocation19_spill] sm:$0xff] %v3167_v17  ;;  %3492 = vst [vmem:[#allocation22_spill] sm:$0xff] %v3171_v24  ;;  %v3183_v14 = vadd.f32 %v2947_v62, %v3495_v31  ;;  %v3187_v38 = vadd.f32 %v2947_v62, %v3496_v33  ;;  %v3497_v17 = vld [vmem:[#allocation7_spill] sm:$0xff]  ;;  %v3498_v24 = vld [vmem:[#allocation9_spill] sm:$0xff]  ;;  %v3203_v31 = vadd.f32 %v2947_v62, %v2943_v29  ;;  %v1142_v29 = vmax.f32 %v3011_v48, 0.0 }
 0x272   :  { %v3191_v25 = vadd.f32 %v2947_v62, %v3497_v17  ;;  %v3195_v44 = vadd.f32 %v2947_v62, %v3498_v24  ;;  %3499 = vst [vmem:[#allocation23_spill] sm:$0xff] %v3199_v27  ;;  %v3207_v33 = vadd.f32 %v2947_v62, %v2951_v42  ;;  %v3211_v17 = vadd.f32 %v2947_v62, %v2955_v40 }
 0x273   :  { %3500 = vst [vmem:[#allocation21_spill] sm:$0xff] %v3203_v31  ;;  %v3215_v24 = vadd.f32 %v2947_v62, %v2959_v11  ;;  %v3219_v6 = vadd.f32 %v2947_v62, %v2963_v36  ;;  %v1136_v40 = vmax.f32 %v2987_v9, 0.0  ;;  %v1138_v11 = vmax.f32 %v2995_v59, 0.0 }
 0x274   :  { %3501 = vst [vmem:[#allocation10_spill] sm:$0xff] %v3207_v33  ;;  %3502 = vst [vmem:[#allocation8_spill] sm:$0xff] %v3211_v17  ;;  %v1137_v17 = vmax.f32 %v2991_v0, 0.0  ;;  %v1140_v62 = vmax.f32 %v3003_v45, 0.0  ;;  %v1141_v36 = vmax.f32 %v3007_v63, 0.0  ;;  %v1143_v31 = vmax.f32 %v3015_v51, 0.0 }
 0x275   :  { %3503 = vst [vmem:[#allocation2_spill] sm:$0xff] %v3215_v24  ;;  %3504 = vst [vmem:[#allocation3_spill] sm:$0xff] %v3219_v6  ;;  %v1139_v24 = vmax.f32 %v2999_v2, 0.0  ;;  %v1144_v42 = vmax.f32 %v3019_v47, 0.0  ;;  %v1145_v33 = vmax.f32 %v3023_v49, 0.0  ;;  %v1146_v9 = vmax.f32 %v3027_v61, 0.0 }
 0x276   :  { %v1147_v0 = vmax.f32 %v3031_v8, 0.0  ;;  %v1148_v59 = vmax.f32 %v3035_v56, 0.0  ;;  %v1149_v2 = vmax.f32 %v3039_v3, 0.0  ;;  %v1150_v45 = vmax.f32 %v3043_v19, 0.0  ;;  %v3505_v27 = vld [vmem:[#allocation15_spill] sm:$0xff]  ;;  %v3506_v16 = vld [vmem:[#allocation18_spill] sm:$0xff] }
 0x277   :  { %v1151_v63 = vmax.f32 %v3047_v28, 0.0  ;;  %v1152_v48 = vmax.f32 %v3051_v13, 0.0  ;;  %v1153_v51 = vmax.f32 %v3055_v23, 0.0  ;;  %v1154_v47 = vmax.f32 %v3059_v37, 0.0  ;;  %v3507_v57 = vld [vmem:[#allocation20_spill] sm:$0xff]  ;;  %v3508_v35 = vld [vmem:[#allocation17_spill] sm:$0xff] }
 0x278   :  { %v1155_v49 = vmax.f32 %v3063_v46, 0.0  ;;  %v1156_v61 = vmax.f32 %v3067_v32, 0.0  ;;  %v1157_v8 = vmax.f32 %v3071_v41, 0.0  ;;  %v1158_v56 = vmax.f32 %v3075_v60, 0.0  ;;  %v3509_v18 = vld [vmem:[#allocation19_spill] sm:$0xff]  ;;  %v3510_v22 = vld [vmem:[#allocation22_spill] sm:$0xff] }
 0x279   :  { %v1159_v3 = vmax.f32 %v3079_v7, 0.0  ;;  %v1160_v19 = vmax.f32 %v3083_v54, 0.0  ;;  %v1161_v28 = vmax.f32 %v3087_v1, 0.0  ;;  %v1162_v13 = vmax.f32 %v3091_v20, 0.0  ;;  %v3511_v6 = vld [vmem:[#allocation23_spill] sm:$0xff] }
 0x27a   :  { %v1163_v23 = vmax.f32 %v3095_v34, 0.0  ;;  %v1164_v37 = vmax.f32 %v3099_v12, 0.0  ;;  %v1165_v46 = vmax.f32 %v3103_v26, 0.0  ;;  %v1166_v32 = vmax.f32 %v3107_v50, 0.0 }
 0x27b   :  { %v1167_v41 = vmax.f32 %v3111_v4, 0.0  ;;  %v1168_v60 = vmax.f32 %v3115_v39, 0.0  ;;  %v1169_v7 = vmax.f32 %v3119_v58, 0.0  ;;  %v1170_v54 = vmax.f32 %v3123_v21, 0.0 }
 0x27c   :  { %v1171_v1 = vmax.f32 %v3127_v43, 0.0  ;;  %v1172_v20 = vmax.f32 %v3131_v10, 0.0  ;;  %v1173_v34 = vmax.f32 %v3135_v30, 0.0  ;;  %v1174_v12 = vmax.f32 %v3139_v5, 0.0 }
 0x27d   :  { %v1175_v26 = vmax.f32 %v3143_v52, 0.0  ;;  %v1176_v50 = vmax.f32 %v3147_v53, 0.0  ;;  %v1177_v4 = vmax.f32 %v3505_v27, 0.0  ;;  %v1178_v39 = vmax.f32 %v3506_v16, 0.0 }
 0x27e   :  { %v1179_v58 = vmax.f32 %v3507_v57, 0.0  ;;  %v1180_v21 = vmax.f32 %v3508_v35, 0.0  ;;  %v1181_v43 = vmax.f32 %v3509_v18, 0.0  ;;  %v1182_v10 = vmax.f32 %v3510_v22, 0.0  ;;  %v3512_v35 = vld [vmem:[#allocation21_spill] sm:$0xff]  ;;  %v3513_v22 = vld [vmem:[#allocation10_spill] sm:$0xff] }
 0x27f   :  { %v1183_v30 = vmax.f32 %v3175_v55, 0.0  ;;  %v1184_v5 = vmax.f32 %v3179_v15, 0.0  ;;  %v1185_v52 = vmax.f32 %v3183_v14, 0.0  ;;  %v1186_v53 = vmax.f32 %v3187_v38, 0.0  ;;  %v3514_v15 = vld [vmem:[#allocation8_spill] sm:$0xff]  ;;  %v3515_v38 = vld [vmem:[#allocation2_spill] sm:$0xff] }
 0x280   :  { %v1187_v27 = vmax.f32 %v3191_v25, 0.0  ;;  %v1188_v16 = vmax.f32 %v3195_v44, 0.0  ;;  %v1189_v57 = vmax.f32 %v3511_v6, 0.0  ;;  %v1190_v18 = vmax.f32 %v3512_v35, 0.0  ;;  %v3516_v44 = vld [vmem:[#allocation3_spill] sm:$0xff]  ;;  %v3517_v35 = vld [vmem:[#allocation12_spill] sm:$0xff] }
 0x281   :  { %v1191_v55 = vmax.f32 %v3513_v22, 0.0  ;;  %v1192_v14 = vmax.f32 %v3514_v15, 0.0  ;;  %v1193_v25 = vmax.f32 %v3515_v38, 0.0  ;;  %v1194_v6 = vmax.f32 %v3516_v44, 0.0  ;;  %v3519_v15 = vld [vmem:[#allocation11_spill] sm:$0xff] }
 0x282   :  { %v3518_v22 = vmax.f32 %v3517_v35, 0.0  ;;  %v3520_v38 = vmax.f32 %v3519_v15, 0.0  ;;  %v3521_v35 = vld [vmem:[#allocation14_spill] sm:$0xff] }
 0x283   :  { %v3522_v15 = vmax.f32 %v3521_v35, 0.0 }
 0x284   :  { %v1719_v44 = vpack.c.bf16 %v3520_v38, %v3518_v22  ;;  %v3523_v22 = vld [vmem:[#allocation16_spill] sm:$0xff] }
 0x285   :  { %v3524_v38 = vmax.f32 %v3523_v22, 0.0  ;;  %v3525_v22 = vld [vmem:[#allocation13_spill] sm:$0xff] }
 0x286   :  { %1720 = vst [vmem:[%s3396_s5] sm:$0xff] %v1719_v44  }
 0x287   :  { %v1724_v35 = vpack.c.bf16 %v3524_v38, %v3522_v15  ;;  %v3526_v15 = vmax.f32 %v3525_v22, 0.0  ;;  %v1734_v22 = vpack.c.bf16 %v1138_v11, %v1137_v17  ;;  %v1749_v11 = vpack.c.bf16 %v1144_v42, %v1143_v31 }
 0x288   :  { %v1754_v17 = vpack.c.bf16 %v1146_v9, %v1145_v33  ;;  %v1769_v31 = vpack.c.bf16 %v1152_v48, %v1151_v63  ;;  %v1774_v33 = vpack.c.bf16 %v1154_v47, %v1153_v51  ;;  %v1779_v42 = vpack.c.bf16 %v1156_v61, %v1155_v49 }
 0x289   :  { %v1729_v38 = vpack.c.bf16 %v1136_v40, %v3526_v15  ;;  %v1739_v15 = vpack.c.bf16 %v1140_v62, %v1139_v24  ;;  %v1744_v40 = vpack.c.bf16 %v1142_v29, %v1141_v36  ;;  %1876 = vst [vmem:[%s3396_s5 + $0x8] sm:$0xff] %v1724_v35   ;;  %1878 = vst [vmem:[%s3396_s5 + $0x18] sm:$0xff] %v1734_v22  }
 0x28a   :  { %v1759_v24 = vpack.c.bf16 %v1148_v59, %v1147_v0  ;;  %v1764_v29 = vpack.c.bf16 %v1150_v45, %v1149_v2  ;;  %1881 = vst [vmem:[%s3396_s5 + $0x30] sm:$0xff] %v1749_v11   ;;  %1882 = vst [vmem:[%s3396_s5 + $0x38] sm:$0xff] %v1754_v17   ;;  %v1784_v62 = vpack.c.bf16 %v1158_v56, %v1157_v8 }
 0x28b   :  { %1877 = vst [vmem:[%s3396_s5 + $0x10] sm:$0xff] %v1729_v38   ;;  %1879 = vst [vmem:[%s3396_s5 + $0x20] sm:$0xff] %v1739_v15   ;;  %v1789_v36 = vpack.c.bf16 %v1160_v19, %v1159_v3  ;;  %v1794_v9 = vpack.c.bf16 %v1162_v13, %v1161_v28  ;;  %v1799_v0 = vpack.c.bf16 %v1164_v37, %v1163_v23 }
 0x28c   :  { %1880 = vst [vmem:[%s3396_s5 + $0x28] sm:$0xff] %v1744_v40   ;;  %1883 = vst [vmem:[%s3396_s5 + $0x40] sm:$0xff] %v1759_v24   ;;  %v1804_v59 = vpack.c.bf16 %v1166_v32, %v1165_v46  ;;  %v1809_v2 = vpack.c.bf16 %v1168_v60, %v1167_v41  ;;  %v1814_v45 = vpack.c.bf16 %v1170_v54, %v1169_v7 }
 0x28d   :  { %1884 = vst [vmem:[%s3396_s5 + $0x48] sm:$0xff] %v1764_v29   ;;  %1885 = vst [vmem:[%s3396_s5 + $0x50] sm:$0xff] %v1769_v31   ;;  %v1819_v63 = vpack.c.bf16 %v1172_v20, %v1171_v1  ;;  %v1824_v48 = vpack.c.bf16 %v1174_v12, %v1173_v34  ;;  %v1829_v51 = vpack.c.bf16 %v1176_v50, %v1175_v26 }
 0x28e   :  { %1886 = vst [vmem:[%s3396_s5 + $0x58] sm:$0xff] %v1774_v33   ;;  %1887 = vst [vmem:[%s3396_s5 + $0x60] sm:$0xff] %v1779_v42   ;;  %v1834_v47 = vpack.c.bf16 %v1178_v39, %v1177_v4  ;;  %v1839_v49 = vpack.c.bf16 %v1180_v21, %v1179_v58  ;;  %v1844_v61 = vpack.c.bf16 %v1182_v10, %v1181_v43 }
 0x28f   :  { %1888 = vst [vmem:[%s3396_s5 + $0x68] sm:$0xff] %v1784_v62   ;;  %1889 = vst [vmem:[%s3396_s5 + $0x70] sm:$0xff] %v1789_v36   ;;  %v1849_v8 = vpack.c.bf16 %v1184_v5, %v1183_v30  ;;  %v1854_v56 = vpack.c.bf16 %v1186_v53, %v1185_v52  ;;  %v1859_v3 = vpack.c.bf16 %v1188_v16, %v1187_v27 }
 0x290   :  { %1890 = vst [vmem:[%s3396_s5 + $0x78] sm:$0xff] %v1794_v9   ;;  %1891 = vst [vmem:[%s3396_s5 + $0x80] sm:$0xff] %v1799_v0   ;;  %v1864_v19 = vpack.c.bf16 %v1190_v18, %v1189_v57  ;;  %v1869_v28 = vpack.c.bf16 %v1192_v14, %v1191_v55  ;;  %v1874_v13 = vpack.c.bf16 %v1194_v6, %v1193_v25 }
 0x291   :  { %1892 = vst [vmem:[%s3396_s5 + $0x88] sm:$0xff] %v1804_v59   ;;  %1893 = vst [vmem:[%s3396_s5 + $0x90] sm:$0xff] %v1809_v2  }
 0x292   :  { %1894 = vst [vmem:[%s3396_s5 + $0x98] sm:$0xff] %v1814_v45   ;;  %1895 = vst [vmem:[%s3396_s5 + $0xa0] sm:$0xff] %v1819_v63  }
 0x293   :  { %1896 = vst [vmem:[%s3396_s5 + $0xa8] sm:$0xff] %v1824_v48   ;;  %1897 = vst [vmem:[%s3396_s5 + $0xb0] sm:$0xff] %v1829_v51  }
 0x294   :  { %1898 = vst [vmem:[%s3396_s5 + $0xb8] sm:$0xff] %v1834_v47   ;;  %1899 = vst [vmem:[%s3396_s5 + $0xc0] sm:$0xff] %v1839_v49  }
 0x295   :  { %1900 = vst [vmem:[%s3396_s5 + $0xc8] sm:$0xff] %v1844_v61   ;;  %1901 = vst [vmem:[%s3396_s5 + $0xd0] sm:$0xff] %v1849_v8  }
 0x296   :  { %1902 = vst [vmem:[%s3396_s5 + $0xd8] sm:$0xff] %v1854_v56   ;;  %1903 = vst [vmem:[%s3396_s5 + $0xe0] sm:$0xff] %v1859_v3  }
 0x297   :  { %1904 = vst [vmem:[%s3396_s5 + $0xe8] sm:$0xff] %v1864_v19   ;;  %1905 = vst [vmem:[%s3396_s5 + $0xf0] sm:$0xff] %v1869_v28  }
 0x298   :  { %1906 = vst [vmem:[%s3396_s5 + $0xf8] sm:$0xff] %v1874_v13  }

// kernel: generator_forward.9
= control target key start
LH: loop header
LB: loop body
LE: loop exit
PB: predicated region body
PF: predicated region fallthrough
CT: control target
= control target key end

     0   :  { %s879_s12 = smov 0   ;;  %s1014_s0 = inlined_call_operand.vmem [shape: bf16[2048,36], index: 0, kind: input, shape index: {}]   ;;  %s1015_s1 = inlined_call_operand.vmem [shape: bf16[36,128], index: 1, kind: input, shape index: {}]   ;;  %s1016_s2 = inlined_call_operand.vmem [shape: f32[1,128], index: 2, kind: input, shape index: {}]   ;;  %s1017_s3 = inlined_call_operand.vmem [shape: f32[2048,128], index: 3, kind: output, shape index: {}]  }
   0x1 LB: > { %s648_s13 = sadd.s32 4294967295, %s857_s12   ;;  %p652_p0 = scmp.ge.s32.totalorder %s857_s12, 1  ;;  %s857_s12 = sphi %s879_s12, %s13_s12  }
   0x2   : > { %p138_p1 = scmp.lt.s32.totalorder %s857_s12, 9 }
   0x4   : > { %p139_p2 = pnand %p652_p0, %p138_p1 }
   0x5   : > { %s653_s18 = sshll.u32 (!%p139_p2), %s648_s13, 5 }
   0x6   : > { %142 = sbr.rel (%p139_p2) target bundleno = 265 (0x109), region = 32  ;;  %p163_p3 = scmp.lt.s32.totalorder (!%p139_p2), %s653_s18, 255 }
   0xb   : > { %v768_v0 = vld [vmem:[%s1015_s1 + $0x10] ss:$0 sps:$4 sm:$0x33]   ;;  %vm363_vm0 = vcmask 1041408   ;;  %v769_v1 = vld [vmem:[%s1015_s1 + $0x8] sm:$0xff]   ;;  %v770_v3 = vld [vmem:[%s1015_s1] sm:$0xff]  }
   0xc   : > { %758 = vmatprep.subr.msk.bf16.mxu0 %vm363_vm0, %v768_v0  ;;  %759 = vmatprep.subr.msk.bf16.mxu1 %vm363_vm0, %v768_v0  ;;  %v365_v2 = vsel %vm363_vm0, %v768_v0, 0  ;;  %s1019_s18 = smov (!%p163_p3, %s653_s18), 255  ;;  %vm314_vm1 = vcmask 293888   ;;  %v939_v20 = vld [vmem:[%s1016_s2] ss:$0 sm:$0xff] }
   0xd   : > { %715 = vmatpush3.bf16.msra.mxu0 %v365_v2  ;;  %755 = vmatpush3.bf16.msra.mxu1 %v365_v2  ;;  %s654_s21 = sshll.u32 %s1019_s18, 2  ;;  %s656_s27 = sshll.u32 %s1019_s18, 3 }
   0xe   : > { %716 = vmatprep.subr.bf16.mxu0 %v769_v1  ;;  %753 = vmatprep.subr.bf16.mxu1 %v769_v1  ;;  %s902_s24 = scalar_lea.vmem %s1014_s0, %s654_s21  ;;  %s959_s30 = scalar_lea.vmem %s1017_s3, %s656_s27 }
   0xf   : > { %v771_v4 = vld [vmem:[%s902_s24] sm:$0xff]   ;;  %v773_v6 = vld [vmem:[%s902_s24 + $0x8] sm:$0xff]   ;;  %v775_v8 = vld [vmem:[%s902_s24 + $0x10] sm:$0xff]  }
  0x10   : > { %v772_v5 = vld [vmem:[%s902_s24 + $0x40] sm:$0xff]   ;;  %720 = vmatprep.mubr.msk.bf16.mxu0 %vm314_vm1, %v771_v4  ;;  %v774_v7 = vld [vmem:[%s902_s24 + $0x48] sm:$0xff]   ;;  %v776_v9 = vld [vmem:[%s902_s24 + $0x50] sm:$0xff]  }
  0x11   : > { %717 = vmatpush3.bf16.msra.mxu0 %v769_v1  ;;  %756 = vmatpush3.bf16.msra.mxu1 %v769_v1  ;;  %v777_v10 = vld [vmem:[%s902_s24 + $0x18] sm:$0xff]   ;;  %v779_v12 = vld [vmem:[%s902_s24 + $0x20] sm:$0xff]   ;;  %v781_v14 = vld [vmem:[%s902_s24 + $0x28] sm:$0xff]  }
  0x12   : > { %718 = vmatprep.subr.bf16.mxu0 %v770_v3  ;;  %754 = vmatprep.subr.bf16.mxu1 %v770_v3  ;;  %v778_v11 = vld [vmem:[%s902_s24 + $0x58] sm:$0xff]   ;;  %v780_v13 = vld [vmem:[%s902_s24 + $0x60] sm:$0xff]   ;;  %v782_v15 = vld [vmem:[%s902_s24 + $0x68] sm:$0xff]  }
  0x13   : > { %736 = vmatprep.mubr.msk.bf16.mxu1 %vm314_vm1, %v772_v5  ;;  %v783_v16 = vld [vmem:[%s902_s24 + $0x30] sm:$0xff]   ;;  %v785_v18 = vld [vmem:[%s902_s24 + $0x38] sm:$0xff]  }
  0x14   : > { %v784_v17 = vld [vmem:[%s902_s24 + $0x70] sm:$0xff]   ;;  %v786_v19 = vld [vmem:[%s902_s24 + $0x78] sm:$0xff]  }
  0x15   : > { %719 = vmatpush3.bf16.msra.mxu0 %v770_v3  ;;  %757 = vmatpush3.bf16.msra.mxu1 %v770_v3 }
  0x18   : > { %721 = vmatmul.mubr.msk.bf16.vlgmr.msra.gmra.mxu0 %vm314_vm1, %v773_v6  ;;  %737 = vmatmul.mubr.msk.bf16.vlgmr.msra.gmra.mxu1 %vm314_vm1, %v774_v7 }
  0x19   : > { %724 = vmatprep.mubr.msk.bf16.mxu0 %vm314_vm1, %v775_v8  ;;  %740 = vmatprep.mubr.msk.bf16.mxu1 %vm314_vm1, %v776_v9 }
  0x20   : > { %725 = vmatmul.mubr.msk.bf16.gmra.mxu0 %vm314_vm1, %v777_v10  ;;  %741 = vmatmul.mubr.msk.bf16.gmra.mxu1 %vm314_vm1, %v778_v11 }
  0x21   : > { %728 = vmatprep.mubr.msk.bf16.mxu0 %vm314_vm1, %v779_v12  ;;  %744 = vmatprep.mubr.msk.bf16.mxu1 %vm314_vm1, %v780_v13 }
  0x28   : > { %729 = vmatmul.mubr.msk.bf16.gmra.mxu0 %vm314_vm1, %v781_v14  ;;  %745 = vmatmul.mubr.msk.bf16.gmra.mxu1 %vm314_vm1, %v782_v15 }
  0x29   : > { %732 = vmatprep.mubr.msk.bf16.mxu0 %vm314_vm1, %v783_v16  ;;  %748 = vmatprep.mubr.msk.bf16.mxu1 %vm314_vm1, %v784_v17 }
  0x30   : > { %733 = vmatmul.mubr.msk.bf16.gmra.mxu0 %vm314_vm1, %v785_v18  ;;  %749 = vmatmul.mubr.msk.bf16.gmra.mxu1 %vm314_vm1, %v786_v19 }
  0xd8   : > { %v722_v21 = vpop.f32.mrf.mxu0  ;;  %v738_v22 = vpop.f32.mrf.mxu1 }
  0xd9   : > { %v410_v23 = vadd.f32 %v722_v21, %v939_v20  ;;  %v474_v24 = vadd.f32 %v738_v22, %v939_v20 }
  0xda   : > { %v401_v25 = vpop.f32.mrf.mxu0  ;;  %v465_v26 = vpop.f32.mrf.mxu1 }
  0xdb   : > { %787 = vtanh.f32 %v410_v23  ;;  %v402_v27 = vadd.f32 %v939_v20, %v401_v25  ;;  %v466_v28 = vadd.f32 %v939_v20, %v465_v26 }
  0xdc   : > { %789 = vtanh.f32 %v474_v24  ;;  %v723_v29 = vpop.f32.mrf.mxu0  ;;  %v739_v30 = vpop.f32.mrf.mxu1 }
  0xdd   : > { %791 = vtanh.f32 %v402_v27  ;;  %v413_v31 = vadd.f32 %v723_v29, %v939_v20  ;;  %v477_v32 = vadd.f32 %v739_v30, %v939_v20 }
  0xde   : > { %793 = vtanh.f32 %v466_v28  ;;  %v404_v33 = vpop.f32.mrf.mxu0  ;;  %v468_v34 = vpop.f32.mrf.mxu1 }
  0xdf   : > { %795 = vtanh.f32 %v413_v31  ;;  %v405_v35 = vadd.f32 %v939_v20, %v404_v33  ;;  %v469_v36 = vadd.f32 %v939_v20, %v468_v34 }
  0xe0   : > { %797 = vtanh.f32 %v477_v32  ;;  %v726_v37 = vpop.f32.mrf.mxu0  ;;  %v742_v38 = vpop.f32.mrf.mxu1 }
  0xe1   : > { %799 = vtanh.f32 %v405_v35  ;;  %v426_v39 = vadd.f32 %v726_v37, %v939_v20  ;;  %v490_v40 = vadd.f32 %v742_v38, %v939_v20 }
  0xe2   : > { %801 = vtanh.f32 %v469_v36  ;;  %v417_v41 = vpop.f32.mrf.mxu0  ;;  %v481_v42 = vpop.f32.mrf.mxu1 }
  0xe3   : > { %803 = vtanh.f32 %v426_v39  ;;  %v418_v43 = vadd.f32 %v939_v20, %v417_v41  ;;  %v482_v44 = vadd.f32 %v939_v20, %v481_v42 }
  0xe4   : > { %805 = vtanh.f32 %v490_v40  ;;  %v727_v45 = vpop.f32.mrf.mxu0  ;;  %v743_v46 = vpop.f32.mrf.mxu1 }
  0xe5   : > { %807 = vtanh.f32 %v418_v43  ;;  %v429_v47 = vadd.f32 %v727_v45, %v939_v20  ;;  %v493_v48 = vadd.f32 %v743_v46, %v939_v20 }
  0xe6   : > { %809 = vtanh.f32 %v482_v44  ;;  %v420_v49 = vpop.f32.mrf.mxu0  ;;  %v484_v50 = vpop.f32.mrf.mxu1 }
  0xe7   : > { %811 = vtanh.f32 %v429_v47  ;;  %v421_v51 = vadd.f32 %v939_v20, %v420_v49  ;;  %v485_v52 = vadd.f32 %v939_v20, %v484_v50 }
  0xe8   : > { %v788_v53 = vpop.eup %787  ;;  %813 = vtanh.f32 %v493_v48  ;;  %v730_v54 = vpop.f32.mrf.mxu0 }
  0xe9   : > { %v746_v55 = vpop.f32.mrf.mxu1  ;;  %v790_v56 = vpop.eup %789  ;;  %562 = vst [vmem:[%s959_s30 + $0x10] sm:$0xff] %v788_v53  ;;  %815 = vtanh.f32 %v421_v51  ;;  %v442_v57 = vadd.f32 %v730_v54, %v939_v20 }
  0xea   : > { %v506_v58 = vadd.f32 %v746_v55, %v939_v20  ;;  %v792_v59 = vpop.eup %791  ;;  %578 = vst [vmem:[%s959_s30 + $0x90] sm:$0xff] %v790_v56  ;;  %817 = vtanh.f32 %v485_v52  ;;  %v433_v60 = vpop.f32.mrf.mxu0 }
  0xeb   : > { %v497_v61 = vpop.f32.mrf.mxu1  ;;  %v794_v62 = vpop.eup %793  ;;  %560 = vst [vmem:[%s959_s30] sm:$0xff] %v792_v59  ;;  %819 = vtanh.f32 %v442_v57  ;;  %v434_v63 = vadd.f32 %v939_v20, %v433_v60 }
  0xec   : > { %v498_v0 = vadd.f32 %v939_v20, %v497_v61  ;;  %v796_v1 = vpop.eup %795  ;;  %576 = vst [vmem:[%s959_s30 + $0x80] sm:$0xff] %v794_v62  ;;  %821 = vtanh.f32 %v506_v58  ;;  %v731_v2 = vpop.f32.mrf.mxu0 }
  0xed   : > { %v747_v3 = vpop.f32.mrf.mxu1  ;;  %v798_v4 = vpop.eup %797  ;;  %563 = vst [vmem:[%s959_s30 + $0x18] sm:$0xff] %v796_v1  ;;  %823 = vtanh.f32 %v434_v63  ;;  %v445_v5 = vadd.f32 %v731_v2, %v939_v20 }
  0xee   : > { %v509_v6 = vadd.f32 %v747_v3, %v939_v20  ;;  %v800_v7 = vpop.eup %799  ;;  %579 = vst [vmem:[%s959_s30 + $0x98] sm:$0xff] %v798_v4  ;;  %825 = vtanh.f32 %v498_v0  ;;  %v436_v8 = vpop.f32.mrf.mxu0 }
  0xef   : > { %v500_v9 = vpop.f32.mrf.mxu1  ;;  %v802_v10 = vpop.eup %801  ;;  %561 = vst [vmem:[%s959_s30 + $0x8] sm:$0xff] %v800_v7  ;;  %827 = vtanh.f32 %v445_v5  ;;  %v437_v11 = vadd.f32 %v939_v20, %v436_v8 }
  0xf0   : > { %v501_v12 = vadd.f32 %v939_v20, %v500_v9  ;;  %v804_v13 = vpop.eup %803  ;;  %577 = vst [vmem:[%s959_s30 + $0x88] sm:$0xff] %v802_v10  ;;  %829 = vtanh.f32 %v509_v6  ;;  %v734_v14 = vpop.f32.mrf.mxu0 }
  0xf1   : > { %v750_v15 = vpop.f32.mrf.mxu1  ;;  %v806_v16 = vpop.eup %805  ;;  %566 = vst [vmem:[%s959_s30 + $0x30] sm:$0xff] %v804_v13  ;;  %831 = vtanh.f32 %v437_v11  ;;  %v458_v17 = vadd.f32 %v734_v14, %v939_v20 }
  0xf2   : > { %v522_v18 = vadd.f32 %v750_v15, %v939_v20  ;;  %v808_v19 = vpop.eup %807  ;;  %582 = vst [vmem:[%s959_s30 + $0xb0] sm:$0xff] %v806_v16  ;;  %833 = vtanh.f32 %v501_v12  ;;  %v449_v21 = vpop.f32.mrf.mxu0 }
  0xf3   : > { %v513_v22 = vpop.f32.mrf.mxu1  ;;  %v810_v23 = vpop.eup %809  ;;  %564 = vst [vmem:[%s959_s30 + $0x20] sm:$0xff] %v808_v19  ;;  %835 = vtanh.f32 %v458_v17  ;;  %v450_v24 = vadd.f32 %v939_v20, %v449_v21 }
  0xf4   : > { %v514_v25 = vadd.f32 %v939_v20, %v513_v22  ;;  %v812_v26 = vpop.eup %811  ;;  %580 = vst [vmem:[%s959_s30 + $0xa0] sm:$0xff] %v810_v23  ;;  %837 = vtanh.f32 %v522_v18  ;;  %v735_v27 = vpop.f32.mrf.mxu0 }
  0xf5   : > { %v751_v28 = vpop.f32.mrf.mxu1  ;;  %v814_v29 = vpop.eup %813  ;;  %567 = vst [vmem:[%s959_s30 + $0x38] sm:$0xff] %v812_v26  ;;  %839 = vtanh.f32 %v450_v24  ;;  %v461_v30 = vadd.f32 %v735_v27, %v939_v20 }
  0xf6   : > { %v525_v31 = vadd.f32 %v751_v28, %v939_v20  ;;  %v816_v32 = vpop.eup %815  ;;  %583 = vst [vmem:[%s959_s30 + $0xb8] sm:$0xff] %v814_v29  ;;  %841 = vtanh.f32 %v514_v25  ;;  %v452_v33 = vpop.f32.mrf.mxu0 }
  0xf7   : > { %v516_v34 = vpop.f32.mrf.mxu1  ;;  %v818_v35 = vpop.eup %817  ;;  %565 = vst [vmem:[%s959_s30 + $0x28] sm:$0xff] %v816_v32  ;;  %843 = vtanh.f32 %v461_v30  ;;  %v453_v36 = vadd.f32 %v939_v20, %v452_v33 }
  0xf8   : > { %v517_v37 = vadd.f32 %v939_v20, %v516_v34  ;;  %v820_v38 = vpop.eup %819  ;;  %581 = vst [vmem:[%s959_s30 + $0xa8] sm:$0xff] %v818_v35  ;;  %845 = vtanh.f32 %v525_v31 }
  0xf9   : > { %v822_v39 = vpop.eup %821  ;;  %570 = vst [vmem:[%s959_s30 + $0x50] sm:$0xff] %v820_v38  ;;  %847 = vtanh.f32 %v453_v36 }
  0xfa   : > { %v824_v40 = vpop.eup %823  ;;  %586 = vst [vmem:[%s959_s30 + $0xd0] sm:$0xff] %v822_v39  ;;  %849 = vtanh.f32 %v517_v37 }
  0xfb   : > { %v826_v41 = vpop.eup %825  ;;  %568 = vst [vmem:[%s959_s30 + $0x40] sm:$0xff] %v824_v40 }
  0xfc   : > { %v828_v42 = vpop.eup %827  ;;  %584 = vst [vmem:[%s959_s30 + $0xc0] sm:$0xff] %v826_v41 }
  0xfd   : > { %v830_v20 = vpop.eup %829  ;;  %571 = vst [vmem:[%s959_s30 + $0x58] sm:$0xff] %v828_v42 }
  0xfe   : > { %v832_v43 = vpop.eup %831  ;;  %587 = vst [vmem:[%s959_s30 + $0xd8] sm:$0xff] %v830_v20 }
  0xff   : > { %v834_v44 = vpop.eup %833  ;;  %569 = vst [vmem:[%s959_s30 + $0x48] sm:$0xff] %v832_v43 }
 0x100   : > { %v836_v45 = vpop.eup %835  ;;  %585 = vst [vmem:[%s959_s30 + $0xc8] sm:$0xff] %v834_v44 }
 0x101   : > { %v838_v46 = vpop.eup %837  ;;  %574 = vst [vmem:[%s959_s30 + $0x70] sm:$0xff] %v836_v45 }
 0x102   : > { %v840_v47 = vpop.eup %839  ;;  %590 = vst [vmem:[%s959_s30 + $0xf0] sm:$0xff] %v838_v46 }
 0x103   : > { %v842_v48 = vpop.eup %841  ;;  %572 = vst [vmem:[%s959_s30 + $0x60] sm:$0xff] %v840_v47 }
 0x104   : > { %v844_v49 = vpop.eup %843  ;;  %588 = vst [vmem:[%s959_s30 + $0xe0] sm:$0xff] %v842_v48 }
 0x105   : > { %v846_v50 = vpop.eup %845  ;;  %575 = vst [vmem:[%s959_s30 + $0x78] sm:$0xff] %v844_v49 }
 0x106   : > { %v848_v51 = vpop.eup %847  ;;  %591 = vst [vmem:[%s959_s30 + $0xf8] sm:$0xff] %v846_v50 }
 0x107   : > { %v850_v52 = vpop.eup %849  ;;  %573 = vst [vmem:[%s959_s30 + $0x68] sm:$0xff] %v848_v51 }
 0x108   : > { %589 = vst [vmem:[%s959_s30 + $0xe8] sm:$0xff] %v850_v52 }
 0x109 PF: > { %s13_s12 = sadd.s32 1, %s857_s12  }
 0x10a   : > { %p10_p4 = scmp.ge.s32.totalorder %s13_s12, 10  }
 0x10c   :  { %12 = sbr.rel (!%p10_p4) target bundleno = 1 (0x1), region = 62 }

</bundles_post_ra>
